<compile_context>
chip_gen: v7x
topology: tpu7x:2x2x1
jax: 0.10.0
libtpu: 0.0.40
codegen_flags: <defaults>
</compile_context>

<pallas_src>
import math
import functools

import jax
import jax.numpy as jnp
from jax import lax
from jax.experimental import pallas as pl
from jax.experimental.pallas import tpu as pltpu


_SMALL_C = 16  # contractions at or below this depth run on the VPU, not MXU


def _vmem_limit_bytes():
    cap = 64 * 1024 * 1024
    try:
        info = pltpu.get_tpu_info()
        cap = int(getattr(info, "vmem_capacity_bytes", cap))
    except Exception:
        pass
    # Leave headroom for double-buffered BlockSpec windows + compiler scratch:
    # ~48 MiB on v7x (64 MiB physical), ~96 MiB on v5e/v6e (128 MiB physical).
    return min(100 * 1024 * 1024, (cap * 3) // 4)


def _lrelu(z):
    return jnp.where(z >= 0, z, 0.2 * z)


def _mm(w, x):
    """out[d, n] = sum_c w[d, c] * x[c, n]  (f32 result).

    Small contraction depth (<= _SMALL_C): unrolled VPU broadcast-FMAs in f32
    (an MXU push would be >96% padding at e.g. C=4).  Otherwise: bf16 MXU
    matmul with f32 accumulation.
    """
    cin = w.shape[-1]
    if cin <= _SMALL_C:
        acc = w[:, 0:1].astype(jnp.float32) * x[0:1, :].astype(jnp.float32)
        for c in range(1, cin):
            acc = acc + (w[:, c:c + 1].astype(jnp.float32)
                         * x[c:c + 1, :].astype(jnp.float32))
        return acc
    return jnp.dot(w.astype(jnp.bfloat16), x.astype(jnp.bfloat16),
                   preferred_element_type=jnp.float32)


def _bcast_spec(shape):
    """BlockSpec for a weight/bias that is identical for every grid step."""
    n = len(shape)
    return pl.BlockSpec(shape, lambda b: (0,) * n)


# ----------------------------------------------------------------------------
# Fused kernel: LayerNorm + ESSAttn + conv path for one batch element,
# channel-major (channels on sublanes, H*W tokens on lanes).
# ----------------------------------------------------------------------------
def _convdown_kernel(x_ref, g_ref, bln_ref, wqkv_ref, bqkv_ref, wo_ref, bo_ref,
                     w1a_ref, w1b_ref, b1_ref, w2_ref, b2_ref, w3_ref, b3_ref,
                     o_ref, *, H, W, C):
    N = H * W
    x = x_ref[0]                                          # (C, N) f32, read once

    # ---- LayerNorm over channels (axis 0), eps=1e-5, biased variance -------
    mu = jnp.mean(x, axis=0, keepdims=True)
    xc = x - mu
    var = jnp.mean(xc * xc, axis=0, keepdims=True)
    xn = xc * lax.rsqrt(var + 1e-5) * g_ref[...] + bln_ref[...]

    # ---- ESSAttn ------------------------------------------------------------
    qkv = _mm(wqkv_ref[...], xn) + bqkv_ref[...]          # (3C, N)
    q = qkv[0:C, :]
    k = qkv[C:2 * C, :]
    v = qkv[2 * C:3 * C, :]

    q = q - jnp.mean(q, axis=0, keepdims=True)
    k = k - jnp.mean(k, axis=0, keepdims=True)
    q2 = q * q
    k2 = k * k
    q2s = jnp.sum(q2, axis=0, keepdims=True)              # (1, N)
    k2s = jnp.sum(k2, axis=0, keepdims=True)              # (1, N)

    # q path: per-token scale cancels in the dim=-1 normalize -> approx EUP.
    q2n = q2 * pl.reciprocal(q2s + 1e-7, approx=True)
    # k path: per-token scale does NOT cancel under the dim=-2 normalize.
    k2n = k2 / (k2s + 1e-7)

    # F.normalize(k2n, dim=-2): L2 over tokens (lane axis).
    k_ss = jnp.sum(k2n * k2n, axis=1, keepdims=True)      # (C, 1)
    k2n = k2n * lax.rsqrt(jnp.maximum(k_ss, 1e-24))       # == / max(norm, 1e-12)
    # F.normalize(q2n, dim=-1): L2 over channels (sublane axis).
    q_ss = jnp.sum(q2n * q2n, axis=0, keepdims=True)      # (1, N)
    q2n = q2n * lax.rsqrt(jnp.maximum(q_ss, 1e-24))

    # kv^T[d, c] = sum_n v[d, n] * k2n[c, n] — deep (N) contraction -> MXU.
    kvT = lax.dot_general(v.astype(jnp.bfloat16), k2n.astype(jnp.bfloat16),
                          (((1,), (1,)), ((), ())),
                          preferred_element_type=jnp.float32)      # (C, C)
    t2 = _mm(kvT, q2n)                                    # (C, N)
    attn = v + t2 * (1.0 / math.sqrt(N))
    attn = _mm(wo_ref[...], attn) + bo_ref[...]           # (C, N)

    # ---- conv path: fused concat + 1x1 conv:  W1 @ [attn; x] ---------------
    y1 = _lrelu(_mm(w1a_ref[...], attn) + _mm(w1b_ref[...], x) + b1_ref[...])

    # 3x3 conv, padding=1: 8 lane rolls (+/-1 for dx, +/-W for dy) + boundary
    # masks, 9 per-tap products accumulated in f32.  No padded scratch.
    lane = lax.broadcasted_iota(jnp.int32, (1, N), 1)
    col = lane % W
    col_lo = (col >= 1).astype(jnp.float32)               # dx = -1 valid
    col_hi = (col <= W - 2).astype(jnp.float32)           # dx = +1 valid
    row_lo = (lane >= W).astype(jnp.float32)              # dy = -1 valid
    row_hi = (lane < N - W).astype(jnp.float32)           # dy = +1 valid

    acc = None
    for dy in range(3):
        for dx in range(3):
            t = dy * 3 + dx
            dr, dc = dy - 1, dx - 1
            if dr == 0 and dc == 0:
                tap = y1
            else:
                delta = dr * W + dc                       # want tap[n] = y1[n+delta]
                tap = pltpu.roll(y1, shift=(-delta) % N, axis=1)
                mask = None
                if dr == -1:
                    mask = row_lo
                elif dr == 1:
                    mask = row_hi
                if dc == -1:
                    mask = col_lo if mask is None else mask * col_lo
                elif dc == 1:
                    mask = col_hi if mask is None else mask * col_hi
                tap = tap * mask
            term = _mm(w2_ref[t], tap)                    # (K, N)
            acc = term if acc is None else acc + term
    y2 = _lrelu(acc + b2_ref[...])                        # (K, N)

    # Final 1x1 conv (2C -> C) + residual shortcut.
    out = _mm(w3_ref[...], y2) + b3_ref[...]              # (C, N)
    o_ref[0] = out + x


# ----------------------------------------------------------------------------
# Wrapper: NCHW in / NCHW out.  No transposes needed (channel-major layout).
# ----------------------------------------------------------------------------
def convdown_forward(x_nchw, kp):
    B, C, H, W = x_nchw.shape
    N = H * W
    K = 2 * C
    x_cn = x_nchw.reshape(B, C, N)       # == patch_embed output, transposed
    kernel = functools.partial(_convdown_kernel, H=H, W=W, C=C)
    out = pl.pallas_call(
        kernel,
        out_shape=jax.ShapeDtypeStruct((B, C, N), jnp.float32),
        grid=(B,),
        in_specs=[
            pl.BlockSpec((1, C, N), lambda b: (b, 0, 0)),
            _bcast_spec((C, 1)), _bcast_spec((C, 1)),
            _bcast_spec((3 * C, C)), _bcast_spec((3 * C, 1)),
            _bcast_spec((C, C)), _bcast_spec((C, 1)),
            _bcast_spec((K, C)), _bcast_spec((K, C)), _bcast_spec((K, 1)),
            _bcast_spec((9, K, K)), _bcast_spec((K, 1)),
            _bcast_spec((C, K)), _bcast_spec((C, 1)),
        ],
        out_specs=pl.BlockSpec((1, C, N), lambda b: (b, 0, 0)),
        compiler_params=pltpu.CompilerParams(
            dimension_semantics=("parallel",),
            vmem_limit_bytes=_vmem_limit_bytes()),
    )(x_cn, kp["ln_g"], kp["ln_b"], kp["wqkv_t"], kp["bqkv"],
      kp["wo_t"], kp["bo"], kp["w1a"], kp["w1b"], kp["b1"],
      kp["w2r"], kp["b2"], kp["w3_t"], kp["b3"])
    return out.reshape(B, C, H, W)


def prepare_kernel_params(p):
    """Fuse / transpose weights once outside the kernel.

    Weights whose contraction depth exceeds _SMALL_C are pre-cast to bf16
    (MXU path, in-kernel cast becomes a no-op); tiny-depth weights stay f32
    for the exact VPU broadcast-FMA path.
    """
    C = p["wq"].shape[0]
    K = 2 * C

    def wdt(cin):
        return jnp.bfloat16 if cin > _SMALL_C else jnp.float32

    wqkv = jnp.concatenate([p["wq"], p["wk"], p["wv"]], axis=1)   # (C, 3C)
    w1t = p["w1"].T                                               # (Kout, Kin)
    return {
        "ln_g": p["ln_g"].reshape(C, 1),
        "ln_b": p["ln_b"].reshape(C, 1),
        "wqkv_t": wqkv.T.astype(wdt(C)),                          # (3C, C)
        "bqkv": jnp.concatenate([p["bq"], p["bk"], p["bv"]],
                                axis=1).reshape(3 * C, 1),
        "wo_t": p["wo"].T.astype(wdt(C)),                         # (C, C)
        "bo": p["bo"].reshape(C, 1),
        "w1a": w1t[:, :C].astype(wdt(C)),                         # (K, C) attn half
        "w1b": w1t[:, C:].astype(wdt(C)),                         # (K, C) shortcut half
        "b1": p["b1"].reshape(K, 1),
        # HWIO (3,3,Kin,Kout) -> (9, Kout, Kin); tap index t = ky*3 + kx.
        "w2r": jnp.transpose(p["w2"], (0, 1, 3, 2)).reshape(9, K, K).astype(wdt(K)),
        "b2": p["b2"].reshape(K, 1),
        "w3_t": p["w3"].T.astype(wdt(K)),                         # (C, K)
        "b3": p["b3"].reshape(C, 1),
    }


# ----------------------------------------------------------------------------
# Pure-JAX f32 reference (structurally different conv) for correctness check.
# ----------------------------------------------------------------------------
def _reference_forward(x_nchw, p):
    B, C, H, W = x_nchw.shape
    N = H * W
    xh = jnp.transpose(x_nchw, (0, 2, 3, 1))
    xe = xh.reshape(B, N, C)

    mu = jnp.mean(xe, -1, keepdims=True)
    var = jnp.mean((xe - mu) ** 2, -1, keepdims=True)
    xn = (xe - mu) / jnp.sqrt(var + 1e-5) * p["ln_g"][0] + p["ln_b"][0]

    q = xn @ p["wq"] + p["bq"][0]
    k = xn @ p["wk"] + p["bk"][0]
    v = xn @ p["wv"] + p["bv"][0]
    q = q - jnp.mean(q, -1, keepdims=True)
    k = k - jnp.mean(k, -1, keepdims=True)
    q2, k2 = q * q, k * k
    q2 = q2 / (jnp.sum(q2, -1, keepdims=True) + 1e-7)
    k2 = k2 / (jnp.sum(k2, -1, keepdims=True) + 1e-7)
    k2 = k2 / jnp.maximum(jnp.linalg.norm(k2, axis=-2, keepdims=True), 1e-12)
    q2 = q2 / jnp.maximum(jnp.linalg.norm(q2, axis=-1, keepdims=True), 1e-12)
    t2 = jnp.einsum('bnc,bmc,bmd->bnd', q2, k2, v) / math.sqrt(N)
    attn = (v + t2) @ p["wo"] + p["bo"][0]

    xa = attn.reshape(B, H, W, C)
    y = jnp.concatenate([xa, xh], axis=-1)

    lrelu = lambda z: jnp.where(z >= 0, z, 0.2 * z)
    y1 = lrelu(jnp.einsum('bhwi,io->bhwo', y, p["w1"]) + p["b1"][0])
    y2 = jax.lax.conv_general_dilated(
        y1, p["w2"], window_strides=(1, 1), padding='SAME',
        dimension_numbers=('NHWC', 'HWIO', 'NHWC'))
    y2 = lrelu(y2 + p["b2"][0])
    y3 = jnp.einsum('bhwi,io->bhwo', y2, p["w3"]) + p["b3"][0]
    out = y3 + xh
    return jnp.transpose(out, (0, 3, 1, 2))


def init_params(key, dim):
    C, K = dim, 2 * dim
    keys = jax.random.split(key, 16)
    n = lambda k, s, scale=0.1: scale * jax.random.normal(k, s, dtype=jnp.float32)
    return {
        # LayerNorm(dim)
        "ln_g": jnp.ones((1, C), jnp.float32),
        "ln_b": jnp.zeros((1, C), jnp.float32),
        # ESSAttn: Linear(dim, 3*dim) split into q/k/v pieces + Linear(dim, dim)
        "wq": n(keys[0], (C, C)), "bq": n(keys[1], (1, C), 0.01),
        "wk": n(keys[2], (C, C)), "bk": n(keys[3], (1, C), 0.01),
        "wv": n(keys[4], (C, C)), "bv": n(keys[5], (1, C), 0.01),
        "wo": n(keys[6], (C, C)), "bo": n(keys[7], (1, C), 0.01),
        # convd: Conv 1x1 (2C->2C), Conv 3x3 (2C->2C), Conv 1x1 (2C->C)
        # conv weights stored as (in, out) / (kh, kw, in, out) [HWIO].
        "w1": n(keys[8], (K, K)), "b1": n(keys[9], (1, K), 0.01),
        "w2": n(keys[10], (3, 3, K, K)), "b2": n(keys[11], (1, K), 0.01),
        "w3": n(keys[12], (K, C)), "b3": n(keys[13], (1, C), 0.01),
    }


if __name__ == "__main__":
    B, dim, H, W = 2, 4, 16, 16
    key = jax.random.PRNGKey(0)
    kx, kparam = jax.random.split(key)
    x = jax.random.normal(kx, (B, dim, H, W), dtype=jnp.float32)
    params = init_params(kparam, dim)
    kparams = prepare_kernel_params(params)

    out = jax.jit(convdown_forward)(x, kparams)
    out = jax.block_until_ready(out)

    ref = _reference_forward(x, params)
    assert out.shape == (B, dim, H, W)
    err = float(jnp.max(jnp.abs(out - ref)))
    # At the test shape all projections run exactly in f32 on the VPU; the only
    # reduced-precision pieces are the bf16 kv matmul (f32 accumulation) and the
    # approx EUP reciprocal on the q path (whose scale cancels).
    assert err < 2e-2, err

    print("KERNEL_OK")
</pallas_src>

<mosaic_0001>
module attributes {stable_mosaic.version = 11 : i64} {
  func.func @_convdown_kernel(%arg0: i32, %arg1: memref<1x4x256xf32, #tpu.memory_space<vmem>>, %arg2: memref<4x1xf32, #tpu.memory_space<vmem>>, %arg3: memref<4x1xf32, #tpu.memory_space<vmem>>, %arg4: memref<12x4xf32, #tpu.memory_space<vmem>>, %arg5: memref<12x1xf32, #tpu.memory_space<vmem>>, %arg6: memref<4x4xf32, #tpu.memory_space<vmem>>, %arg7: memref<4x1xf32, #tpu.memory_space<vmem>>, %arg8: memref<8x4xf32, #tpu.memory_space<vmem>>, %arg9: memref<8x4xf32, #tpu.memory_space<vmem>>, %arg10: memref<8x1xf32, #tpu.memory_space<vmem>>, %arg11: memref<9x8x8xf32, #tpu.memory_space<vmem>>, %arg12: memref<8x1xf32, #tpu.memory_space<vmem>>, %arg13: memref<4x8xf32, #tpu.memory_space<vmem>>, %arg14: memref<4x1xf32, #tpu.memory_space<vmem>>, %arg15: memref<1x4x256xf32, #tpu.memory_space<vmem>>) attributes {dimension_semantics = [#tpu.dimension_semantics<parallel>], iteration_bounds = array<i64: 2>, scalar_prefetch = 0 : i64, scratch_operands = 0 : i64, tpu.core_type = #tpu.core_type<tc>, window_params = [{transform_indices = @transform_0, window_bounds = array<i64: 1, 4, 256>}, {pipeline_mode = #tpu.pipeline_mode<synchronous>, transform_indices = @transform_1, window_bounds = array<i64: 4, 1>}, {pipeline_mode = #tpu.pipeline_mode<synchronous>, transform_indices = @transform_2, window_bounds = array<i64: 4, 1>}, {pipeline_mode = #tpu.pipeline_mode<synchronous>, transform_indices = @transform_3, window_bounds = array<i64: 12, 4>}, {pipeline_mode = #tpu.pipeline_mode<synchronous>, transform_indices = @transform_4, window_bounds = array<i64: 12, 1>}, {pipeline_mode = #tpu.pipeline_mode<synchronous>, transform_indices = @transform_5, window_bounds = array<i64: 4, 4>}, {pipeline_mode = #tpu.pipeline_mode<synchronous>, transform_indices = @transform_6, window_bounds = array<i64: 4, 1>}, {pipeline_mode = #tpu.pipeline_mode<synchronous>, transform_indices = @transform_7, window_bounds = array<i64: 8, 4>}, {pipeline_mode = #tpu.pipeline_mode<synchronous>, transform_indices = @transform_8, window_bounds = array<i64: 8, 4>}, {pipeline_mode = #tpu.pipeline_mode<synchronous>, transform_indices = @transform_9, window_bounds = array<i64: 8, 1>}, {pipeline_mode = #tpu.pipeline_mode<synchronous>, transform_indices = @transform_10, window_bounds = array<i64: 9, 8, 8>}, {pipeline_mode = #tpu.pipeline_mode<synchronous>, transform_indices = @transform_11, window_bounds = array<i64: 8, 1>}, {pipeline_mode = #tpu.pipeline_mode<synchronous>, transform_indices = @transform_12, window_bounds = array<i64: 4, 8>}, {pipeline_mode = #tpu.pipeline_mode<synchronous>, transform_indices = @transform_13, window_bounds = array<i64: 4, 1>}, {transform_indices = @transform_14, window_bounds = array<i64: 1, 4, 256>}]} {
    %c0 = arith.constant 0 : index
    %c0_0 = arith.constant 0 : index
    %c0_1 = arith.constant 0 : index
    %0 = vector.load %arg1[%c0, %c0_0, %c0_1] : memref<1x4x256xf32, #tpu.memory_space<vmem>>, vector<1x4x256xf32>
    %1 = vector.shape_cast %0 : vector<1x4x256xf32> to vector<4x256xf32>
    %cst = arith.constant dense<0.000000e+00> : vector<256xf32>
    %2 = vector.multi_reduction <add>, %1, %cst [0] : vector<4x256xf32> to vector<256xf32>
    %3 = vector.shape_cast %2 : vector<256xf32> to vector<1x256xf32>
    %cst_2 = arith.constant 4.000000e+00 : f32
    %4 = vector.broadcast %cst_2 : f32 to vector<1x256xf32>
    %5 = arith.divf %3, %4 : vector<1x256xf32>
    %6 = vector.broadcast %5 : vector<1x256xf32> to vector<4x256xf32>
    %7 = arith.subf %1, %6 : vector<4x256xf32>
    %8 = arith.mulf %7, %7 : vector<4x256xf32>
    %cst_3 = arith.constant dense<0.000000e+00> : vector<256xf32>
    %9 = vector.multi_reduction <add>, %8, %cst_3 [0] : vector<4x256xf32> to vector<256xf32>
    %10 = vector.shape_cast %9 : vector<256xf32> to vector<1x256xf32>
    %cst_4 = arith.constant 4.000000e+00 : f32
    %11 = vector.broadcast %cst_4 : f32 to vector<1x256xf32>
    %12 = arith.divf %10, %11 : vector<1x256xf32>
    %cst_5 = arith.constant 9.99999974E-6 : f32
    %13 = vector.broadcast %cst_5 : f32 to vector<1x256xf32>
    %14 = arith.addf %12, %13 : vector<1x256xf32>
    %15 = math.rsqrt %14 : vector<1x256xf32>
    %16 = vector.broadcast %15 : vector<1x256xf32> to vector<4x256xf32>
    %17 = arith.mulf %7, %16 : vector<4x256xf32>
    %c0_6 = arith.constant 0 : index
    %c0_7 = arith.constant 0 : index
    %18 = vector.load %arg2[%c0_6, %c0_7] : memref<4x1xf32, #tpu.memory_space<vmem>>, vector<4x1xf32>
    %19 = vector.broadcast %18 : vector<4x1xf32> to vector<4x256xf32>
    %20 = arith.mulf %17, %19 : vector<4x256xf32>
    %c0_8 = arith.constant 0 : index
    %c0_9 = arith.constant 0 : index
    %21 = vector.load %arg3[%c0_8, %c0_9] : memref<4x1xf32, #tpu.memory_space<vmem>>, vector<4x1xf32>
    %22 = vector.broadcast %21 : vector<4x1xf32> to vector<4x256xf32>
    %23 = arith.addf %20, %22 : vector<4x256xf32>
    %c0_10 = arith.constant 0 : index
    %c0_11 = arith.constant 0 : index
    %24 = vector.load %arg4[%c0_10, %c0_11] : memref<12x4xf32, #tpu.memory_space<vmem>>, vector<12x4xf32>
    %25 = vector.extract_strided_slice %24 {offsets = [0, 0], sizes = [12, 1], strides = [1, 1]} : vector<12x4xf32> to vector<12x1xf32>
    %26 = vector.extract_strided_slice %23 {offsets = [0, 0], sizes = [1, 256], strides = [1, 1]} : vector<4x256xf32> to vector<1x256xf32>
    %27 = vector.broadcast %25 : vector<12x1xf32> to vector<12x256xf32>
    %28 = vector.broadcast %26 : vector<1x256xf32> to vector<12x256xf32>
    %29 = arith.mulf %27, %28 : vector<12x256xf32>
    %30 = vector.extract_strided_slice %24 {offsets = [0, 1], sizes = [12, 1], strides = [1, 1]} : vector<12x4xf32> to vector<12x1xf32>
    %31 = vector.extract_strided_slice %23 {offsets = [1, 0], sizes = [1, 256], strides = [1, 1]} : vector<4x256xf32> to vector<1x256xf32>
    %32 = vector.broadcast %30 : vector<12x1xf32> to vector<12x256xf32>
    %33 = vector.broadcast %31 : vector<1x256xf32> to vector<12x256xf32>
    %34 = arith.mulf %32, %33 : vector<12x256xf32>
    %35 = arith.addf %29, %34 : vector<12x256xf32>
    %36 = vector.extract_strided_slice %24 {offsets = [0, 2], sizes = [12, 1], strides = [1, 1]} : vector<12x4xf32> to vector<12x1xf32>
    %37 = vector.extract_strided_slice %23 {offsets = [2, 0], sizes = [1, 256], strides = [1, 1]} : vector<4x256xf32> to vector<1x256xf32>
    %38 = vector.broadcast %36 : vector<12x1xf32> to vector<12x256xf32>
    %39 = vector.broadcast %37 : vector<1x256xf32> to vector<12x256xf32>
    %40 = arith.mulf %38, %39 : vector<12x256xf32>
    %41 = arith.addf %35, %40 : vector<12x256xf32>
    %42 = vector.extract_strided_slice %24 {offsets = [0, 3], sizes = [12, 1], strides = [1, 1]} : vector<12x4xf32> to vector<12x1xf32>
    %43 = vector.extract_strided_slice %23 {offsets = [3, 0], sizes = [1, 256], strides = [1, 1]} : vector<4x256xf32> to vector<1x256xf32>
    %44 = vector.broadcast %42 : vector<12x1xf32> to vector<12x256xf32>
    %45 = vector.broadcast %43 : vector<1x256xf32> to vector<12x256xf32>
    %46 = arith.mulf %44, %45 : vector<12x256xf32>
    %47 = arith.addf %41, %46 : vector<12x256xf32>
    %c0_12 = arith.constant 0 : index
    %c0_13 = arith.constant 0 : index
    %48 = vector.load %arg5[%c0_12, %c0_13] : memref<12x1xf32, #tpu.memory_space<vmem>>, vector<12x1xf32>
    %49 = vector.broadcast %48 : vector<12x1xf32> to vector<12x256xf32>
    %50 = arith.addf %47, %49 : vector<12x256xf32>
    %51 = vector.extract_strided_slice %50 {offsets = [0, 0], sizes = [4, 256], strides = [1, 1]} : vector<12x256xf32> to vector<4x256xf32>
    %52 = vector.extract_strided_slice %50 {offsets = [4, 0], sizes = [4, 256], strides = [1, 1]} : vector<12x256xf32> to vector<4x256xf32>
    %53 = vector.extract_strided_slice %50 {offsets = [8, 0], sizes = [4, 256], strides = [1, 1]} : vector<12x256xf32> to vector<4x256xf32>
    %cst_14 = arith.constant dense<0.000000e+00> : vector<256xf32>
    %54 = vector.multi_reduction <add>, %51, %cst_14 [0] : vector<4x256xf32> to vector<256xf32>
    %55 = vector.shape_cast %54 : vector<256xf32> to vector<1x256xf32>
    %cst_15 = arith.constant 4.000000e+00 : f32
    %56 = vector.broadcast %cst_15 : f32 to vector<1x256xf32>
    %57 = arith.divf %55, %56 : vector<1x256xf32>
    %58 = vector.broadcast %57 : vector<1x256xf32> to vector<4x256xf32>
    %59 = arith.subf %51, %58 : vector<4x256xf32>
    %cst_16 = arith.constant dense<0.000000e+00> : vector<256xf32>
    %60 = vector.multi_reduction <add>, %52, %cst_16 [0] : vector<4x256xf32> to vector<256xf32>
    %61 = vector.shape_cast %60 : vector<256xf32> to vector<1x256xf32>
    %cst_17 = arith.constant 4.000000e+00 : f32
    %62 = vector.broadcast %cst_17 : f32 to vector<1x256xf32>
    %63 = arith.divf %61, %62 : vector<1x256xf32>
    %64 = vector.broadcast %63 : vector<1x256xf32> to vector<4x256xf32>
    %65 = arith.subf %52, %64 : vector<4x256xf32>
    %66 = arith.mulf %59, %59 : vector<4x256xf32>
    %67 = arith.mulf %65, %65 : vector<4x256xf32>
    %cst_18 = arith.constant dense<0.000000e+00> : vector<256xf32>
    %68 = vector.multi_reduction <add>, %66, %cst_18 [0] : vector<4x256xf32> to vector<256xf32>
    %69 = vector.shape_cast %68 : vector<256xf32> to vector<1x256xf32>
    %cst_19 = arith.constant dense<0.000000e+00> : vector<256xf32>
    %70 = vector.multi_reduction <add>, %67, %cst_19 [0] : vector<4x256xf32> to vector<256xf32>
    %71 = vector.shape_cast %70 : vector<256xf32> to vector<1x256xf32>
    %cst_20 = arith.constant 1.000000e-07 : f32
    %72 = vector.broadcast %cst_20 : f32 to vector<1x256xf32>
    %73 = arith.addf %69, %72 : vector<1x256xf32>
    %74 = tpu.reciprocal %73 {approx = true} : vector<1x256xf32> -> vector<1x256xf32>
    %75 = vector.broadcast %74 : vector<1x256xf32> to vector<4x256xf32>
    %76 = arith.mulf %66, %75 : vector<4x256xf32>
    %cst_21 = arith.constant 1.000000e-07 : f32
    %77 = vector.broadcast %cst_21 : f32 to vector<1x256xf32>
    %78 = arith.addf %71, %77 : vector<1x256xf32>
    %79 = vector.broadcast %78 : vector<1x256xf32> to vector<4x256xf32>
    %80 = arith.divf %67, %79 : vector<4x256xf32>
    %81 = arith.mulf %80, %80 : vector<4x256xf32>
    %cst_22 = arith.constant dense<0.000000e+00> : vector<4xf32>
    %82 = vector.multi_reduction <add>, %81, %cst_22 [1] : vector<4x256xf32> to vector<4xf32>
    %83 = vector.shape_cast %82 : vector<4xf32> to vector<4x1xf32>
    %cst_23 = arith.constant 1.000000e-24 : f32
    %84 = vector.broadcast %cst_23 : f32 to vector<4x1xf32>
    %85 = arith.maximumf %83, %84 : vector<4x1xf32>
    %86 = math.rsqrt %85 : vector<4x1xf32>
    %87 = vector.broadcast %86 : vector<4x1xf32> to vector<4x256xf32>
    %88 = arith.mulf %80, %87 : vector<4x256xf32>
    %89 = arith.mulf %76, %76 : vector<4x256xf32>
    %cst_24 = arith.constant dense<0.000000e+00> : vector<256xf32>
    %90 = vector.multi_reduction <add>, %89, %cst_24 [0] : vector<4x256xf32> to vector<256xf32>
    %91 = vector.shape_cast %90 : vector<256xf32> to vector<1x256xf32>
    %cst_25 = arith.constant 1.000000e-24 : f32
    %92 = vector.broadcast %cst_25 : f32 to vector<1x256xf32>
    %93 = arith.maximumf %91, %92 : vector<1x256xf32>
    %94 = math.rsqrt %93 : vector<1x256xf32>
    %95 = vector.broadcast %94 : vector<1x256xf32> to vector<4x256xf32>
    %96 = arith.mulf %76, %95 : vector<4x256xf32>
    %97 = arith.truncf %53 : vector<4x256xf32> to vector<4x256xbf16>
    %98 = arith.truncf %88 : vector<4x256xf32> to vector<4x256xbf16>
    %cst_26 = arith.constant dense<0.000000e+00> : vector<4x4xf32>
    %99 = tpu.matmul %97, %98, %cst_26 {dimension_numbers = #tpu.dot_dimension_numbers<[1], [1], [0], [0], [0, 0, 1, 0], [], []>} : vector<4x256xbf16>, vector<4x256xbf16>, vector<4x4xf32> -> vector<4x4xf32>
    %100 = vector.extract_strided_slice %99 {offsets = [0, 0], sizes = [4, 1], strides = [1, 1]} : vector<4x4xf32> to vector<4x1xf32>
    %101 = vector.extract_strided_slice %96 {offsets = [0, 0], sizes = [1, 256], strides = [1, 1]} : vector<4x256xf32> to vector<1x256xf32>
    %102 = vector.broadcast %100 : vector<4x1xf32> to vector<4x256xf32>
    %103 = vector.broadcast %101 : vector<1x256xf32> to vector<4x256xf32>
    %104 = arith.mulf %102, %103 : vector<4x256xf32>
    %105 = vector.extract_strided_slice %99 {offsets = [0, 1], sizes = [4, 1], strides = [1, 1]} : vector<4x4xf32> to vector<4x1xf32>
    %106 = vector.extract_strided_slice %96 {offsets = [1, 0], sizes = [1, 256], strides = [1, 1]} : vector<4x256xf32> to vector<1x256xf32>
    %107 = vector.broadcast %105 : vector<4x1xf32> to vector<4x256xf32>
    %108 = vector.broadcast %106 : vector<1x256xf32> to vector<4x256xf32>
    %109 = arith.mulf %107, %108 : vector<4x256xf32>
    %110 = arith.addf %104, %109 : vector<4x256xf32>
    %111 = vector.extract_strided_slice %99 {offsets = [0, 2], sizes = [4, 1], strides = [1, 1]} : vector<4x4xf32> to vector<4x1xf32>
    %112 = vector.extract_strided_slice %96 {offsets = [2, 0], sizes = [1, 256], strides = [1, 1]} : vector<4x256xf32> to vector<1x256xf32>
    %113 = vector.broadcast %111 : vector<4x1xf32> to vector<4x256xf32>
    %114 = vector.broadcast %112 : vector<1x256xf32> to vector<4x256xf32>
    %115 = arith.mulf %113, %114 : vector<4x256xf32>
    %116 = arith.addf %110, %115 : vector<4x256xf32>
    %117 = vector.extract_strided_slice %99 {offsets = [0, 3], sizes = [4, 1], strides = [1, 1]} : vector<4x4xf32> to vector<4x1xf32>
    %118 = vector.extract_strided_slice %96 {offsets = [3, 0], sizes = [1, 256], strides = [1, 1]} : vector<4x256xf32> to vector<1x256xf32>
    %119 = vector.broadcast %117 : vector<4x1xf32> to vector<4x256xf32>
    %120 = vector.broadcast %118 : vector<1x256xf32> to vector<4x256xf32>
    %121 = arith.mulf %119, %120 : vector<4x256xf32>
    %122 = arith.addf %116, %121 : vector<4x256xf32>
    %cst_27 = arith.constant 6.250000e-02 : f32
    %123 = vector.broadcast %cst_27 : f32 to vector<4x256xf32>
    %124 = arith.mulf %122, %123 : vector<4x256xf32>
    %125 = arith.addf %53, %124 : vector<4x256xf32>
    %c0_28 = arith.constant 0 : index
    %c0_29 = arith.constant 0 : index
    %126 = vector.load %arg6[%c0_28, %c0_29] : memref<4x4xf32, #tpu.memory_space<vmem>>, vector<4x4xf32>
    %127 = vector.extract_strided_slice %126 {offsets = [0, 0], sizes = [4, 1], strides = [1, 1]} : vector<4x4xf32> to vector<4x1xf32>
    %128 = vector.extract_strided_slice %125 {offsets = [0, 0], sizes = [1, 256], strides = [1, 1]} : vector<4x256xf32> to vector<1x256xf32>
    %129 = vector.broadcast %127 : vector<4x1xf32> to vector<4x256xf32>
    %130 = vector.broadcast %128 : vector<1x256xf32> to vector<4x256xf32>
    %131 = arith.mulf %129, %130 : vector<4x256xf32>
    %132 = vector.extract_strided_slice %126 {offsets = [0, 1], sizes = [4, 1], strides = [1, 1]} : vector<4x4xf32> to vector<4x1xf32>
    %133 = vector.extract_strided_slice %125 {offsets = [1, 0], sizes = [1, 256], strides = [1, 1]} : vector<4x256xf32> to vector<1x256xf32>
    %134 = vector.broadcast %132 : vector<4x1xf32> to vector<4x256xf32>
    %135 = vector.broadcast %133 : vector<1x256xf32> to vector<4x256xf32>
    %136 = arith.mulf %134, %135 : vector<4x256xf32>
    %137 = arith.addf %131, %136 : vector<4x256xf32>
    %138 = vector.extract_strided_slice %126 {offsets = [0, 2], sizes = [4, 1], strides = [1, 1]} : vector<4x4xf32> to vector<4x1xf32>
    %139 = vector.extract_strided_slice %125 {offsets = [2, 0], sizes = [1, 256], strides = [1, 1]} : vector<4x256xf32> to vector<1x256xf32>
    %140 = vector.broadcast %138 : vector<4x1xf32> to vector<4x256xf32>
    %141 = vector.broadcast %139 : vector<1x256xf32> to vector<4x256xf32>
    %142 = arith.mulf %140, %141 : vector<4x256xf32>
    %143 = arith.addf %137, %142 : vector<4x256xf32>
    %144 = vector.extract_strided_slice %126 {offsets = [0, 3], sizes = [4, 1], strides = [1, 1]} : vector<4x4xf32> to vector<4x1xf32>
    %145 = vector.extract_strided_slice %125 {offsets = [3, 0], sizes = [1, 256], strides = [1, 1]} : vector<4x256xf32> to vector<1x256xf32>
    %146 = vector.broadcast %144 : vector<4x1xf32> to vector<4x256xf32>
    %147 = vector.broadcast %145 : vector<1x256xf32> to vector<4x256xf32>
    %148 = arith.mulf %146, %147 : vector<4x256xf32>
    %149 = arith.addf %143, %148 : vector<4x256xf32>
    %c0_30 = arith.constant 0 : index
    %c0_31 = arith.constant 0 : index
    %150 = vector.load %arg7[%c0_30, %c0_31] : memref<4x1xf32, #tpu.memory_space<vmem>>, vector<4x1xf32>
    %151 = vector.broadcast %150 : vector<4x1xf32> to vector<4x256xf32>
    %152 = arith.addf %149, %151 : vector<4x256xf32>
    %c0_32 = arith.constant 0 : index
    %c0_33 = arith.constant 0 : index
    %153 = vector.load %arg8[%c0_32, %c0_33] : memref<8x4xf32, #tpu.memory_space<vmem>>, vector<8x4xf32>
    %154 = vector.extract_strided_slice %153 {offsets = [0, 0], sizes = [8, 1], strides = [1, 1]} : vector<8x4xf32> to vector<8x1xf32>
    %155 = vector.extract_strided_slice %152 {offsets = [0, 0], sizes = [1, 256], strides = [1, 1]} : vector<4x256xf32> to vector<1x256xf32>
    %156 = vector.broadcast %154 : vector<8x1xf32> to vector<8x256xf32>
    %157 = vector.broadcast %155 : vector<1x256xf32> to vector<8x256xf32>
    %158 = arith.mulf %156, %157 : vector<8x256xf32>
    %159 = vector.extract_strided_slice %153 {offsets = [0, 1], sizes = [8, 1], strides = [1, 1]} : vector<8x4xf32> to vector<8x1xf32>
    %160 = vector.extract_strided_slice %152 {offsets = [1, 0], sizes = [1, 256], strides = [1, 1]} : vector<4x256xf32> to vector<1x256xf32>
    %161 = vector.broadcast %159 : vector<8x1xf32> to vector<8x256xf32>
    %162 = vector.broadcast %160 : vector<1x256xf32> to vector<8x256xf32>
    %163 = arith.mulf %161, %162 : vector<8x256xf32>
    %164 = arith.addf %158, %163 : vector<8x256xf32>
    %165 = vector.extract_strided_slice %153 {offsets = [0, 2], sizes = [8, 1], strides = [1, 1]} : vector<8x4xf32> to vector<8x1xf32>
    %166 = vector.extract_strided_slice %152 {offsets = [2, 0], sizes = [1, 256], strides = [1, 1]} : vector<4x256xf32> to vector<1x256xf32>
    %167 = vector.broadcast %165 : vector<8x1xf32> to vector<8x256xf32>
    %168 = vector.broadcast %166 : vector<1x256xf32> to vector<8x256xf32>
    %169 = arith.mulf %167, %168 : vector<8x256xf32>
    %170 = arith.addf %164, %169 : vector<8x256xf32>
    %171 = vector.extract_strided_slice %153 {offsets = [0, 3], sizes = [8, 1], strides = [1, 1]} : vector<8x4xf32> to vector<8x1xf32>
    %172 = vector.extract_strided_slice %152 {offsets = [3, 0], sizes = [1, 256], strides = [1, 1]} : vector<4x256xf32> to vector<1x256xf32>
    %173 = vector.broadcast %171 : vector<8x1xf32> to vector<8x256xf32>
    %174 = vector.broadcast %172 : vector<1x256xf32> to vector<8x256xf32>
    %175 = arith.mulf %173, %174 : vector<8x256xf32>
    %176 = arith.addf %170, %175 : vector<8x256xf32>
    %c0_34 = arith.constant 0 : index
    %c0_35 = arith.constant 0 : index
    %177 = vector.load %arg9[%c0_34, %c0_35] : memref<8x4xf32, #tpu.memory_space<vmem>>, vector<8x4xf32>
    %178 = vector.extract_strided_slice %177 {offsets = [0, 0], sizes = [8, 1], strides = [1, 1]} : vector<8x4xf32> to vector<8x1xf32>
    %179 = vector.extract_strided_slice %1 {offsets = [0, 0], sizes = [1, 256], strides = [1, 1]} : vector<4x256xf32> to vector<1x256xf32>
    %180 = vector.broadcast %178 : vector<8x1xf32> to vector<8x256xf32>
    %181 = vector.broadcast %179 : vector<1x256xf32> to vector<8x256xf32>
    %182 = arith.mulf %180, %181 : vector<8x256xf32>
    %183 = vector.extract_strided_slice %177 {offsets = [0, 1], sizes = [8, 1], strides = [1, 1]} : vector<8x4xf32> to vector<8x1xf32>
    %184 = vector.extract_strided_slice %1 {offsets = [1, 0], sizes = [1, 256], strides = [1, 1]} : vector<4x256xf32> to vector<1x256xf32>
    %185 = vector.broadcast %183 : vector<8x1xf32> to vector<8x256xf32>
    %186 = vector.broadcast %184 : vector<1x256xf32> to vector<8x256xf32>
    %187 = arith.mulf %185, %186 : vector<8x256xf32>
    %188 = arith.addf %182, %187 : vector<8x256xf32>
    %189 = vector.extract_strided_slice %177 {offsets = [0, 2], sizes = [8, 1], strides = [1, 1]} : vector<8x4xf32> to vector<8x1xf32>
    %190 = vector.extract_strided_slice %1 {offsets = [2, 0], sizes = [1, 256], strides = [1, 1]} : vector<4x256xf32> to vector<1x256xf32>
    %191 = vector.broadcast %189 : vector<8x1xf32> to vector<8x256xf32>
    %192 = vector.broadcast %190 : vector<1x256xf32> to vector<8x256xf32>
    %193 = arith.mulf %191, %192 : vector<8x256xf32>
    %194 = arith.addf %188, %193 : vector<8x256xf32>
    %195 = vector.extract_strided_slice %177 {offsets = [0, 3], sizes = [8, 1], strides = [1, 1]} : vector<8x4xf32> to vector<8x1xf32>
    %196 = vector.extract_strided_slice %1 {offsets = [3, 0], sizes = [1, 256], strides = [1, 1]} : vector<4x256xf32> to vector<1x256xf32>
    %197 = vector.broadcast %195 : vector<8x1xf32> to vector<8x256xf32>
    %198 = vector.broadcast %196 : vector<1x256xf32> to vector<8x256xf32>
    %199 = arith.mulf %197, %198 : vector<8x256xf32>
    %200 = arith.addf %194, %199 : vector<8x256xf32>
    %201 = arith.addf %176, %200 : vector<8x256xf32>
    %c0_36 = arith.constant 0 : index
    %c0_37 = arith.constant 0 : index
    %202 = vector.load %arg10[%c0_36, %c0_37] : memref<8x1xf32, #tpu.memory_space<vmem>>, vector<8x1xf32>
    %203 = vector.broadcast %202 : vector<8x1xf32> to vector<8x256xf32>
    %204 = arith.addf %201, %203 : vector<8x256xf32>
    %cst_38 = arith.constant 0.000000e+00 : f32
    %205 = vector.broadcast %cst_38 : f32 to vector<8x256xf32>
    %206 = arith.cmpf oge, %204, %205 : vector<8x256xf32>
    %cst_39 = arith.constant 2.000000e-01 : f32
    %207 = vector.broadcast %cst_39 : f32 to vector<8x256xf32>
    %208 = arith.mulf %207, %204 : vector<8x256xf32>
    %209 = arith.select %206, %204, %208 : vector<8x256xi1>, vector<8x256xf32>
    %210 = tpu.iota {dimensions = array<i32: 1>} : vector<1x256xi32>
    %c16_i32 = arith.constant 16 : i32
    %c0_i32 = arith.constant 0 : i32
    %211 = arith.cmpi eq, %c16_i32, %c0_i32 : i32
    %c1_i32 = arith.constant 1 : i32
    %212 = arith.select %211, %c1_i32, %c16_i32 : i32
    %213 = vector.broadcast %212 : i32 to vector<1x256xi32>
    %214 = arith.remsi %210, %213 : vector<1x256xi32>
    %c0_i32_40 = arith.constant 0 : i32
    %215 = vector.broadcast %c0_i32_40 : i32 to vector<1x256xi32>
    %216 = arith.cmpi ne, %214, %215 : vector<1x256xi32>
    %c0_i32_41 = arith.constant 0 : i32
    %217 = vector.broadcast %c0_i32_41 : i32 to vector<1x256xi32>
    %218 = arith.cmpi slt, %214, %217 : vector<1x256xi32>
    %c0_i32_42 = arith.constant 0 : i32
    %219 = arith.cmpi slt, %212, %c0_i32_42 : i32
    %220 = vector.broadcast %219 : i1 to vector<1x256xi1>
    %221 = vector.broadcast %220 : vector<1x256xi1> to vector<1x256xi1>
    %222 = arith.xori %218, %221 : vector<1x256xi1>
    %223 = arith.andi %222, %216 : vector<1x256xi1>
    %224 = vector.broadcast %212 : i32 to vector<1x256xi32>
    %225 = arith.addi %214, %224 : vector<1x256xi32>
    %226 = arith.select %223, %225, %214 : vector<1x256xi1>, vector<1x256xi32>
    %c1_i32_43 = arith.constant 1 : i32
    %227 = vector.broadcast %c1_i32_43 : i32 to vector<1x256xi32>
    %228 = arith.cmpi sge, %226, %227 : vector<1x256xi32>
    %229 = arith.extui %228 : vector<1x256xi1> to vector<1x256xi32>
    %230 = arith.sitofp %229 : vector<1x256xi32> to vector<1x256xf32>
    %c14_i32 = arith.constant 14 : i32
    %231 = vector.broadcast %c14_i32 : i32 to vector<1x256xi32>
    %232 = arith.cmpi sle, %226, %231 : vector<1x256xi32>
    %233 = arith.extui %232 : vector<1x256xi1> to vector<1x256xi32>
    %234 = arith.sitofp %233 : vector<1x256xi32> to vector<1x256xf32>
    %c16_i32_44 = arith.constant 16 : i32
    %235 = vector.broadcast %c16_i32_44 : i32 to vector<1x256xi32>
    %236 = arith.cmpi sge, %210, %235 : vector<1x256xi32>
    %237 = arith.extui %236 : vector<1x256xi1> to vector<1x256xi32>
    %238 = arith.sitofp %237 : vector<1x256xi32> to vector<1x256xf32>
    %c240_i32 = arith.constant 240 : i32
    %239 = vector.broadcast %c240_i32 : i32 to vector<1x256xi32>
    %240 = arith.cmpi slt, %210, %239 : vector<1x256xi32>
    %241 = arith.extui %240 : vector<1x256xi1> to vector<1x256xi32>
    %242 = arith.sitofp %241 : vector<1x256xi32> to vector<1x256xf32>
    %c17_i32 = arith.constant 17 : i32
    %243 = tpu.dynamic_rotate %209 by %c17_i32 dim 1 : vector<8x256xf32>, i32 -> vector<8x256xf32>
    %244 = arith.mulf %238, %230 : vector<1x256xf32>
    %245 = vector.broadcast %244 : vector<1x256xf32> to vector<8x256xf32>
    %246 = arith.mulf %243, %245 : vector<8x256xf32>
    %c0_45 = arith.constant 0 : index
    %c0_46 = arith.constant 0 : index
    %c0_47 = arith.constant 0 : index
    %247 = vector.load %arg11[%c0_45, %c0_46, %c0_47] : memref<9x8x8xf32, #tpu.memory_space<vmem>>, vector<1x8x8xf32>
    %248 = vector.shape_cast %247 : vector<1x8x8xf32> to vector<8x8xf32>
    %249 = vector.extract_strided_slice %248 {offsets = [0, 0], sizes = [8, 1], strides = [1, 1]} : vector<8x8xf32> to vector<8x1xf32>
    %250 = vector.extract_strided_slice %246 {offsets = [0, 0], sizes = [1, 256], strides = [1, 1]} : vector<8x256xf32> to vector<1x256xf32>
    %251 = vector.broadcast %249 : vector<8x1xf32> to vector<8x256xf32>
    %252 = vector.broadcast %250 : vector<1x256xf32> to vector<8x256xf32>
    %253 = arith.mulf %251, %252 : vector<8x256xf32>
    %254 = vector.extract_strided_slice %248 {offsets = [0, 1], sizes = [8, 1], strides = [1, 1]} : vector<8x8xf32> to vector<8x1xf32>
    %255 = vector.extract_strided_slice %246 {offsets = [1, 0], sizes = [1, 256], strides = [1, 1]} : vector<8x256xf32> to vector<1x256xf32>
    %256 = vector.broadcast %254 : vector<8x1xf32> to vector<8x256xf32>
    %257 = vector.broadcast %255 : vector<1x256xf32> to vector<8x256xf32>
    %258 = arith.mulf %256, %257 : vector<8x256xf32>
    %259 = arith.addf %253, %258 : vector<8x256xf32>
    %260 = vector.extract_strided_slice %248 {offsets = [0, 2], sizes = [8, 1], strides = [1, 1]} : vector<8x8xf32> to vector<8x1xf32>
    %261 = vector.extract_strided_slice %246 {offsets = [2, 0], sizes = [1, 256], strides = [1, 1]} : vector<8x256xf32> to vector<1x256xf32>
    %262 = vector.broadcast %260 : vector<8x1xf32> to vector<8x256xf32>
    %263 = vector.broadcast %261 : vector<1x256xf32> to vector<8x256xf32>
    %264 = arith.mulf %262, %263 : vector<8x256xf32>
    %265 = arith.addf %259, %264 : vector<8x256xf32>
    %266 = vector.extract_strided_slice %248 {offsets = [0, 3], sizes = [8, 1], strides = [1, 1]} : vector<8x8xf32> to vector<8x1xf32>
    %267 = vector.extract_strided_slice %246 {offsets = [3, 0], sizes = [1, 256], strides = [1, 1]} : vector<8x256xf32> to vector<1x256xf32>
    %268 = vector.broadcast %266 : vector<8x1xf32> to vector<8x256xf32>
    %269 = vector.broadcast %267 : vector<1x256xf32> to vector<8x256xf32>
    %270 = arith.mulf %268, %269 : vector<8x256xf32>
    %271 = arith.addf %265, %270 : vector<8x256xf32>
    %272 = vector.extract_strided_slice %248 {offsets = [0, 4], sizes = [8, 1], strides = [1, 1]} : vector<8x8xf32> to vector<8x1xf32>
    %273 = vector.extract_strided_slice %246 {offsets = [4, 0], sizes = [1, 256], strides = [1, 1]} : vector<8x256xf32> to vector<1x256xf32>
    %274 = vector.broadcast %272 : vector<8x1xf32> to vector<8x256xf32>
    %275 = vector.broadcast %273 : vector<1x256xf32> to vector<8x256xf32>
    %276 = arith.mulf %274, %275 : vector<8x256xf32>
    %277 = arith.addf %271, %276 : vector<8x256xf32>
    %278 = vector.extract_strided_slice %248 {offsets = [0, 5], sizes = [8, 1], strides = [1, 1]} : vector<8x8xf32> to vector<8x1xf32>
    %279 = vector.extract_strided_slice %246 {offsets = [5, 0], sizes = [1, 256], strides = [1, 1]} : vector<8x256xf32> to vector<1x256xf32>
    %280 = vector.broadcast %278 : vector<8x1xf32> to vector<8x256xf32>
    %281 = vector.broadcast %279 : vector<1x256xf32> to vector<8x256xf32>
    %282 = arith.mulf %280, %281 : vector<8x256xf32>
    %283 = arith.addf %277, %282 : vector<8x256xf32>
    %284 = vector.extract_strided_slice %248 {offsets = [0, 6], sizes = [8, 1], strides = [1, 1]} : vector<8x8xf32> to vector<8x1xf32>
    %285 = vector.extract_strided_slice %246 {offsets = [6, 0], sizes = [1, 256], strides = [1, 1]} : vector<8x256xf32> to vector<1x256xf32>
    %286 = vector.broadcast %284 : vector<8x1xf32> to vector<8x256xf32>
    %287 = vector.broadcast %285 : vector<1x256xf32> to vector<8x256xf32>
    %288 = arith.mulf %286, %287 : vector<8x256xf32>
    %289 = arith.addf %283, %288 : vector<8x256xf32>
    %290 = vector.extract_strided_slice %248 {offsets = [0, 7], sizes = [8, 1], strides = [1, 1]} : vector<8x8xf32> to vector<8x1xf32>
    %291 = vector.extract_strided_slice %246 {offsets = [7, 0], sizes = [1, 256], strides = [1, 1]} : vector<8x256xf32> to vector<1x256xf32>
    %292 = vector.broadcast %290 : vector<8x1xf32> to vector<8x256xf32>
    %293 = vector.broadcast %291 : vector<1x256xf32> to vector<8x256xf32>
    %294 = arith.mulf %292, %293 : vector<8x256xf32>
    %295 = arith.addf %289, %294 : vector<8x256xf32>
    %c16_i32_48 = arith.constant 16 : i32
    %296 = tpu.dynamic_rotate %209 by %c16_i32_48 dim 1 : vector<8x256xf32>, i32 -> vector<8x256xf32>
    %297 = vector.broadcast %238 : vector<1x256xf32> to vector<8x256xf32>
    %298 = arith.mulf %296, %297 : vector<8x256xf32>
    %c1 = arith.constant 1 : index
    %c0_49 = arith.constant 0 : index
    %c0_50 = arith.constant 0 : index
    %299 = vector.load %arg11[%c1, %c0_49, %c0_50] : memref<9x8x8xf32, #tpu.memory_space<vmem>>, vector<1x8x8xf32>
    %300 = vector.shape_cast %299 : vector<1x8x8xf32> to vector<8x8xf32>
    %301 = vector.extract_strided_slice %300 {offsets = [0, 0], sizes = [8, 1], strides = [1, 1]} : vector<8x8xf32> to vector<8x1xf32>
    %302 = vector.extract_strided_slice %298 {offsets = [0, 0], sizes = [1, 256], strides = [1, 1]} : vector<8x256xf32> to vector<1x256xf32>
    %303 = vector.broadcast %301 : vector<8x1xf32> to vector<8x256xf32>
    %304 = vector.broadcast %302 : vector<1x256xf32> to vector<8x256xf32>
    %305 = arith.mulf %303, %304 : vector<8x256xf32>
    %306 = vector.extract_strided_slice %300 {offsets = [0, 1], sizes = [8, 1], strides = [1, 1]} : vector<8x8xf32> to vector<8x1xf32>
    %307 = vector.extract_strided_slice %298 {offsets = [1, 0], sizes = [1, 256], strides = [1, 1]} : vector<8x256xf32> to vector<1x256xf32>
    %308 = vector.broadcast %306 : vector<8x1xf32> to vector<8x256xf32>
    %309 = vector.broadcast %307 : vector<1x256xf32> to vector<8x256xf32>
    %310 = arith.mulf %308, %309 : vector<8x256xf32>
    %311 = arith.addf %305, %310 : vector<8x256xf32>
    %312 = vector.extract_strided_slice %300 {offsets = [0, 2], sizes = [8, 1], strides = [1, 1]} : vector<8x8xf32> to vector<8x1xf32>
    %313 = vector.extract_strided_slice %298 {offsets = [2, 0], sizes = [1, 256], strides = [1, 1]} : vector<8x256xf32> to vector<1x256xf32>
    %314 = vector.broadcast %312 : vector<8x1xf32> to vector<8x256xf32>
    %315 = vector.broadcast %313 : vector<1x256xf32> to vector<8x256xf32>
    %316 = arith.mulf %314, %315 : vector<8x256xf32>
    %317 = arith.addf %311, %316 : vector<8x256xf32>
    %318 = vector.extract_strided_slice %300 {offsets = [0, 3], sizes = [8, 1], strides = [1, 1]} : vector<8x8xf32> to vector<8x1xf32>
    %319 = vector.extract_strided_slice %298 {offsets = [3, 0], sizes = [1, 256], strides = [1, 1]} : vector<8x256xf32> to vector<1x256xf32>
    %320 = vector.broadcast %318 : vector<8x1xf32> to vector<8x256xf32>
    %321 = vector.broadcast %319 : vector<1x256xf32> to vector<8x256xf32>
    %322 = arith.mulf %320, %321 : vector<8x256xf32>
    %323 = arith.addf %317, %322 : vector<8x256xf32>
    %324 = vector.extract_strided_slice %300 {offsets = [0, 4], sizes = [8, 1], strides = [1, 1]} : vector<8x8xf32> to vector<8x1xf32>
    %325 = vector.extract_strided_slice %298 {offsets = [4, 0], sizes = [1, 256], strides = [1, 1]} : vector<8x256xf32> to vector<1x256xf32>
    %326 = vector.broadcast %324 : vector<8x1xf32> to vector<8x256xf32>
    %327 = vector.broadcast %325 : vector<1x256xf32> to vector<8x256xf32>
    %328 = arith.mulf %326, %327 : vector<8x256xf32>
    %329 = arith.addf %323, %328 : vector<8x256xf32>
    %330 = vector.extract_strided_slice %300 {offsets = [0, 5], sizes = [8, 1], strides = [1, 1]} : vector<8x8xf32> to vector<8x1xf32>
    %331 = vector.extract_strided_slice %298 {offsets = [5, 0], sizes = [1, 256], strides = [1, 1]} : vector<8x256xf32> to vector<1x256xf32>
    %332 = vector.broadcast %330 : vector<8x1xf32> to vector<8x256xf32>
    %333 = vector.broadcast %331 : vector<1x256xf32> to vector<8x256xf32>
    %334 = arith.mulf %332, %333 : vector<8x256xf32>
    %335 = arith.addf %329, %334 : vector<8x256xf32>
    %336 = vector.extract_strided_slice %300 {offsets = [0, 6], sizes = [8, 1], strides = [1, 1]} : vector<8x8xf32> to vector<8x1xf32>
    %337 = vector.extract_strided_slice %298 {offsets = [6, 0], sizes = [1, 256], strides = [1, 1]} : vector<8x256xf32> to vector<1x256xf32>
    %338 = vector.broadcast %336 : vector<8x1xf32> to vector<8x256xf32>
    %339 = vector.broadcast %337 : vector<1x256xf32> to vector<8x256xf32>
    %340 = arith.mulf %338, %339 : vector<8x256xf32>
    %341 = arith.addf %335, %340 : vector<8x256xf32>
    %342 = vector.extract_strided_slice %300 {offsets = [0, 7], sizes = [8, 1], strides = [1, 1]} : vector<8x8xf32> to vector<8x1xf32>
    %343 = vector.extract_strided_slice %298 {offsets = [7, 0], sizes = [1, 256], strides = [1, 1]} : vector<8x256xf32> to vector<1x256xf32>
    %344 = vector.broadcast %342 : vector<8x1xf32> to vector<8x256xf32>
    %345 = vector.broadcast %343 : vector<1x256xf32> to vector<8x256xf32>
    %346 = arith.mulf %344, %345 : vector<8x256xf32>
    %347 = arith.addf %341, %346 : vector<8x256xf32>
    %348 = arith.addf %295, %347 : vector<8x256xf32>
    %c15_i32 = arith.constant 15 : i32
    %349 = tpu.dynamic_rotate %209 by %c15_i32 dim 1 : vector<8x256xf32>, i32 -> vector<8x256xf32>
    %350 = arith.mulf %238, %234 : vector<1x256xf32>
    %351 = vector.broadcast %350 : vector<1x256xf32> to vector<8x256xf32>
    %352 = arith.mulf %349, %351 : vector<8x256xf32>
    %c2 = arith.constant 2 : index
    %c0_51 = arith.constant 0 : index
    %c0_52 = arith.constant 0 : index
    %353 = vector.load %arg11[%c2, %c0_51, %c0_52] : memref<9x8x8xf32, #tpu.memory_space<vmem>>, vector<1x8x8xf32>
    %354 = vector.shape_cast %353 : vector<1x8x8xf32> to vector<8x8xf32>
    %355 = vector.extract_strided_slice %354 {offsets = [0, 0], sizes = [8, 1], strides = [1, 1]} : vector<8x8xf32> to vector<8x1xf32>
    %356 = vector.extract_strided_slice %352 {offsets = [0, 0], sizes = [1, 256], strides = [1, 1]} : vector<8x256xf32> to vector<1x256xf32>
    %357 = vector.broadcast %355 : vector<8x1xf32> to vector<8x256xf32>
    %358 = vector.broadcast %356 : vector<1x256xf32> to vector<8x256xf32>
    %359 = arith.mulf %357, %358 : vector<8x256xf32>
    %360 = vector.extract_strided_slice %354 {offsets = [0, 1], sizes = [8, 1], strides = [1, 1]} : vector<8x8xf32> to vector<8x1xf32>
    %361 = vector.extract_strided_slice %352 {offsets = [1, 0], sizes = [1, 256], strides = [1, 1]} : vector<8x256xf32> to vector<1x256xf32>
    %362 = vector.broadcast %360 : vector<8x1xf32> to vector<8x256xf32>
    %363 = vector.broadcast %361 : vector<1x256xf32> to vector<8x256xf32>
    %364 = arith.mulf %362, %363 : vector<8x256xf32>
    %365 = arith.addf %359, %364 : vector<8x256xf32>
    %366 = vector.extract_strided_slice %354 {offsets = [0, 2], sizes = [8, 1], strides = [1, 1]} : vector<8x8xf32> to vector<8x1xf32>
    %367 = vector.extract_strided_slice %352 {offsets = [2, 0], sizes = [1, 256], strides = [1, 1]} : vector<8x256xf32> to vector<1x256xf32>
    %368 = vector.broadcast %366 : vector<8x1xf32> to vector<8x256xf32>
    %369 = vector.broadcast %367 : vector<1x256xf32> to vector<8x256xf32>
    %370 = arith.mulf %368, %369 : vector<8x256xf32>
    %371 = arith.addf %365, %370 : vector<8x256xf32>
    %372 = vector.extract_strided_slice %354 {offsets = [0, 3], sizes = [8, 1], strides = [1, 1]} : vector<8x8xf32> to vector<8x1xf32>
    %373 = vector.extract_strided_slice %352 {offsets = [3, 0], sizes = [1, 256], strides = [1, 1]} : vector<8x256xf32> to vector<1x256xf32>
    %374 = vector.broadcast %372 : vector<8x1xf32> to vector<8x256xf32>
    %375 = vector.broadcast %373 : vector<1x256xf32> to vector<8x256xf32>
    %376 = arith.mulf %374, %375 : vector<8x256xf32>
    %377 = arith.addf %371, %376 : vector<8x256xf32>
    %378 = vector.extract_strided_slice %354 {offsets = [0, 4], sizes = [8, 1], strides = [1, 1]} : vector<8x8xf32> to vector<8x1xf32>
    %379 = vector.extract_strided_slice %352 {offsets = [4, 0], sizes = [1, 256], strides = [1, 1]} : vector<8x256xf32> to vector<1x256xf32>
    %380 = vector.broadcast %378 : vector<8x1xf32> to vector<8x256xf32>
    %381 = vector.broadcast %379 : vector<1x256xf32> to vector<8x256xf32>
    %382 = arith.mulf %380, %381 : vector<8x256xf32>
    %383 = arith.addf %377, %382 : vector<8x256xf32>
    %384 = vector.extract_strided_slice %354 {offsets = [0, 5], sizes = [8, 1], strides = [1, 1]} : vector<8x8xf32> to vector<8x1xf32>
    %385 = vector.extract_strided_slice %352 {offsets = [5, 0], sizes = [1, 256], strides = [1, 1]} : vector<8x256xf32> to vector<1x256xf32>
    %386 = vector.broadcast %384 : vector<8x1xf32> to vector<8x256xf32>
    %387 = vector.broadcast %385 : vector<1x256xf32> to vector<8x256xf32>
    %388 = arith.mulf %386, %387 : vector<8x256xf32>
    %389 = arith.addf %383, %388 : vector<8x256xf32>
    %390 = vector.extract_strided_slice %354 {offsets = [0, 6], sizes = [8, 1], strides = [1, 1]} : vector<8x8xf32> to vector<8x1xf32>
    %391 = vector.extract_strided_slice %352 {offsets = [6, 0], sizes = [1, 256], strides = [1, 1]} : vector<8x256xf32> to vector<1x256xf32>
    %392 = vector.broadcast %390 : vector<8x1xf32> to vector<8x256xf32>
    %393 = vector.broadcast %391 : vector<1x256xf32> to vector<8x256xf32>
    %394 = arith.mulf %392, %393 : vector<8x256xf32>
    %395 = arith.addf %389, %394 : vector<8x256xf32>
    %396 = vector.extract_strided_slice %354 {offsets = [0, 7], sizes = [8, 1], strides = [1, 1]} : vector<8x8xf32> to vector<8x1xf32>
    %397 = vector.extract_strided_slice %352 {offsets = [7, 0], sizes = [1, 256], strides = [1, 1]} : vector<8x256xf32> to vector<1x256xf32>
    %398 = vector.broadcast %396 : vector<8x1xf32> to vector<8x256xf32>
    %399 = vector.broadcast %397 : vector<1x256xf32> to vector<8x256xf32>
    %400 = arith.mulf %398, %399 : vector<8x256xf32>
    %401 = arith.addf %395, %400 : vector<8x256xf32>
    %402 = arith.addf %348, %401 : vector<8x256xf32>
    %c1_i32_53 = arith.constant 1 : i32
    %403 = tpu.dynamic_rotate %209 by %c1_i32_53 dim 1 : vector<8x256xf32>, i32 -> vector<8x256xf32>
    %404 = vector.broadcast %230 : vector<1x256xf32> to vector<8x256xf32>
    %405 = arith.mulf %403, %404 : vector<8x256xf32>
    %c3 = arith.constant 3 : index
    %c0_54 = arith.constant 0 : index
    %c0_55 = arith.constant 0 : index
    %406 = vector.load %arg11[%c3, %c0_54, %c0_55] : memref<9x8x8xf32, #tpu.memory_space<vmem>>, vector<1x8x8xf32>
    %407 = vector.shape_cast %406 : vector<1x8x8xf32> to vector<8x8xf32>
    %408 = vector.extract_strided_slice %407 {offsets = [0, 0], sizes = [8, 1], strides = [1, 1]} : vector<8x8xf32> to vector<8x1xf32>
    %409 = vector.extract_strided_slice %405 {offsets = [0, 0], sizes = [1, 256], strides = [1, 1]} : vector<8x256xf32> to vector<1x256xf32>
    %410 = vector.broadcast %408 : vector<8x1xf32> to vector<8x256xf32>
    %411 = vector.broadcast %409 : vector<1x256xf32> to vector<8x256xf32>
    %412 = arith.mulf %410, %411 : vector<8x256xf32>
    %413 = vector.extract_strided_slice %407 {offsets = [0, 1], sizes = [8, 1], strides = [1, 1]} : vector<8x8xf32> to vector<8x1xf32>
    %414 = vector.extract_strided_slice %405 {offsets = [1, 0], sizes = [1, 256], strides = [1, 1]} : vector<8x256xf32> to vector<1x256xf32>
    %415 = vector.broadcast %413 : vector<8x1xf32> to vector<8x256xf32>
    %416 = vector.broadcast %414 : vector<1x256xf32> to vector<8x256xf32>
    %417 = arith.mulf %415, %416 : vector<8x256xf32>
    %418 = arith.addf %412, %417 : vector<8x256xf32>
    %419 = vector.extract_strided_slice %407 {offsets = [0, 2], sizes = [8, 1], strides = [1, 1]} : vector<8x8xf32> to vector<8x1xf32>
    %420 = vector.extract_strided_slice %405 {offsets = [2, 0], sizes = [1, 256], strides = [1, 1]} : vector<8x256xf32> to vector<1x256xf32>
    %421 = vector.broadcast %419 : vector<8x1xf32> to vector<8x256xf32>
    %422 = vector.broadcast %420 : vector<1x256xf32> to vector<8x256xf32>
    %423 = arith.mulf %421, %422 : vector<8x256xf32>
    %424 = arith.addf %418, %423 : vector<8x256xf32>
    %425 = vector.extract_strided_slice %407 {offsets = [0, 3], sizes = [8, 1], strides = [1, 1]} : vector<8x8xf32> to vector<8x1xf32>
    %426 = vector.extract_strided_slice %405 {offsets = [3, 0], sizes = [1, 256], strides = [1, 1]} : vector<8x256xf32> to vector<1x256xf32>
    %427 = vector.broadcast %425 : vector<8x1xf32> to vector<8x256xf32>
    %428 = vector.broadcast %426 : vector<1x256xf32> to vector<8x256xf32>
    %429 = arith.mulf %427, %428 : vector<8x256xf32>
    %430 = arith.addf %424, %429 : vector<8x256xf32>
    %431 = vector.extract_strided_slice %407 {offsets = [0, 4], sizes = [8, 1], strides = [1, 1]} : vector<8x8xf32> to vector<8x1xf32>
    %432 = vector.extract_strided_slice %405 {offsets = [4, 0], sizes = [1, 256], strides = [1, 1]} : vector<8x256xf32> to vector<1x256xf32>
    %433 = vector.broadcast %431 : vector<8x1xf32> to vector<8x256xf32>
    %434 = vector.broadcast %432 : vector<1x256xf32> to vector<8x256xf32>
    %435 = arith.mulf %433, %434 : vector<8x256xf32>
    %436 = arith.addf %430, %435 : vector<8x256xf32>
    %437 = vector.extract_strided_slice %407 {offsets = [0, 5], sizes = [8, 1], strides = [1, 1]} : vector<8x8xf32> to vector<8x1xf32>
    %438 = vector.extract_strided_slice %405 {offsets = [5, 0], sizes = [1, 256], strides = [1, 1]} : vector<8x256xf32> to vector<1x256xf32>
    %439 = vector.broadcast %437 : vector<8x1xf32> to vector<8x256xf32>
    %440 = vector.broadcast %438 : vector<1x256xf32> to vector<8x256xf32>
    %441 = arith.mulf %439, %440 : vector<8x256xf32>
    %442 = arith.addf %436, %441 : vector<8x256xf32>
    %443 = vector.extract_strided_slice %407 {offsets = [0, 6], sizes = [8, 1], strides = [1, 1]} : vector<8x8xf32> to vector<8x1xf32>
    %444 = vector.extract_strided_slice %405 {offsets = [6, 0], sizes = [1, 256], strides = [1, 1]} : vector<8x256xf32> to vector<1x256xf32>
    %445 = vector.broadcast %443 : vector<8x1xf32> to vector<8x256xf32>
    %446 = vector.broadcast %444 : vector<1x256xf32> to vector<8x256xf32>
    %447 = arith.mulf %445, %446 : vector<8x256xf32>
    %448 = arith.addf %442, %447 : vector<8x256xf32>
    %449 = vector.extract_strided_slice %407 {offsets = [0, 7], sizes = [8, 1], strides = [1, 1]} : vector<8x8xf32> to vector<8x1xf32>
    %450 = vector.extract_strided_slice %405 {offsets = [7, 0], sizes = [1, 256], strides = [1, 1]} : vector<8x256xf32> to vector<1x256xf32>
    %451 = vector.broadcast %449 : vector<8x1xf32> to vector<8x256xf32>
    %452 = vector.broadcast %450 : vector<1x256xf32> to vector<8x256xf32>
    %453 = arith.mulf %451, %452 : vector<8x256xf32>
    %454 = arith.addf %448, %453 : vector<8x256xf32>
    %455 = arith.addf %402, %454 : vector<8x256xf32>
    %c4 = arith.constant 4 : index
    %c0_56 = arith.constant 0 : index
    %c0_57 = arith.constant 0 : index
    %456 = vector.load %arg11[%c4, %c0_56, %c0_57] : memref<9x8x8xf32, #tpu.memory_space<vmem>>, vector<1x8x8xf32>
    %457 = vector.shape_cast %456 : vector<1x8x8xf32> to vector<8x8xf32>
    %458 = vector.extract_strided_slice %457 {offsets = [0, 0], sizes = [8, 1], strides = [1, 1]} : vector<8x8xf32> to vector<8x1xf32>
    %459 = vector.extract_strided_slice %209 {offsets = [0, 0], sizes = [1, 256], strides = [1, 1]} : vector<8x256xf32> to vector<1x256xf32>
    %460 = vector.broadcast %458 : vector<8x1xf32> to vector<8x256xf32>
    %461 = vector.broadcast %459 : vector<1x256xf32> to vector<8x256xf32>
    %462 = arith.mulf %460, %461 : vector<8x256xf32>
    %463 = vector.extract_strided_slice %457 {offsets = [0, 1], sizes = [8, 1], strides = [1, 1]} : vector<8x8xf32> to vector<8x1xf32>
    %464 = vector.extract_strided_slice %209 {offsets = [1, 0], sizes = [1, 256], strides = [1, 1]} : vector<8x256xf32> to vector<1x256xf32>
    %465 = vector.broadcast %463 : vector<8x1xf32> to vector<8x256xf32>
    %466 = vector.broadcast %464 : vector<1x256xf32> to vector<8x256xf32>
    %467 = arith.mulf %465, %466 : vector<8x256xf32>
    %468 = arith.addf %462, %467 : vector<8x256xf32>
    %469 = vector.extract_strided_slice %457 {offsets = [0, 2], sizes = [8, 1], strides = [1, 1]} : vector<8x8xf32> to vector<8x1xf32>
    %470 = vector.extract_strided_slice %209 {offsets = [2, 0], sizes = [1, 256], strides = [1, 1]} : vector<8x256xf32> to vector<1x256xf32>
    %471 = vector.broadcast %469 : vector<8x1xf32> to vector<8x256xf32>
    %472 = vector.broadcast %470 : vector<1x256xf32> to vector<8x256xf32>
    %473 = arith.mulf %471, %472 : vector<8x256xf32>
    %474 = arith.addf %468, %473 : vector<8x256xf32>
    %475 = vector.extract_strided_slice %457 {offsets = [0, 3], sizes = [8, 1], strides = [1, 1]} : vector<8x8xf32> to vector<8x1xf32>
    %476 = vector.extract_strided_slice %209 {offsets = [3, 0], sizes = [1, 256], strides = [1, 1]} : vector<8x256xf32> to vector<1x256xf32>
    %477 = vector.broadcast %475 : vector<8x1xf32> to vector<8x256xf32>
    %478 = vector.broadcast %476 : vector<1x256xf32> to vector<8x256xf32>
    %479 = arith.mulf %477, %478 : vector<8x256xf32>
    %480 = arith.addf %474, %479 : vector<8x256xf32>
    %481 = vector.extract_strided_slice %457 {offsets = [0, 4], sizes = [8, 1], strides = [1, 1]} : vector<8x8xf32> to vector<8x1xf32>
    %482 = vector.extract_strided_slice %209 {offsets = [4, 0], sizes = [1, 256], strides = [1, 1]} : vector<8x256xf32> to vector<1x256xf32>
    %483 = vector.broadcast %481 : vector<8x1xf32> to vector<8x256xf32>
    %484 = vector.broadcast %482 : vector<1x256xf32> to vector<8x256xf32>
    %485 = arith.mulf %483, %484 : vector<8x256xf32>
    %486 = arith.addf %480, %485 : vector<8x256xf32>
    %487 = vector.extract_strided_slice %457 {offsets = [0, 5], sizes = [8, 1], strides = [1, 1]} : vector<8x8xf32> to vector<8x1xf32>
    %488 = vector.extract_strided_slice %209 {offsets = [5, 0], sizes = [1, 256], strides = [1, 1]} : vector<8x256xf32> to vector<1x256xf32>
    %489 = vector.broadcast %487 : vector<8x1xf32> to vector<8x256xf32>
    %490 = vector.broadcast %488 : vector<1x256xf32> to vector<8x256xf32>
    %491 = arith.mulf %489, %490 : vector<8x256xf32>
    %492 = arith.addf %486, %491 : vector<8x256xf32>
    %493 = vector.extract_strided_slice %457 {offsets = [0, 6], sizes = [8, 1], strides = [1, 1]} : vector<8x8xf32> to vector<8x1xf32>
    %494 = vector.extract_strided_slice %209 {offsets = [6, 0], sizes = [1, 256], strides = [1, 1]} : vector<8x256xf32> to vector<1x256xf32>
    %495 = vector.broadcast %493 : vector<8x1xf32> to vector<8x256xf32>
    %496 = vector.broadcast %494 : vector<1x256xf32> to vector<8x256xf32>
    %497 = arith.mulf %495, %496 : vector<8x256xf32>
    %498 = arith.addf %492, %497 : vector<8x256xf32>
    %499 = vector.extract_strided_slice %457 {offsets = [0, 7], sizes = [8, 1], strides = [1, 1]} : vector<8x8xf32> to vector<8x1xf32>
    %500 = vector.extract_strided_slice %209 {offsets = [7, 0], sizes = [1, 256], strides = [1, 1]} : vector<8x256xf32> to vector<1x256xf32>
    %501 = vector.broadcast %499 : vector<8x1xf32> to vector<8x256xf32>
    %502 = vector.broadcast %500 : vector<1x256xf32> to vector<8x256xf32>
    %503 = arith.mulf %501, %502 : vector<8x256xf32>
    %504 = arith.addf %498, %503 : vector<8x256xf32>
    %505 = arith.addf %455, %504 : vector<8x256xf32>
    %c255_i32 = arith.constant 255 : i32
    %506 = tpu.dynamic_rotate %209 by %c255_i32 dim 1 : vector<8x256xf32>, i32 -> vector<8x256xf32>
    %507 = vector.broadcast %234 : vector<1x256xf32> to vector<8x256xf32>
    %508 = arith.mulf %506, %507 : vector<8x256xf32>
    %c5 = arith.constant 5 : index
    %c0_58 = arith.constant 0 : index
    %c0_59 = arith.constant 0 : index
    %509 = vector.load %arg11[%c5, %c0_58, %c0_59] : memref<9x8x8xf32, #tpu.memory_space<vmem>>, vector<1x8x8xf32>
    %510 = vector.shape_cast %509 : vector<1x8x8xf32> to vector<8x8xf32>
    %511 = vector.extract_strided_slice %510 {offsets = [0, 0], sizes = [8, 1], strides = [1, 1]} : vector<8x8xf32> to vector<8x1xf32>
    %512 = vector.extract_strided_slice %508 {offsets = [0, 0], sizes = [1, 256], strides = [1, 1]} : vector<8x256xf32> to vector<1x256xf32>
    %513 = vector.broadcast %511 : vector<8x1xf32> to vector<8x256xf32>
    %514 = vector.broadcast %512 : vector<1x256xf32> to vector<8x256xf32>
    %515 = arith.mulf %513, %514 : vector<8x256xf32>
    %516 = vector.extract_strided_slice %510 {offsets = [0, 1], sizes = [8, 1], strides = [1, 1]} : vector<8x8xf32> to vector<8x1xf32>
    %517 = vector.extract_strided_slice %508 {offsets = [1, 0], sizes = [1, 256], strides = [1, 1]} : vector<8x256xf32> to vector<1x256xf32>
    %518 = vector.broadcast %516 : vector<8x1xf32> to vector<8x256xf32>
    %519 = vector.broadcast %517 : vector<1x256xf32> to vector<8x256xf32>
    %520 = arith.mulf %518, %519 : vector<8x256xf32>
    %521 = arith.addf %515, %520 : vector<8x256xf32>
    %522 = vector.extract_strided_slice %510 {offsets = [0, 2], sizes = [8, 1], strides = [1, 1]} : vector<8x8xf32> to vector<8x1xf32>
    %523 = vector.extract_strided_slice %508 {offsets = [2, 0], sizes = [1, 256], strides = [1, 1]} : vector<8x256xf32> to vector<1x256xf32>
    %524 = vector.broadcast %522 : vector<8x1xf32> to vector<8x256xf32>
    %525 = vector.broadcast %523 : vector<1x256xf32> to vector<8x256xf32>
    %526 = arith.mulf %524, %525 : vector<8x256xf32>
    %527 = arith.addf %521, %526 : vector<8x256xf32>
    %528 = vector.extract_strided_slice %510 {offsets = [0, 3], sizes = [8, 1], strides = [1, 1]} : vector<8x8xf32> to vector<8x1xf32>
    %529 = vector.extract_strided_slice %508 {offsets = [3, 0], sizes = [1, 256], strides = [1, 1]} : vector<8x256xf32> to vector<1x256xf32>
    %530 = vector.broadcast %528 : vector<8x1xf32> to vector<8x256xf32>
    %531 = vector.broadcast %529 : vector<1x256xf32> to vector<8x256xf32>
    %532 = arith.mulf %530, %531 : vector<8x256xf32>
    %533 = arith.addf %527, %532 : vector<8x256xf32>
    %534 = vector.extract_strided_slice %510 {offsets = [0, 4], sizes = [8, 1], strides = [1, 1]} : vector<8x8xf32> to vector<8x1xf32>
    %535 = vector.extract_strided_slice %508 {offsets = [4, 0], sizes = [1, 256], strides = [1, 1]} : vector<8x256xf32> to vector<1x256xf32>
    %536 = vector.broadcast %534 : vector<8x1xf32> to vector<8x256xf32>
    %537 = vector.broadcast %535 : vector<1x256xf32> to vector<8x256xf32>
    %538 = arith.mulf %536, %537 : vector<8x256xf32>
    %539 = arith.addf %533, %538 : vector<8x256xf32>
    %540 = vector.extract_strided_slice %510 {offsets = [0, 5], sizes = [8, 1], strides = [1, 1]} : vector<8x8xf32> to vector<8x1xf32>
    %541 = vector.extract_strided_slice %508 {offsets = [5, 0], sizes = [1, 256], strides = [1, 1]} : vector<8x256xf32> to vector<1x256xf32>
    %542 = vector.broadcast %540 : vector<8x1xf32> to vector<8x256xf32>
    %543 = vector.broadcast %541 : vector<1x256xf32> to vector<8x256xf32>
    %544 = arith.mulf %542, %543 : vector<8x256xf32>
    %545 = arith.addf %539, %544 : vector<8x256xf32>
    %546 = vector.extract_strided_slice %510 {offsets = [0, 6], sizes = [8, 1], strides = [1, 1]} : vector<8x8xf32> to vector<8x1xf32>
    %547 = vector.extract_strided_slice %508 {offsets = [6, 0], sizes = [1, 256], strides = [1, 1]} : vector<8x256xf32> to vector<1x256xf32>
    %548 = vector.broadcast %546 : vector<8x1xf32> to vector<8x256xf32>
    %549 = vector.broadcast %547 : vector<1x256xf32> to vector<8x256xf32>
    %550 = arith.mulf %548, %549 : vector<8x256xf32>
    %551 = arith.addf %545, %550 : vector<8x256xf32>
    %552 = vector.extract_strided_slice %510 {offsets = [0, 7], sizes = [8, 1], strides = [1, 1]} : vector<8x8xf32> to vector<8x1xf32>
    %553 = vector.extract_strided_slice %508 {offsets = [7, 0], sizes = [1, 256], strides = [1, 1]} : vector<8x256xf32> to vector<1x256xf32>
    %554 = vector.broadcast %552 : vector<8x1xf32> to vector<8x256xf32>
    %555 = vector.broadcast %553 : vector<1x256xf32> to vector<8x256xf32>
    %556 = arith.mulf %554, %555 : vector<8x256xf32>
    %557 = arith.addf %551, %556 : vector<8x256xf32>
    %558 = arith.addf %505, %557 : vector<8x256xf32>
    %c241_i32 = arith.constant 241 : i32
    %559 = tpu.dynamic_rotate %209 by %c241_i32 dim 1 : vector<8x256xf32>, i32 -> vector<8x256xf32>
    %560 = arith.mulf %242, %230 : vector<1x256xf32>
    %561 = vector.broadcast %560 : vector<1x256xf32> to vector<8x256xf32>
    %562 = arith.mulf %559, %561 : vector<8x256xf32>
    %c6 = arith.constant 6 : index
    %c0_60 = arith.constant 0 : index
    %c0_61 = arith.constant 0 : index
    %563 = vector.load %arg11[%c6, %c0_60, %c0_61] : memref<9x8x8xf32, #tpu.memory_space<vmem>>, vector<1x8x8xf32>
    %564 = vector.shape_cast %563 : vector<1x8x8xf32> to vector<8x8xf32>
    %565 = vector.extract_strided_slice %564 {offsets = [0, 0], sizes = [8, 1], strides = [1, 1]} : vector<8x8xf32> to vector<8x1xf32>
    %566 = vector.extract_strided_slice %562 {offsets = [0, 0], sizes = [1, 256], strides = [1, 1]} : vector<8x256xf32> to vector<1x256xf32>
    %567 = vector.broadcast %565 : vector<8x1xf32> to vector<8x256xf32>
    %568 = vector.broadcast %566 : vector<1x256xf32> to vector<8x256xf32>
    %569 = arith.mulf %567, %568 : vector<8x256xf32>
    %570 = vector.extract_strided_slice %564 {offsets = [0, 1], sizes = [8, 1], strides = [1, 1]} : vector<8x8xf32> to vector<8x1xf32>
    %571 = vector.extract_strided_slice %562 {offsets = [1, 0], sizes = [1, 256], strides = [1, 1]} : vector<8x256xf32> to vector<1x256xf32>
    %572 = vector.broadcast %570 : vector<8x1xf32> to vector<8x256xf32>
    %573 = vector.broadcast %571 : vector<1x256xf32> to vector<8x256xf32>
    %574 = arith.mulf %572, %573 : vector<8x256xf32>
    %575 = arith.addf %569, %574 : vector<8x256xf32>
    %576 = vector.extract_strided_slice %564 {offsets = [0, 2], sizes = [8, 1], strides = [1, 1]} : vector<8x8xf32> to vector<8x1xf32>
    %577 = vector.extract_strided_slice %562 {offsets = [2, 0], sizes = [1, 256], strides = [1, 1]} : vector<8x256xf32> to vector<1x256xf32>
    %578 = vector.broadcast %576 : vector<8x1xf32> to vector<8x256xf32>
    %579 = vector.broadcast %577 : vector<1x256xf32> to vector<8x256xf32>
    %580 = arith.mulf %578, %579 : vector<8x256xf32>
    %581 = arith.addf %575, %580 : vector<8x256xf32>
    %582 = vector.extract_strided_slice %564 {offsets = [0, 3], sizes = [8, 1], strides = [1, 1]} : vector<8x8xf32> to vector<8x1xf32>
    %583 = vector.extract_strided_slice %562 {offsets = [3, 0], sizes = [1, 256], strides = [1, 1]} : vector<8x256xf32> to vector<1x256xf32>
    %584 = vector.broadcast %582 : vector<8x1xf32> to vector<8x256xf32>
    %585 = vector.broadcast %583 : vector<1x256xf32> to vector<8x256xf32>
    %586 = arith.mulf %584, %585 : vector<8x256xf32>
    %587 = arith.addf %581, %586 : vector<8x256xf32>
    %588 = vector.extract_strided_slice %564 {offsets = [0, 4], sizes = [8, 1], strides = [1, 1]} : vector<8x8xf32> to vector<8x1xf32>
    %589 = vector.extract_strided_slice %562 {offsets = [4, 0], sizes = [1, 256], strides = [1, 1]} : vector<8x256xf32> to vector<1x256xf32>
    %590 = vector.broadcast %588 : vector<8x1xf32> to vector<8x256xf32>
    %591 = vector.broadcast %589 : vector<1x256xf32> to vector<8x256xf32>
    %592 = arith.mulf %590, %591 : vector<8x256xf32>
    %593 = arith.addf %587, %592 : vector<8x256xf32>
    %594 = vector.extract_strided_slice %564 {offsets = [0, 5], sizes = [8, 1], strides = [1, 1]} : vector<8x8xf32> to vector<8x1xf32>
    %595 = vector.extract_strided_slice %562 {offsets = [5, 0], sizes = [1, 256], strides = [1, 1]} : vector<8x256xf32> to vector<1x256xf32>
    %596 = vector.broadcast %594 : vector<8x1xf32> to vector<8x256xf32>
    %597 = vector.broadcast %595 : vector<1x256xf32> to vector<8x256xf32>
    %598 = arith.mulf %596, %597 : vector<8x256xf32>
    %599 = arith.addf %593, %598 : vector<8x256xf32>
    %600 = vector.extract_strided_slice %564 {offsets = [0, 6], sizes = [8, 1], strides = [1, 1]} : vector<8x8xf32> to vector<8x1xf32>
    %601 = vector.extract_strided_slice %562 {offsets = [6, 0], sizes = [1, 256], strides = [1, 1]} : vector<8x256xf32> to vector<1x256xf32>
    %602 = vector.broadcast %600 : vector<8x1xf32> to vector<8x256xf32>
    %603 = vector.broadcast %601 : vector<1x256xf32> to vector<8x256xf32>
    %604 = arith.mulf %602, %603 : vector<8x256xf32>
    %605 = arith.addf %599, %604 : vector<8x256xf32>
    %606 = vector.extract_strided_slice %564 {offsets = [0, 7], sizes = [8, 1], strides = [1, 1]} : vector<8x8xf32> to vector<8x1xf32>
    %607 = vector.extract_strided_slice %562 {offsets = [7, 0], sizes = [1, 256], strides = [1, 1]} : vector<8x256xf32> to vector<1x256xf32>
    %608 = vector.broadcast %606 : vector<8x1xf32> to vector<8x256xf32>
    %609 = vector.broadcast %607 : vector<1x256xf32> to vector<8x256xf32>
    %610 = arith.mulf %608, %609 : vector<8x256xf32>
    %611 = arith.addf %605, %610 : vector<8x256xf32>
    %612 = arith.addf %558, %611 : vector<8x256xf32>
    %c240_i32_62 = arith.constant 240 : i32
    %613 = tpu.dynamic_rotate %209 by %c240_i32_62 dim 1 : vector<8x256xf32>, i32 -> vector<8x256xf32>
    %614 = vector.broadcast %242 : vector<1x256xf32> to vector<8x256xf32>
    %615 = arith.mulf %613, %614 : vector<8x256xf32>
    %c7 = arith.constant 7 : index
    %c0_63 = arith.constant 0 : index
    %c0_64 = arith.constant 0 : index
    %616 = vector.load %arg11[%c7, %c0_63, %c0_64] : memref<9x8x8xf32, #tpu.memory_space<vmem>>, vector<1x8x8xf32>
    %617 = vector.shape_cast %616 : vector<1x8x8xf32> to vector<8x8xf32>
    %618 = vector.extract_strided_slice %617 {offsets = [0, 0], sizes = [8, 1], strides = [1, 1]} : vector<8x8xf32> to vector<8x1xf32>
    %619 = vector.extract_strided_slice %615 {offsets = [0, 0], sizes = [1, 256], strides = [1, 1]} : vector<8x256xf32> to vector<1x256xf32>
    %620 = vector.broadcast %618 : vector<8x1xf32> to vector<8x256xf32>
    %621 = vector.broadcast %619 : vector<1x256xf32> to vector<8x256xf32>
    %622 = arith.mulf %620, %621 : vector<8x256xf32>
    %623 = vector.extract_strided_slice %617 {offsets = [0, 1], sizes = [8, 1], strides = [1, 1]} : vector<8x8xf32> to vector<8x1xf32>
    %624 = vector.extract_strided_slice %615 {offsets = [1, 0], sizes = [1, 256], strides = [1, 1]} : vector<8x256xf32> to vector<1x256xf32>
    %625 = vector.broadcast %623 : vector<8x1xf32> to vector<8x256xf32>
    %626 = vector.broadcast %624 : vector<1x256xf32> to vector<8x256xf32>
    %627 = arith.mulf %625, %626 : vector<8x256xf32>
    %628 = arith.addf %622, %627 : vector<8x256xf32>
    %629 = vector.extract_strided_slice %617 {offsets = [0, 2], sizes = [8, 1], strides = [1, 1]} : vector<8x8xf32> to vector<8x1xf32>
    %630 = vector.extract_strided_slice %615 {offsets = [2, 0], sizes = [1, 256], strides = [1, 1]} : vector<8x256xf32> to vector<1x256xf32>
    %631 = vector.broadcast %629 : vector<8x1xf32> to vector<8x256xf32>
    %632 = vector.broadcast %630 : vector<1x256xf32> to vector<8x256xf32>
    %633 = arith.mulf %631, %632 : vector<8x256xf32>
    %634 = arith.addf %628, %633 : vector<8x256xf32>
    %635 = vector.extract_strided_slice %617 {offsets = [0, 3], sizes = [8, 1], strides = [1, 1]} : vector<8x8xf32> to vector<8x1xf32>
    %636 = vector.extract_strided_slice %615 {offsets = [3, 0], sizes = [1, 256], strides = [1, 1]} : vector<8x256xf32> to vector<1x256xf32>
    %637 = vector.broadcast %635 : vector<8x1xf32> to vector<8x256xf32>
    %638 = vector.broadcast %636 : vector<1x256xf32> to vector<8x256xf32>
    %639 = arith.mulf %637, %638 : vector<8x256xf32>
    %640 = arith.addf %634, %639 : vector<8x256xf32>
    %641 = vector.extract_strided_slice %617 {offsets = [0, 4], sizes = [8, 1], strides = [1, 1]} : vector<8x8xf32> to vector<8x1xf32>
    %642 = vector.extract_strided_slice %615 {offsets = [4, 0], sizes = [1, 256], strides = [1, 1]} : vector<8x256xf32> to vector<1x256xf32>
    %643 = vector.broadcast %641 : vector<8x1xf32> to vector<8x256xf32>
    %644 = vector.broadcast %642 : vector<1x256xf32> to vector<8x256xf32>
    %645 = arith.mulf %643, %644 : vector<8x256xf32>
    %646 = arith.addf %640, %645 : vector<8x256xf32>
    %647 = vector.extract_strided_slice %617 {offsets = [0, 5], sizes = [8, 1], strides = [1, 1]} : vector<8x8xf32> to vector<8x1xf32>
    %648 = vector.extract_strided_slice %615 {offsets = [5, 0], sizes = [1, 256], strides = [1, 1]} : vector<8x256xf32> to vector<1x256xf32>
    %649 = vector.broadcast %647 : vector<8x1xf32> to vector<8x256xf32>
    %650 = vector.broadcast %648 : vector<1x256xf32> to vector<8x256xf32>
    %651 = arith.mulf %649, %650 : vector<8x256xf32>
    %652 = arith.addf %646, %651 : vector<8x256xf32>
    %653 = vector.extract_strided_slice %617 {offsets = [0, 6], sizes = [8, 1], strides = [1, 1]} : vector<8x8xf32> to vector<8x1xf32>
    %654 = vector.extract_strided_slice %615 {offsets = [6, 0], sizes = [1, 256], strides = [1, 1]} : vector<8x256xf32> to vector<1x256xf32>
    %655 = vector.broadcast %653 : vector<8x1xf32> to vector<8x256xf32>
    %656 = vector.broadcast %654 : vector<1x256xf32> to vector<8x256xf32>
    %657 = arith.mulf %655, %656 : vector<8x256xf32>
    %658 = arith.addf %652, %657 : vector<8x256xf32>
    %659 = vector.extract_strided_slice %617 {offsets = [0, 7], sizes = [8, 1], strides = [1, 1]} : vector<8x8xf32> to vector<8x1xf32>
    %660 = vector.extract_strided_slice %615 {offsets = [7, 0], sizes = [1, 256], strides = [1, 1]} : vector<8x256xf32> to vector<1x256xf32>
    %661 = vector.broadcast %659 : vector<8x1xf32> to vector<8x256xf32>
    %662 = vector.broadcast %660 : vector<1x256xf32> to vector<8x256xf32>
    %663 = arith.mulf %661, %662 : vector<8x256xf32>
    %664 = arith.addf %658, %663 : vector<8x256xf32>
    %665 = arith.addf %612, %664 : vector<8x256xf32>
    %c239_i32 = arith.constant 239 : i32
    %666 = tpu.dynamic_rotate %209 by %c239_i32 dim 1 : vector<8x256xf32>, i32 -> vector<8x256xf32>
    %667 = arith.mulf %242, %234 : vector<1x256xf32>
    %668 = vector.broadcast %667 : vector<1x256xf32> to vector<8x256xf32>
    %669 = arith.mulf %666, %668 : vector<8x256xf32>
    %c8 = arith.constant 8 : index
    %c0_65 = arith.constant 0 : index
    %c0_66 = arith.constant 0 : index
    %670 = vector.load %arg11[%c8, %c0_65, %c0_66] : memref<9x8x8xf32, #tpu.memory_space<vmem>>, vector<1x8x8xf32>
    %671 = vector.shape_cast %670 : vector<1x8x8xf32> to vector<8x8xf32>
    %672 = vector.extract_strided_slice %671 {offsets = [0, 0], sizes = [8, 1], strides = [1, 1]} : vector<8x8xf32> to vector<8x1xf32>
    %673 = vector.extract_strided_slice %669 {offsets = [0, 0], sizes = [1, 256], strides = [1, 1]} : vector<8x256xf32> to vector<1x256xf32>
    %674 = vector.broadcast %672 : vector<8x1xf32> to vector<8x256xf32>
    %675 = vector.broadcast %673 : vector<1x256xf32> to vector<8x256xf32>
    %676 = arith.mulf %674, %675 : vector<8x256xf32>
    %677 = vector.extract_strided_slice %671 {offsets = [0, 1], sizes = [8, 1], strides = [1, 1]} : vector<8x8xf32> to vector<8x1xf32>
    %678 = vector.extract_strided_slice %669 {offsets = [1, 0], sizes = [1, 256], strides = [1, 1]} : vector<8x256xf32> to vector<1x256xf32>
    %679 = vector.broadcast %677 : vector<8x1xf32> to vector<8x256xf32>
    %680 = vector.broadcast %678 : vector<1x256xf32> to vector<8x256xf32>
    %681 = arith.mulf %679, %680 : vector<8x256xf32>
    %682 = arith.addf %676, %681 : vector<8x256xf32>
    %683 = vector.extract_strided_slice %671 {offsets = [0, 2], sizes = [8, 1], strides = [1, 1]} : vector<8x8xf32> to vector<8x1xf32>
    %684 = vector.extract_strided_slice %669 {offsets = [2, 0], sizes = [1, 256], strides = [1, 1]} : vector<8x256xf32> to vector<1x256xf32>
    %685 = vector.broadcast %683 : vector<8x1xf32> to vector<8x256xf32>
    %686 = vector.broadcast %684 : vector<1x256xf32> to vector<8x256xf32>
    %687 = arith.mulf %685, %686 : vector<8x256xf32>
    %688 = arith.addf %682, %687 : vector<8x256xf32>
    %689 = vector.extract_strided_slice %671 {offsets = [0, 3], sizes = [8, 1], strides = [1, 1]} : vector<8x8xf32> to vector<8x1xf32>
    %690 = vector.extract_strided_slice %669 {offsets = [3, 0], sizes = [1, 256], strides = [1, 1]} : vector<8x256xf32> to vector<1x256xf32>
    %691 = vector.broadcast %689 : vector<8x1xf32> to vector<8x256xf32>
    %692 = vector.broadcast %690 : vector<1x256xf32> to vector<8x256xf32>
    %693 = arith.mulf %691, %692 : vector<8x256xf32>
    %694 = arith.addf %688, %693 : vector<8x256xf32>
    %695 = vector.extract_strided_slice %671 {offsets = [0, 4], sizes = [8, 1], strides = [1, 1]} : vector<8x8xf32> to vector<8x1xf32>
    %696 = vector.extract_strided_slice %669 {offsets = [4, 0], sizes = [1, 256], strides = [1, 1]} : vector<8x256xf32> to vector<1x256xf32>
    %697 = vector.broadcast %695 : vector<8x1xf32> to vector<8x256xf32>
    %698 = vector.broadcast %696 : vector<1x256xf32> to vector<8x256xf32>
    %699 = arith.mulf %697, %698 : vector<8x256xf32>
    %700 = arith.addf %694, %699 : vector<8x256xf32>
    %701 = vector.extract_strided_slice %671 {offsets = [0, 5], sizes = [8, 1], strides = [1, 1]} : vector<8x8xf32> to vector<8x1xf32>
    %702 = vector.extract_strided_slice %669 {offsets = [5, 0], sizes = [1, 256], strides = [1, 1]} : vector<8x256xf32> to vector<1x256xf32>
    %703 = vector.broadcast %701 : vector<8x1xf32> to vector<8x256xf32>
    %704 = vector.broadcast %702 : vector<1x256xf32> to vector<8x256xf32>
    %705 = arith.mulf %703, %704 : vector<8x256xf32>
    %706 = arith.addf %700, %705 : vector<8x256xf32>
    %707 = vector.extract_strided_slice %671 {offsets = [0, 6], sizes = [8, 1], strides = [1, 1]} : vector<8x8xf32> to vector<8x1xf32>
    %708 = vector.extract_strided_slice %669 {offsets = [6, 0], sizes = [1, 256], strides = [1, 1]} : vector<8x256xf32> to vector<1x256xf32>
    %709 = vector.broadcast %707 : vector<8x1xf32> to vector<8x256xf32>
    %710 = vector.broadcast %708 : vector<1x256xf32> to vector<8x256xf32>
    %711 = arith.mulf %709, %710 : vector<8x256xf32>
    %712 = arith.addf %706, %711 : vector<8x256xf32>
    %713 = vector.extract_strided_slice %671 {offsets = [0, 7], sizes = [8, 1], strides = [1, 1]} : vector<8x8xf32> to vector<8x1xf32>
    %714 = vector.extract_strided_slice %669 {offsets = [7, 0], sizes = [1, 256], strides = [1, 1]} : vector<8x256xf32> to vector<1x256xf32>
    %715 = vector.broadcast %713 : vector<8x1xf32> to vector<8x256xf32>
    %716 = vector.broadcast %714 : vector<1x256xf32> to vector<8x256xf32>
    %717 = arith.mulf %715, %716 : vector<8x256xf32>
    %718 = arith.addf %712, %717 : vector<8x256xf32>
    %719 = arith.addf %665, %718 : vector<8x256xf32>
    %c0_67 = arith.constant 0 : index
    %c0_68 = arith.constant 0 : index
    %720 = vector.load %arg12[%c0_67, %c0_68] : memref<8x1xf32, #tpu.memory_space<vmem>>, vector<8x1xf32>
    %721 = vector.broadcast %720 : vector<8x1xf32> to vector<8x256xf32>
    %722 = arith.addf %719, %721 : vector<8x256xf32>
    %cst_69 = arith.constant 0.000000e+00 : f32
    %723 = vector.broadcast %cst_69 : f32 to vector<8x256xf32>
    %724 = arith.cmpf oge, %722, %723 : vector<8x256xf32>
    %cst_70 = arith.constant 2.000000e-01 : f32
    %725 = vector.broadcast %cst_70 : f32 to vector<8x256xf32>
    %726 = arith.mulf %725, %722 : vector<8x256xf32>
    %727 = arith.select %724, %722, %726 : vector<8x256xi1>, vector<8x256xf32>
    %c0_71 = arith.constant 0 : index
    %c0_72 = arith.constant 0 : index
    %728 = vector.load %arg13[%c0_71, %c0_72] : memref<4x8xf32, #tpu.memory_space<vmem>>, vector<4x8xf32>
    %729 = vector.extract_strided_slice %728 {offsets = [0, 0], sizes = [4, 1], strides = [1, 1]} : vector<4x8xf32> to vector<4x1xf32>
    %730 = vector.extract_strided_slice %727 {offsets = [0, 0], sizes = [1, 256], strides = [1, 1]} : vector<8x256xf32> to vector<1x256xf32>
    %731 = vector.broadcast %729 : vector<4x1xf32> to vector<4x256xf32>
    %732 = vector.broadcast %730 : vector<1x256xf32> to vector<4x256xf32>
    %733 = arith.mulf %731, %732 : vector<4x256xf32>
    %734 = vector.extract_strided_slice %728 {offsets = [0, 1], sizes = [4, 1], strides = [1, 1]} : vector<4x8xf32> to vector<4x1xf32>
    %735 = vector.extract_strided_slice %727 {offsets = [1, 0], sizes = [1, 256], strides = [1, 1]} : vector<8x256xf32> to vector<1x256xf32>
    %736 = vector.broadcast %734 : vector<4x1xf32> to vector<4x256xf32>
    %737 = vector.broadcast %735 : vector<1x256xf32> to vector<4x256xf32>
    %738 = arith.mulf %736, %737 : vector<4x256xf32>
    %739 = arith.addf %733, %738 : vector<4x256xf32>
    %740 = vector.extract_strided_slice %728 {offsets = [0, 2], sizes = [4, 1], strides = [1, 1]} : vector<4x8xf32> to vector<4x1xf32>
    %741 = vector.extract_strided_slice %727 {offsets = [2, 0], sizes = [1, 256], strides = [1, 1]} : vector<8x256xf32> to vector<1x256xf32>
    %742 = vector.broadcast %740 : vector<4x1xf32> to vector<4x256xf32>
    %743 = vector.broadcast %741 : vector<1x256xf32> to vector<4x256xf32>
    %744 = arith.mulf %742, %743 : vector<4x256xf32>
    %745 = arith.addf %739, %744 : vector<4x256xf32>
    %746 = vector.extract_strided_slice %728 {offsets = [0, 3], sizes = [4, 1], strides = [1, 1]} : vector<4x8xf32> to vector<4x1xf32>
    %747 = vector.extract_strided_slice %727 {offsets = [3, 0], sizes = [1, 256], strides = [1, 1]} : vector<8x256xf32> to vector<1x256xf32>
    %748 = vector.broadcast %746 : vector<4x1xf32> to vector<4x256xf32>
    %749 = vector.broadcast %747 : vector<1x256xf32> to vector<4x256xf32>
    %750 = arith.mulf %748, %749 : vector<4x256xf32>
    %751 = arith.addf %745, %750 : vector<4x256xf32>
    %752 = vector.extract_strided_slice %728 {offsets = [0, 4], sizes = [4, 1], strides = [1, 1]} : vector<4x8xf32> to vector<4x1xf32>
    %753 = vector.extract_strided_slice %727 {offsets = [4, 0], sizes = [1, 256], strides = [1, 1]} : vector<8x256xf32> to vector<1x256xf32>
    %754 = vector.broadcast %752 : vector<4x1xf32> to vector<4x256xf32>
    %755 = vector.broadcast %753 : vector<1x256xf32> to vector<4x256xf32>
    %756 = arith.mulf %754, %755 : vector<4x256xf32>
    %757 = arith.addf %751, %756 : vector<4x256xf32>
    %758 = vector.extract_strided_slice %728 {offsets = [0, 5], sizes = [4, 1], strides = [1, 1]} : vector<4x8xf32> to vector<4x1xf32>
    %759 = vector.extract_strided_slice %727 {offsets = [5, 0], sizes = [1, 256], strides = [1, 1]} : vector<8x256xf32> to vector<1x256xf32>
    %760 = vector.broadcast %758 : vector<4x1xf32> to vector<4x256xf32>
    %761 = vector.broadcast %759 : vector<1x256xf32> to vector<4x256xf32>
    %762 = arith.mulf %760, %761 : vector<4x256xf32>
    %763 = arith.addf %757, %762 : vector<4x256xf32>
    %764 = vector.extract_strided_slice %728 {offsets = [0, 6], sizes = [4, 1], strides = [1, 1]} : vector<4x8xf32> to vector<4x1xf32>
    %765 = vector.extract_strided_slice %727 {offsets = [6, 0], sizes = [1, 256], strides = [1, 1]} : vector<8x256xf32> to vector<1x256xf32>
    %766 = vector.broadcast %764 : vector<4x1xf32> to vector<4x256xf32>
    %767 = vector.broadcast %765 : vector<1x256xf32> to vector<4x256xf32>
    %768 = arith.mulf %766, %767 : vector<4x256xf32>
    %769 = arith.addf %763, %768 : vector<4x256xf32>
    %770 = vector.extract_strided_slice %728 {offsets = [0, 7], sizes = [4, 1], strides = [1, 1]} : vector<4x8xf32> to vector<4x1xf32>
    %771 = vector.extract_strided_slice %727 {offsets = [7, 0], sizes = [1, 256], strides = [1, 1]} : vector<8x256xf32> to vector<1x256xf32>
    %772 = vector.broadcast %770 : vector<4x1xf32> to vector<4x256xf32>
    %773 = vector.broadcast %771 : vector<1x256xf32> to vector<4x256xf32>
    %774 = arith.mulf %772, %773 : vector<4x256xf32>
    %775 = arith.addf %769, %774 : vector<4x256xf32>
    %c0_73 = arith.constant 0 : index
    %c0_74 = arith.constant 0 : index
    %776 = vector.load %arg14[%c0_73, %c0_74] : memref<4x1xf32, #tpu.memory_space<vmem>>, vector<4x1xf32>
    %777 = vector.broadcast %776 : vector<4x1xf32> to vector<4x256xf32>
    %778 = arith.addf %775, %777 : vector<4x256xf32>
    %779 = arith.addf %778, %1 : vector<4x256xf32>
    %c0_75 = arith.constant 0 : index
    %c0_76 = arith.constant 0 : index
    %c0_77 = arith.constant 0 : index
    %780 = vector.load %arg15[%c0_75, %c0_76, %c0_77] : memref<1x4x256xf32, #tpu.memory_space<vmem>>, vector<1x4x256xf32>
    %781 = vector.shape_cast %780 : vector<1x4x256xf32> to vector<4x256xf32>
    %782 = vector.shape_cast %779 : vector<4x256xf32> to vector<1x4x256xf32>
    tpu.vector_store %arg15[%c0_75, %c0_76, %c0_77], %782 {strides = array<i32>} : memref<1x4x256xf32, #tpu.memory_space<vmem>>, vector<1x4x256xf32>,
    return
  }
  func.func @transform_0(%arg0: i32) -> (i32, i32, i32) {
    %c0_i32 = arith.constant 0 : i32
    %c0_i32_0 = arith.constant 0 : i32
    %c0_i32_1 = arith.constant 0 : i32
    return %arg0, %c0_i32, %c0_i32_0 : i32, i32, i32
  }
  func.func @transform_1(%arg0: i32) -> (i32, i32) {
    %c0_i32 = arith.constant 0 : i32
    %c0_i32_0 = arith.constant 0 : i32
    %c0_i32_1 = arith.constant 0 : i32
    return %c0_i32, %c0_i32_0 : i32, i32
  }
  func.func @transform_2(%arg0: i32) -> (i32, i32) {
    %c0_i32 = arith.constant 0 : i32
    %c0_i32_0 = arith.constant 0 : i32
    %c0_i32_1 = arith.constant 0 : i32
    return %c0_i32, %c0_i32_0 : i32, i32
  }
  func.func @transform_3(%arg0: i32) -> (i32, i32) {
    %c0_i32 = arith.constant 0 : i32
    %c0_i32_0 = arith.constant 0 : i32
    %c0_i32_1 = arith.constant 0 : i32
    return %c0_i32, %c0_i32_0 : i32, i32
  }
  func.func @transform_4(%arg0: i32) -> (i32, i32) {
    %c0_i32 = arith.constant 0 : i32
    %c0_i32_0 = arith.constant 0 : i32
    %c0_i32_1 = arith.constant 0 : i32
    return %c0_i32, %c0_i32_0 : i32, i32
  }
  func.func @transform_5(%arg0: i32) -> (i32, i32) {
    %c0_i32 = arith.constant 0 : i32
    %c0_i32_0 = arith.constant 0 : i32
    %c0_i32_1 = arith.constant 0 : i32
    return %c0_i32, %c0_i32_0 : i32, i32
  }
  func.func @transform_6(%arg0: i32) -> (i32, i32) {
    %c0_i32 = arith.constant 0 : i32
    %c0_i32_0 = arith.constant 0 : i32
    %c0_i32_1 = arith.constant 0 : i32
    return %c0_i32, %c0_i32_0 : i32, i32
  }
  func.func @transform_7(%arg0: i32) -> (i32, i32) {
    %c0_i32 = arith.constant 0 : i32
    %c0_i32_0 = arith.constant 0 : i32
    %c0_i32_1 = arith.constant 0 : i32
    return %c0_i32, %c0_i32_0 : i32, i32
  }
  func.func @transform_8(%arg0: i32) -> (i32, i32) {
    %c0_i32 = arith.constant 0 : i32
    %c0_i32_0 = arith.constant 0 : i32
    %c0_i32_1 = arith.constant 0 : i32
    return %c0_i32, %c0_i32_0 : i32, i32
  }
  func.func @transform_9(%arg0: i32) -> (i32, i32) {
    %c0_i32 = arith.constant 0 : i32
    %c0_i32_0 = arith.constant 0 : i32
    %c0_i32_1 = arith.constant 0 : i32
    return %c0_i32, %c0_i32_0 : i32, i32
  }
  func.func @transform_10(%arg0: i32) -> (i32, i32, i32) {
    %c0_i32 = arith.constant 0 : i32
    %c0_i32_0 = arith.constant 0 : i32
    %c0_i32_1 = arith.constant 0 : i32
    %c0_i32_2 = arith.constant 0 : i32
    return %c0_i32, %c0_i32_0, %c0_i32_1 : i32, i32, i32
  }
  func.func @transform_11(%arg0: i32) -> (i32, i32) {
    %c0_i32 = arith.constant 0 : i32
    %c0_i32_0 = arith.constant 0 : i32
    %c0_i32_1 = arith.constant 0 : i32
    return %c0_i32, %c0_i32_0 : i32, i32
  }
  func.func @transform_12(%arg0: i32) -> (i32, i32) {
    %c0_i32 = arith.constant 0 : i32
    %c0_i32_0 = arith.constant 0 : i32
    %c0_i32_1 = arith.constant 0 : i32
    return %c0_i32, %c0_i32_0 : i32, i32
  }
  func.func @transform_13(%arg0: i32) -> (i32, i32) {
    %c0_i32 = arith.constant 0 : i32
    %c0_i32_0 = arith.constant 0 : i32
    %c0_i32_1 = arith.constant 0 : i32
    return %c0_i32, %c0_i32_0 : i32, i32
  }
  func.func @transform_14(%arg0: i32) -> (i32, i32, i32) {
    %c0_i32 = arith.constant 0 : i32
    %c0_i32_0 = arith.constant 0 : i32
    %c0_i32_1 = arith.constant 0 : i32
    return %arg0, %c0_i32, %c0_i32_0 : i32, i32, i32
  }
}

</mosaic_0001>

<bundles_post_ra>
// kernel: convdown_forward.1
= control target key start
LH: loop header
LB: loop body
LE: loop exit
PB: predicated region body
PF: predicated region fallthrough
CT: control target
= control target key end

     0   :  { %s2990_s29 = smov 0   ;;  %s4237_s0 = inlined_call_operand.vmem [shape: f32[2,4,256], index: 0, kind: input, shape index: {}]   ;;  %s4238_s1 = inlined_call_operand.vmem [shape: f32[4,1], index: 1, kind: input, shape index: {}]   ;;  %s4239_s2 = inlined_call_operand.vmem [shape: f32[4,1], index: 2, kind: input, shape index: {}]   ;;  %s4240_s3 = inlined_call_operand.vmem [shape: f32[12,4], index: 3, kind: input, shape index: {}]   ;;  %s4241_s4 = inlined_call_operand.vmem [shape: f32[12,1], index: 4, kind: input, shape index: {}]   ;;  %s4242_s5 = inlined_call_operand.vmem [shape: f32[4,4], index: 5, kind: input, shape index: {}]   ;;  %s4243_s6 = inlined_call_operand.vmem [shape: f32[4,1], index: 6, kind: input, shape index: {}]   ;;  %s4244_s7 = inlined_call_operand.vmem [shape: f32[8,4], index: 7, kind: input, shape index: {}]   ;;  %s4245_s8 = inlined_call_operand.vmem [shape: f32[8,4], index: 8, kind: input, shape index: {}]   ;;  %s4246_s9 = inlined_call_operand.vmem [shape: f32[8,1], index: 9, kind: input, shape index: {}]   ;;  %s4247_s10 = inlined_call_operand.vmem [shape: f32[9,8,8], index: 10, kind: input, shape index: {}]   ;;  %s4248_s11 = inlined_call_operand.vmem [shape: f32[8,1], index: 11, kind: input, shape index: {}]   ;;  %s4249_s12 = inlined_call_operand.vmem [shape: f32[4,8], index: 12, kind: input, shape index: {}]   ;;  %s4250_s13 = inlined_call_operand.vmem [shape: f32[4,1], index: 13, kind: input, shape index: {}]   ;;  %s4251_s14 = inlined_call_operand.vmem [shape: f32[2,4,256], index: 14, kind: output, shape index: {}]  }
   0x1 LB: > { %s2724_s30 = sadd.s32 4294967295, %s2895_s29   ;;  %p2728_p0 = scmp.ge.s32.totalorder %s2895_s29, 1  ;;  %s2895_s29 = sphi %s2990_s29, %s24_s29  }
   0x2   : > { %p412_p1 = scmp.lt.s32.totalorder %s2895_s29, 3 }
   0x4   : > { %p413_p2 = pnand %p2728_p0, %p412_p1 }
   0x6   : > { %416 = sbr.rel (%p413_p2) target bundleno = 1041 (0x411), region = 76 }
   0xd   : > { %v553_v0 = vld [vmem:[%s4240_s3] sm:$0xff]  ;;  %v4257_v2 = vmov 0   ;;  %v4263_v4 = vmov 1   ;;  %v4254_v5 = vmov 2   ;;  %p458_p3 = scmp.lt.s32.totalorder %s2724_s30, 1  ;;  %v4261_v6 = vmov 3  }
   0xe   : > { %v525_v1 = vld [vmem:[%s4238_s1] sm:$0xf]  ;;  %2778 = vset.pattern.permute.xlu1 %v4257_v2  ;;  %2777 = vset.pattern.permute.xlu0 %v4257_v2  ;;  %v554_v8 = vld [vmem:[%s4240_s3 + $0x8] sm:$0xf]  ;;  %vm473_vm0 = vcmask 1043456   ;;  %v4252_v56 = vlaneseq  ;;  %vm800_vm1 = vcmask 1047556  }
   0xf   : > { %557 = vperm.xlu1 %2778, %v553_v0   ;;  %528 = vperm.xlu0 %2777, %v525_v1   ;;  %v539_v3 = vld [vmem:[%s4239_s2] sm:$0xf]  ;;  %s4454_s30 = smov (!%p458_p3, %s2724_s30), 1  ;;  %v691_v15 = vld [vmem:[%s4241_s4 + $0x8] sm:$0xf]  ;;  %s2906_s21 = smov 17  }
  0x10   : > { %v690_v7 = vld [vmem:[%s4241_s4] sm:$0xff]  ;;  %s2749_s25 = sshll.u32 %s4454_s30, 3  ;;  %v2901_v54 = vmov 839922192   ;;  %v534_v59 = vshrl.u32 %v4252_v56, 7  ;;  %s2907_s22 = smov 16  }
  0x11   : > { %s3027_s28 = scalar_lea.vmem %s4237_s0, %s2749_s25  ;;  %v949_v24 = vld [vmem:[%s4242_s5] sm:$0xf]  ;;  %v531_v55 = vunpack.c.l.s4 %v2901_v54  ;;  %s2908_s23 = smov 15  }
  0x12   : > { %v469_v9 = vld [vmem:[%s3027_s28] sm:$0xff]  ;;  %s2909_s24 = smov 1   ;;  %s2910_s26 = smov 127  }
  0x13   : > { %2779 = vset.pattern.permute.xlu1 %v4263_v4  ;;  %542 = vperm.xlu0 %2777, %v539_v3   ;;  %v3031_v10 = vcombine.high %v469_v9, %v469_v9  ;;  %v474_v11 = vsel %vm473_vm0, %v469_v9, 0.0  ;;  %v1013_v31 = vld [vmem:[%s4243_s6] sm:$0xf]  ;;  %v532_v58 = vunpack.c.0.s8 %v531_v55  ;;  %s2911_s27 = smov 113   ;;  %s2912_s15 = smov 112  }
  0x14   : > { %589 = vperm.xlu1 %2779, %v553_v0   ;;  %v475_v13 = vrot.slane %v474_v11, 4  ;;  %v1021_v33 = vld [vmem:[%s4244_s7] sm:$0xff]  ;;  %s2913_s16 = smov 111  }
  0x15   : > { %4321 = vst [vmem:[#allocation2_spill] sm:$0xff] %v3031_v10  ;;  %v481_v12 = vsel %vm473_vm0, %v3031_v10, 0.0  ;;  %v3063_v44 = vld [vmem:[%s4245_s8] sm:$0xff]  ;;  %v535_v61 = vsub.s32 %v532_v58, %v534_v59 }
  0x16   : > { %v482_v14 = vrot.slane %v481_v12, 4  ;;  %v476_v16 = vadd.f32 %v475_v13, %v474_v11  ;;  %v3077_v11 = vsub.s32 1, %v534_v59 }
  0x17   : > { %2780 = vset.pattern.permute.xlu0 %v4254_v5 }
  0x18   : > { %2781 = vset.pattern.permute.xlu1 %v4261_v6  ;;  %623 = vperm.xlu0 %2780, %v553_v0   ;;  %v483_v17 = vadd.f32 %v482_v14, %v481_v12  ;;  %v477_v18 = vrot.slane %v476_v16, 2  ;;  %v3079_v12 = vsub.s32 5, %v534_v59 }
  0x19   : > { %657 = vperm.xlu1 %2781, %v553_v0  }
  0x1a   : > { %v484_v19 = vrot.slane %v483_v17, 2  ;;  %v478_v20 = vadd.f32 %v477_v18, %v476_v16  ;;  %v3081_v16 = vsub.s32 2, %v534_v59  ;;  %v3085_v18 = vsub.s32 3, %v534_v59 }
  0x1c   : > { %v485_v21 = vadd.f32 %v484_v19, %v483_v17  ;;  %v479_v22 = vrot.slane %v478_v20, 1  ;;  %v3083_v17 = vsub.s32 6, %v534_v59  ;;  %v3087_v19 = vsub.s32 7, %v534_v59 }
  0x1d   : > { %2782 = vset.pattern.permute.xlu1 %v4257_v2 }
  0x1e   : > { %694 = vperm.xlu1 %2782, %v690_v7   ;;  %v486_v23 = vrot.slane %v485_v21, 1  ;;  %v480_v25 = vadd.f32 %v479_v22, %v478_v20  ;;  %v3073_v7 = vsub.s32 0, %v534_v59 }
  0x20   : > { %v487_v26 = vadd.f32 %v486_v23, %v485_v21  ;;  %v489_v27 = vmul.f32 0.25, %v480_v25 }
  0x22   : > { %562 = vperm.xlu1 %2782, %v554_v8   ;;  %v490_v28 = vmul.f32 0.25, %v487_v26 }
  0x24   : > { %v493_v29 = vcombine.low %v489_v27, %v490_v28 }
  0x26   : > { %2783 = vset.pattern.permute.xlu1 %v4263_v4  ;;  %v495_v30 = vsub.f32 %v469_v9, %v493_v29 }
  0x27   : > { %593 = vperm.xlu1 %2783, %v554_v8  }
  0x28   : > { %v496_v32 = vmul.f32 %v495_v30, %v495_v30 }
  0x2a   : > { %v498_v34 = vcombine.high %v496_v32, %v496_v32  ;;  %v500_v35 = vsel %vm473_vm0, %v496_v32, 0.0 }
  0x2b   : > { %2784 = vset.pattern.permute.xlu1 %v4254_v5  ;;  %v501_v37 = vrot.slane %v500_v35, 4 }
  0x2c   : > { %627 = vperm.xlu1 %2784, %v554_v8   ;;  %v507_v36 = vsel %vm473_vm0, %v498_v34, 0.0 }
  0x2d   : > { %v508_v38 = vrot.slane %v507_v36, 4  ;;  %v502_v39 = vadd.f32 %v501_v37, %v500_v35 }
  0x2f   : > { %v509_v40 = vadd.f32 %v508_v38, %v507_v36  ;;  %v503_v41 = vrot.slane %v502_v39, 2 }
  0x30   : > { %2785 = vset.pattern.permute.xlu1 %v4261_v6 }
  0x31   : > { %661 = vperm.xlu1 %2785, %v554_v8   ;;  %v510_v42 = vrot.slane %v509_v40, 2  ;;  %v504_v43 = vadd.f32 %v503_v41, %v502_v39  ;;  %v3075_v8 = vsub.s32 4, %v534_v59 }
  0x33   : > { %v511_v45 = vadd.f32 %v510_v42, %v509_v40  ;;  %v505_v46 = vrot.slane %v504_v43, 1 }
  0x35   : > { %2786 = vset.pattern.permute.xlu1 %v4257_v2  ;;  %v512_v47 = vrot.slane %v511_v45, 1  ;;  %v506_v48 = vadd.f32 %v505_v46, %v504_v43 }
  0x36   : > { %699 = vperm.xlu1 %2786, %v691_v15  }
  0x37   : > { %v513_v49 = vadd.f32 %v512_v47, %v511_v45  ;;  %v514_v50 = vmul.f32 0.25, %v506_v48 }
  0x39   : > { %v515_v51 = vmul.f32 0.25, %v513_v49  ;;  %v516_v52 = vadd.f32 1e-05, %v514_v50 }
  0x3a   : > { %952 = vperm.xlu1 %2786, %v949_v24  }
  0x3b   : > { %v517_v53 = vadd.f32 1e-05, %v515_v51  ;;  %2869 = vrsqrt.f32 %v516_v52 }
  0x3d   : > { %2871 = vrsqrt.f32 %v517_v53 }
  0x3e   : > { %2787 = vset.pattern.permute.xlu1 %v4263_v4 }
  0x3f   : > { %966 = vperm.xlu1 %2787, %v949_v24  }
  0x43   : > { %2788 = vset.pattern.permute.xlu1 %v4254_v5 }
  0x44   : > { %982 = vperm.xlu1 %2788, %v949_v24  }
  0x45   : > { %v2870_v57 = vpop.eup %2869 }
  0x47   : > { %v2872_v60 = vpop.eup %2871 }
  0x48   : > { %2789 = vset.pattern.permute.xlu1 %v4261_v6  ;;  %v522_v62 = vcombine.low %v2870_v57, %v2872_v60 }
  0x49   : > { %998 = vperm.xlu1 %2789, %v949_v24  }
  0x4a   : > { %v524_v1 = vmul.f32 %v522_v62, %v495_v30 }
  0x4d   : > { %2790 = vset.pattern.permute.xlu1 %v4257_v2 }
  0x4e   : > { %1016 = vperm.xlu1 %2790, %v1013_v31  }
  0x52   : > { %1024 = vperm.xlu1 %2790, %v1021_v33  }
  0x56   : > { %2791 = vset.pattern.permute.xlu1 %v4263_v4 }
  0x57   : > { %1038 = vperm.xlu1 %2791, %v1021_v33  }
  0x5b   : > { %2792 = vset.pattern.permute.xlu1 %v4254_v5 }
  0x5c   : > { %1054 = vperm.xlu1 %2792, %v1021_v33  }
  0x60   : > { %2793 = vset.pattern.permute.xlu1 %v4261_v6 }
  0x61   : > { %1070 = vperm.xlu1 %2793, %v1021_v33  }
  0x65   : > { %2794 = vset.pattern.permute.xlu1 %v4257_v2 }
  0x66   : > { %1088 = vperm.xlu1 %2794, %v3063_v44  }
  0x6a   : > { %2795 = vset.pattern.permute.xlu1 %v4263_v4 }
  0x6b   : > { %1112 = vperm.xlu1 %2795, %v3063_v44  }
  0x6f   : > { %2796 = vset.pattern.permute.xlu1 %v4261_v6 }
  0x70   : > { %1164 = vperm.xlu1 %2796, %v3063_v44  }
  0x74   : > { %2797 = vset.pattern.permute.xlu1 %v4257_v2 }
  0x8e   : > { %v529_v63 = vpop.permute.xlu0 %528  ;;  %v558_v0 = vpop.permute.xlu1 %557 }
  0x8f   : > { %v536_v3 = vrot.slane %v529_v63, %v535_v61 }
  0x91   : > { %v538_v13 = vmul.f32 %v536_v3, %v524_v1 }
  0x92   : > { %v543_v9 = vpop.permute.xlu0 %542 }
  0x93   : > { %v550_v14 = vrot.slane %v543_v9, %v535_v61  ;;  %v590_v15 = vpop.permute.xlu1 %589 }
  0x95   : > { %v552_v20 = vadd.f32 %v550_v14, %v538_v13 }
  0x97   : > { %v569_v21 = vrot.slane %v552_v20, %v3073_v7  ;;  %v573_v22 = vrot.slane %v552_v20, %v3075_v8  ;;  %v599_v23 = vrot.slane %v552_v20, %v3077_v11  ;;  %v603_v24 = vrot.slane %v552_v20, %v3079_v12  ;;  %v624_v36 = vpop.permute.xlu0 %623 }
  0x98   : > { %v658_v25 = vpop.permute.xlu1 %657  ;;  %v667_v26 = vrot.slane %v552_v20, %v3085_v18  ;;  %v671_v27 = vrot.slane %v552_v20, %v3087_v19  ;;  %v633_v28 = vrot.slane %v552_v20, %v3081_v16  ;;  %v637_v29 = vrot.slane %v552_v20, %v3083_v17 }
  0x99   : > { %v579_v30 = vrot.slane %v569_v21, %v3073_v7  ;;  %v583_v31 = vrot.slane %v573_v22, %v3073_v7  ;;  %v609_v32 = vrot.slane %v599_v23, %v3077_v11  ;;  %v613_v33 = vrot.slane %v603_v24, %v3077_v11 }
  0x9a   : > { %v677_v34 = vrot.slane %v667_v26, %v3085_v18  ;;  %v681_v35 = vrot.slane %v671_v27, %v3085_v18  ;;  %v643_v37 = vrot.slane %v633_v28, %v3081_v16  ;;  %v647_v38 = vrot.slane %v637_v29, %v3081_v16 }
  0x9b   : > { %v584_v39 = vmul.f32 %v579_v30, %v558_v0  ;;  %v585_v40 = vmul.f32 %v583_v31, %v558_v0  ;;  %v614_v41 = vmul.f32 %v609_v32, %v590_v15  ;;  %v615_v42 = vmul.f32 %v613_v33, %v590_v15 }
  0x9c   : > { %v648_v46 = vmul.f32 %v643_v37, %v624_v36  ;;  %v649_v47 = vmul.f32 %v647_v38, %v624_v36  ;;  %v682_v49 = vmul.f32 %v677_v34, %v658_v25  ;;  %v683_v50 = vmul.f32 %v681_v35, %v658_v25 }
  0x9d   : > { %v618_v43 = vadd.f32 %v614_v41, %v584_v39  ;;  %v619_v45 = vadd.f32 %v615_v42, %v585_v40  ;;  %v695_v48 = vpop.permute.xlu1 %694 }
  0x9f   : > { %v652_v51 = vadd.f32 %v648_v46, %v618_v43  ;;  %v653_v52 = vadd.f32 %v649_v47, %v619_v45 }
  0xa1   : > { %v686_v53 = vadd.f32 %v682_v49, %v652_v51  ;;  %v687_v54 = vadd.f32 %v683_v50, %v653_v52  ;;  %v563_v55 = vpop.permute.xlu1 %562 }
  0xa2   : > { %v586_v0 = vmul.f32 %v579_v30, %v563_v55  ;;  %v587_v22 = vmul.f32 %v583_v31, %v563_v55 }
  0xa3   : > { %v3105_v57 = vadd.f32 %v695_v48, %v686_v53  ;;  %v3107_v58 = vadd.f32 %v695_v48, %v687_v54 }
  0xa5   : > { %v726_v59 = vrot.slane %v3105_v57, 4  ;;  %v727_v60 = vrot.slane %v3107_v58, 4 }
  0xa6   : > { %v594_v61 = vpop.permute.xlu1 %593 }
  0xa7   : > { %v730_v62 = vsel %vm473_vm0, %v726_v59, 0.0  ;;  %v737_v63 = vsel %vm473_vm0, %v727_v60, 0.0  ;;  %v616_v1 = vmul.f32 %v609_v32, %v594_v61  ;;  %v617_v20 = vmul.f32 %v613_v33, %v594_v61 }
  0xa8   : > { %v731_v3 = vrot.slane %v730_v62, 4  ;;  %v738_v9 = vrot.slane %v737_v63, 4 }
  0xa9   : > { %v620_v13 = vadd.f32 %v616_v1, %v586_v0  ;;  %v621_v27 = vadd.f32 %v617_v20, %v587_v22 }
  0xaa   : > { %v732_v14 = vadd.f32 %v731_v3, %v730_v62  ;;  %v739_v15 = vadd.f32 %v738_v9, %v737_v63 }
  0xab   : > { %v628_v21 = vpop.permute.xlu1 %627 }
  0xac   : > { %v650_v23 = vmul.f32 %v643_v37, %v628_v21  ;;  %v651_v24 = vmul.f32 %v647_v38, %v628_v21  ;;  %v733_v25 = vrot.slane %v732_v14, 2  ;;  %v740_v26 = vrot.slane %v739_v15, 2 }
  0xae   : > { %v654_v28 = vadd.f32 %v650_v23, %v620_v13  ;;  %v734_v29 = vadd.f32 %v733_v25, %v732_v14  ;;  %v741_v36 = vadd.f32 %v740_v26, %v739_v15  ;;  %v655_v39 = vadd.f32 %v651_v24, %v621_v27 }
  0xb0   : > { %v662_v40 = vpop.permute.xlu1 %661  ;;  %v735_v41 = vrot.slane %v734_v29, 1  ;;  %v742_v42 = vrot.slane %v741_v36, 1 }
  0xb1   : > { %v684_v30 = vmul.f32 %v677_v34, %v662_v40  ;;  %v685_v32 = vmul.f32 %v681_v35, %v662_v40  ;;  %v3148_v40 = vld [vmem:[%s4247_s10] sm:$0xff] }
  0xb2   : > { %v736_v33 = vadd.f32 %v735_v41, %v734_v29  ;;  %v743_v46 = vadd.f32 %v742_v42, %v741_v36  ;;  %v1191_v36 = vld [vmem:[%s4246_s9] sm:$0xff]  ;;  %v3172_v41 = vld [vmem:[%s4247_s10 + $0x28] sm:$0xff]  ;;  %v4253_v42 = vmov 5  }
  0xb3   : > { %v3113_v43 = vadd.f32 %v684_v30, %v654_v28  ;;  %v689_v45 = vadd.f32 %v685_v32, %v655_v39  ;;  %v3142_v39 = vld [vmem:[%s4247_s10 + $0x8] sm:$0xff]  ;;  %1194 = vperm.xlu1 %2797, %v1191_v36   ;;  %v3165_v30 = vld [vmem:[%s4247_s10 + $0x10] sm:$0xff]  ;;  %v4271_v32 = vmov 4  }
  0xb4   : > { %v744_v37 = vmul.f32 0.25, %v736_v33  ;;  %v745_v38 = vmul.f32 0.25, %v743_v46  ;;  %v4255_v33 = vmov 7  }
  0xb5   : > { %v3115_v31 = vpop.permute.xlu1 %699 }
  0xb6   : > { %v3118_v47 = vadd.f32 %v3115_v31, %v689_v45  ;;  %v746_v48 = vsub.f32 %v3105_v57, %v744_v37  ;;  %v747_v49 = vsub.f32 %v3107_v58, %v745_v38  ;;  %v4259_v45 = vmov 6   ;;  %v3218_v38 = vld [vmem:[%s4247_s10 + $0x20] sm:$0xff] }
  0xb7   : > { %2798 = vset.pattern.permute.xlu1 %v4263_v4 }
  0xb8   : > { %v833_v34 = vpack.c.bf16 %v3118_v47, %v3118_v47  ;;  %v750_v35 = vmul.f32 %v746_v48, %v746_v48  ;;  %v751_v50 = vmul.f32 %v747_v49, %v747_v49  ;;  %1284 = vperm.xlu1 %2798, %v3148_v40  }
  0xba   : > { %874 = vmatprep.mubr.bf16.mxu0 %v833_v34  ;;  %v768_v51 = vrot.slane %v750_v35, 4  ;;  %v769_v52 = vrot.slane %v751_v50, 4 }
  0xbc   : > { %v772_v53 = vsel %vm473_vm0, %v768_v51, 0.0  ;;  %v779_v54 = vsel %vm473_vm0, %v769_v52, 0.0  ;;  %2799 = vset.pattern.permute.xlu1 %v4254_v5 }
  0xbd   : > { %v773_v55 = vrot.slane %v772_v53, 4  ;;  %v780_v59 = vrot.slane %v779_v54, 4  ;;  %1300 = vperm.xlu1 %2799, %v3148_v40  }
  0xbf   : > { %v774_v60 = vadd.f32 %v773_v55, %v772_v53  ;;  %v781_v61 = vadd.f32 %v780_v59, %v779_v54  ;;  %v3232_v53 = vadd.f32 %v3115_v31, %v3113_v43  ;;  %v3237_v55 = vpop.permute.xlu1 %952 }
  0xc1   : > { %v775_v62 = vrot.slane %v774_v60, 2  ;;  %v782_v63 = vrot.slane %v781_v61, 2  ;;  %2800 = vset.pattern.permute.xlu1 %v4271_v32  ;;  %v832_v54 = vpack.c.bf16 %v3232_v53, %v3232_v53 }
  0xc2   : > { %1332 = vperm.xlu1 %2800, %v3148_v40  }
  0xc3   : > { %v776_v0 = vadd.f32 %v775_v62, %v774_v60  ;;  %v783_v1 = vadd.f32 %v782_v63, %v781_v61  ;;  %v3239_v59 = vpop.permute.xlu1 %966 }
  0xc5   : > { %v777_v3 = vrot.slane %v776_v0, 1  ;;  %v784_v9 = vrot.slane %v783_v1, 1 }
  0xc6   : > { %2801 = vset.pattern.permute.xlu1 %v4253_v42 }
  0xc7   : > { %v778_v13 = vadd.f32 %v777_v3, %v776_v0  ;;  %v785_v14 = vadd.f32 %v784_v9, %v783_v1  ;;  %1348 = vperm.xlu1 %2801, %v3148_v40   ;;  %v3241_v60 = vpop.permute.xlu1 %982 }
  0xc9   : > { %v792_v15 = vadd.f32 1e-07, %v778_v13  ;;  %v793_v20 = vadd.f32 1e-07, %v785_v14 }
  0xcb   : > { %2873 = vrcp.f32 %v792_v15  ;;  %2802 = vset.pattern.permute.xlu1 %v4255_v33  ;;  %v3243_v61 = vpop.permute.xlu1 %998 }
  0xcc   : > { %2875 = vrcp.f32 %v793_v20  ;;  %1380 = vperm.xlu1 %2802, %v3148_v40   ;;  %v706_v20 = vsel %vm473_vm0, %v3105_v57, 0.0 }
  0xcf   : > { %v3245_v62 = vpop.permute.xlu1 %1016 }
  0xd0   : > { %2803 = vset.pattern.permute.xlu1 %v4257_v2 }
  0xd1   : > { %1408 = vperm.xlu1 %2803, %v3142_v39  }
  0xd3   : > { %v3247_v63 = vpop.permute.xlu1 %1024 }
  0xd5   : > { %v2874_v21 = vpop.eup %2873  ;;  %2805 = vset.pattern.permute.xlu1 %v4254_v5 }
  0xd6   : > { %v2876_v22 = vpop.eup %2875  ;;  %v3126_v23 = vmul.f32 %v2874_v21, %v750_v35  ;;  %1438 = vperm.xlu1 %2805, %v3142_v39   ;;  %v713_v21 = vsel %vm473_vm0, %v3107_v58, 0.0 }
  0xd7   : > { %v3128_v24 = vmul.f32 %v2876_v22, %v751_v50  ;;  %v3249_v43 = vpop.permute.xlu1 %1038  ;;  %v707_v22 = vrot.slane %v706_v20, 4 }
  0xd8   : > { %v798_v25 = vmul.f32 %v3126_v23, %v3126_v23 }
  0xd9   : > { %v799_v26 = vmul.f32 %v3128_v24, %v3128_v24 }
  0xda   : > { %v801_v27 = vsel %vm800_vm1, %v798_v25, 0.0  ;;  %2806 = vset.pattern.permute.xlu1 %v4261_v6  ;;  %v708_v25 = vadd.f32 %v707_v22, %v706_v20 }
  0xdb   : > { %v802_v28 = vsel %vm800_vm1, %v799_v26, 0.0  ;;  %1454 = vperm.xlu1 %2806, %v3142_v39   ;;  %v3251_v31 = vpop.permute.xlu1 %1054 }
  0xdc   : > { %v803_v29 = vadd.f32 %v802_v28, %v801_v27 }
  0xde   : > { %804 = vadd.xlane.f32.xlu0 %v803_v29 }
  0xdf   : > { %2807 = vset.pattern.permute.xlu1 %v4253_v42 }
  0xe0   : > { %1486 = vperm.xlu1 %2807, %v3142_v39   ;;  %v3253_v0 = vpop.permute.xlu1 %1070 }
  0xe4   : > { %2808 = vset.pattern.permute.xlu1 %v4259_v45 }
  0xe5   : > { %1502 = vperm.xlu1 %2808, %v3142_v39   ;;  %v3255_v1 = vpop.permute.xlu1 %1088 }
  0xe9   : > { %2809 = vset.pattern.permute.xlu1 %v4263_v4 }
  0xea   : > { %1564 = vperm.xlu1 %2809, %v3165_v30   ;;  %v3257_v3 = vpop.permute.xlu1 %1112 }
  0xee   : > { %2810 = vset.pattern.permute.xlu1 %v4254_v5 }
  0xef   : > { %1580 = vperm.xlu1 %2810, %v3165_v30   ;;  %v3259_v9 = vpop.permute.xlu1 %1164 }
  0xf3   : > { %2811 = vset.pattern.permute.xlu1 %v4271_v32 }
  0xf4   : > { %1138 = vperm.xlu0 %2780, %v3063_v44   ;;  %v3153_v44 = vld [vmem:[%s4247_s10 + $0x18] sm:$0xff]  ;;  %1612 = vperm.xlu1 %2811, %v3165_v30  }
  0xf8   : > { %2804 = vset.pattern.permute.xlu0 %v4263_v4  ;;  %2812 = vset.pattern.permute.xlu1 %v4253_v42 }
  0xf9   : > { %1422 = vperm.xlu0 %2804, %v3142_v39   ;;  %1628 = vperm.xlu1 %2812, %v3165_v30  }
  0xfd   : > { %1704 = vperm.xlu0 %2804, %v3153_v44   ;;  %2813 = vset.pattern.permute.xlu1 %v4255_v33 }
  0xfe   : > { %1660 = vperm.xlu1 %2813, %v3165_v30  }
 0x101   : > { %2815 = vset.pattern.permute.xlu0 %v4257_v2 }
 0x102   : > { %1270 = vperm.xlu0 %2815, %v3148_v40   ;;  %2814 = vset.pattern.permute.xlu1 %v4257_v2 }
 0x103   : > { %1690 = vperm.xlu1 %2814, %v3153_v44  }
 0x106   : > { %1550 = vperm.xlu0 %2815, %v3165_v30  }
 0x107   : > { %2816 = vset.pattern.permute.xlu1 %v4254_v5 }
 0x108   : > { %1720 = vperm.xlu1 %2816, %v3153_v44  }
 0x10a   : > { %1961 = vperm.xlu0 %2815, %v3172_v41  }
 0x10c   : > { %2817 = vset.pattern.permute.xlu1 %v4261_v6 }
 0x10d   : > { %1736 = vperm.xlu1 %2817, %v3153_v44  }
 0x10e   : > { %2829 = vset.pattern.permute.xlu0 %v4259_v45 }
 0x10f   : > { %1364 = vperm.xlu0 %2829, %v3148_v40  }
 0x111   : > { %2818 = vset.pattern.permute.xlu1 %v4253_v42 }
 0x112   : > { %1768 = vperm.xlu1 %2818, %v3153_v44  }
 0x113   : > { %1644 = vperm.xlu0 %2829, %v3165_v30  }
 0x116   : > { %2819 = vset.pattern.permute.xlu1 %v4259_v45 }
 0x117   : > { %2055 = vperm.xlu0 %2829, %v3172_v41   ;;  %1784 = vperm.xlu1 %2819, %v3153_v44  }
 0x11b   : > { %2836 = vset.pattern.permute.xlu0 %v4261_v6  ;;  %2820 = vset.pattern.permute.xlu1 %v4257_v2 }
 0x11c   : > { %1821 = vperm.xlu1 %2820, %v3218_v38  }
 0x120   : > { %2821 = vset.pattern.permute.xlu1 %v4263_v4 }
 0x121   : > { %1835 = vperm.xlu1 %2821, %v3218_v38  }
 0x125   : > { %2822 = vset.pattern.permute.xlu1 %v4261_v6 }
 0x126   : > { %1867 = vperm.xlu1 %2822, %v3218_v38  }
 0x12a   : > { %2823 = vset.pattern.permute.xlu1 %v4271_v32 }
 0x12b   : > { %1883 = vperm.xlu1 %2823, %v3218_v38  }
 0x12f   : > { %2824 = vset.pattern.permute.xlu1 %v4257_v2 }
 0x132   : > { %v3261_v13 = vpop.permute.xlu1 %1194 }
 0x137   : > { %v3263_v14 = vpop.permute.xlu1 %1284 }
 0x13c   : > { %v3265_v15 = vpop.permute.xlu1 %1300 }
 0x13d   : > { %4322 = vst [vmem:[#allocation3_spill] sm:$0xff] %v3265_v15 }
 0x16b   : > { %v805_v46 = vpop.xlane.xlu0 %804 }
 0x16c   : > { %v806_v37 = vmax.f32 %v805_v46, 1e-24 }
 0x16e   : > { %2877 = vrsqrt.f32 %v806_v37  ;;  %v3278_v37 = vld [vmem:[%s4247_s10 + $0x30] sm:$0xff] }
 0x178   : > { %v2878_v48 = vpop.eup %2877 }
 0x179   : > { %v809_v49 = vmul.f32 %v2878_v48, %v3128_v24  ;;  %v808_v34 = vmul.f32 %v2878_v48, %v3126_v23  ;;  %v3271_v23 = vpop.permute.xlu1 %1332  ;;  %v714_v24 = vrot.slane %v713_v21, 4  ;;  %v709_v48 = vrot.slane %v708_v25, 2 }
 0x17a   : > { %4323 = vst [vmem:[#allocation4_spill] sm:$0xff] %v3271_v23 }
 0x17b   : > { %v835_v35 = vpack.c.bf16 %v809_v49, %v809_v49  ;;  %v834_v50 = vpack.c.bf16 %v808_v34, %v808_v34  ;;  %v715_v27 = vadd.f32 %v714_v24, %v713_v21  ;;  %v710_v34 = vadd.f32 %v709_v48, %v708_v25 }
 0x17d   : > { %v839_v51 = vrot.slane %v835_v35, 2  ;;  %v838_v52 = vrot.slane %v834_v50, 2  ;;  %v3273_v36 = vpop.permute.xlu1 %1348  ;;  %v716_v49 = vrot.slane %v715_v27, 2 }
 0x17e   : > { %4324 = vst [vmem:[#allocation5_spill] sm:$0xff] %v3273_v36 }
 0x17f   : > { %842 = vmatprep.subr.bf16.mxu0 %v839_v51  ;;  %v717_v50 = vadd.f32 %v716_v49, %v715_v27  ;;  %v711_v51 = vrot.slane %v710_v34, 1 }
 0x180   : > { %843 = vmatpush1.bf16.xpose.msra.mxu0 %v838_v52 }
 0x181   : > { %v3283_v35 = vpop.permute.xlu1 %1380  ;;  %v718_v52 = vrot.slane %v717_v50, 1  ;;  %v712_v20 = vadd.f32 %v711_v51, %v710_v34 }
 0x182   : > { %4325 = vst [vmem:[#allocation6_spill] sm:$0xff] %v3283_v35 }
 0x183   : > { %v719_v21 = vadd.f32 %v718_v52, %v717_v50  ;;  %v720_v22 = vmul.f32 0.25, %v712_v20 }
 0x185   : > { %v721_v25 = vmul.f32 0.25, %v719_v21 }
 0x187   : > { %875 = vmatmul.mubr.bf16.vlgmr.msra.gmra.mrb[0].mxu0 %v832_v54  ;;  %v3288_v54 = vpop.permute.xlu1 %1408  ;;  %v723_v27 = vsub.f32 %v3107_v58, %v721_v25 }
 0x188   : > { %4326 = vst [vmem:[#allocation7_spill] sm:$0xff] %v3288_v54 }
 0x18b   : > { %v3294_v24 = vpop.permute.xlu1 %1438 }
 0x18c   : > { %4327 = vst [vmem:[#allocation8_spill] sm:$0xff] %v3294_v24 }
 0x25a   : > { %v876_v26 = vpop.f32.mrb[0].mxu0 }
 0x25b   : > { %930 = vperm.xlu0 %2836, %v876_v26   ;;  %884 = vperm.xlu1 %2824, %v876_v26   ;;  %v878_v28 = vpop.f32.mrb[1].mxu0 }
 0x25c   : > { %v879_v29 = vpop.f32.mrb[2].mxu0  ;;  %v3303_v28 = vpop.permute.xlu1 %1454 }
 0x25d   : > { %v880_v46 = vpop.f32.mrb[3].mxu0  ;;  %4328 = vst [vmem:[#allocation9_spill] sm:$0xff] %v3303_v28 }
 0x25e   : > { %v3309_v46 = vmul.f32 %v723_v27, %v723_v27 }
 0x25f   : > { %2837 = vset.pattern.permute.xlu0 %v4263_v4  ;;  %2825 = vset.pattern.permute.xlu1 %v4263_v4 }
 0x260   : > { %2117 = vperm.xlu0 %2837, %v3278_v37   ;;  %898 = vperm.xlu1 %2825, %v876_v26   ;;  %v3316_v58 = vpop.permute.xlu1 %1486 }
 0x261   : > { %4329 = vst [vmem:[#allocation10_spill] sm:$0xff] %v3316_v58 }
 0x264   : > { %2838 = vset.pattern.permute.xlu0 %v4271_v32  ;;  %2826 = vset.pattern.permute.xlu1 %v4254_v5  ;;  %v3324_v49 = vpop.permute.xlu1 %1502 }
 0x265   : > { %1470 = vperm.xlu0 %2838, %v3142_v39   ;;  %914 = vperm.xlu1 %2826, %v876_v26   ;;  %v722_v26 = vsub.f32 %v3105_v57, %v720_v22  ;;  %4330 = vst [vmem:[#allocation11_spill] sm:$0xff] %v3324_v49  ;;  %v2887_v49 = vld [vmem:[%s3027_s28] sm:$0xff] }
 0x266   : > { %v1118_v58 = vrot.slane %v2887_v49, %v3077_v11 }
 0x267   : > { %v3306_v29 = vmul.f32 %v722_v26, %v722_v26 }
 0x268   : > { %v3329_v20 = vpop.permute.xlu1 %1564 }
 0x269   : > { %1752 = vperm.xlu0 %2838, %v3153_v44   ;;  %2827 = vset.pattern.permute.xlu1 %v4259_v45  ;;  %v752_v57 = vsel %vm473_vm0, %v3306_v29, 0.0  ;;  %4331 = vst [vmem:[#allocation12_spill] sm:$0xff] %v3329_v20 }
 0x26a   : > { %1915 = vperm.xlu1 %2827, %v3218_v38   ;;  %v753_v48 = vrot.slane %v752_v57, 4 }
 0x26c   : > { %v754_v34 = vadd.f32 %v753_v48, %v752_v57  ;;  %v3354_v48 = vld [vmem:[%s4247_s10 + $0x40] sm:$0xff] }
 0x26d   : > { %2165 = vperm.xlu0 %2838, %v3278_v37  }
 0x26e   : > { %2828 = vset.pattern.permute.xlu1 %v4255_v33  ;;  %v755_v51 = vrot.slane %v754_v34, 2 }
 0x26f   : > { %1931 = vperm.xlu1 %2828, %v3218_v38  }
 0x270   : > { %v756_v21 = vadd.f32 %v755_v51, %v754_v34 }
 0x271   : > { %2841 = vset.pattern.permute.xlu0 %v4255_v33 }
 0x272   : > { %1518 = vperm.xlu0 %2841, %v3142_v39   ;;  %v759_v39 = vsel %vm473_vm0, %v3309_v46, 0.0  ;;  %v757_v25 = vrot.slane %v756_v21, 1 }
 0x273   : > { %2830 = vset.pattern.permute.xlu1 %v4263_v4 }
 0x274   : > { %1975 = vperm.xlu1 %2830, %v3172_v41   ;;  %v758_v27 = vadd.f32 %v757_v25, %v756_v21  ;;  %v3375_v25 = vpop.permute.xlu0 %1138 }
 0x276   : > { %1800 = vperm.xlu0 %2841, %v3153_v44   ;;  %v760_v44 = vrot.slane %v759_v39, 4 }
 0x278   : > { %2831 = vset.pattern.permute.xlu1 %v4254_v5  ;;  %v761_v50 = vadd.f32 %v760_v44, %v759_v39  ;;  %v786_v39 = vadd.f32 1e-07, %v758_v27 }
 0x279   : > { %1991 = vperm.xlu1 %2831, %v3172_v41  }
 0x27a   : > { %2213 = vperm.xlu0 %2841, %v3278_v37   ;;  %v762_v52 = vrot.slane %v761_v50, 2  ;;  %2879 = vrcp.f32 %v786_v39 }
 0x27c   : > { %v763_v22 = vadd.f32 %v762_v52, %v761_v50 }
 0x27d   : > { %2832 = vset.pattern.permute.xlu1 %v4271_v32 }
 0x27e   : > { %2844 = vset.pattern.permute.xlu0 %v4261_v6  ;;  %2023 = vperm.xlu1 %2832, %v3172_v41   ;;  %v764_v26 = vrot.slane %v763_v22, 1 }
 0x27f   : > { %1316 = vperm.xlu0 %2844, %v3148_v40   ;;  %v3336_v40 = vld [vmem:[%s4247_s10 + $0x38] sm:$0xff] }
 0x282   : > { %2833 = vset.pattern.permute.xlu1 %v4253_v42 }
 0x283   : > { %1596 = vperm.xlu0 %2844, %v3165_v30   ;;  %2039 = vperm.xlu1 %2833, %v3172_v41   ;;  %v3340_v30 = vpop.permute.xlu1 %1580 }
 0x284   : > { %4332 = vst [vmem:[#allocation13_spill] sm:$0xff] %v3340_v30  ;;  %v2880_v51 = vpop.eup %2879 }
 0x287   : > { %2007 = vperm.xlu0 %2844, %v3172_v41   ;;  %2834 = vset.pattern.permute.xlu1 %v4255_v33  ;;  %v3347_v57 = vpop.permute.xlu1 %1612 }
 0x288   : > { %2071 = vperm.xlu1 %2834, %v3172_v41   ;;  %v765_v41 = vadd.f32 %v764_v26, %v763_v22  ;;  %4333 = vst [vmem:[#allocation14_spill] sm:$0xff] %v3347_v57  ;;  %v790_v22 = vmul.f32 %v2880_v51, %v3306_v29 }
 0x28a   : > { %v787_v44 = vadd.f32 1e-07, %v765_v41  ;;  %v810_v27 = vmul.f32 %v790_v22, %v790_v22 }
 0x28b   : > { %2289 = vperm.xlu0 %2844, %v3336_v40   ;;  %v3359_v34 = vpop.permute.xlu1 %1628 }
 0x28c   : > { %2835 = vset.pattern.permute.xlu1 %v4257_v2  ;;  %4334 = vst [vmem:[#allocation15_spill] sm:$0xff] %v3359_v34  ;;  %2881 = vrcp.f32 %v787_v44  ;;  %v812_v39 = vsel %vm473_vm0, %v810_v27, 0.0 }
 0x28d   : > { %2103 = vperm.xlu1 %2835, %v3278_v37   ;;  %v813_v51 = vrot.slane %v812_v39, 4 }
 0x28f   : > { %2849 = vset.pattern.permute.xlu0 %v4254_v5  ;;  %v3365_v50 = vpop.permute.xlu1 %1660  ;;  %v814_v56 = vadd.f32 %v813_v51, %v812_v39  ;;  %v4344_v39 = vmov 3  }
 0x290   : > { %1851 = vperm.xlu0 %2849, %v3218_v38   ;;  %4335 = vst [vmem:[#allocation16_spill] sm:$0xff] %v3365_v50 }
 0x291   : > { %2839 = vset.pattern.permute.xlu1 %v4254_v5 }
 0x292   : > { %2133 = vperm.xlu1 %2839, %v3278_v37  }
 0x293   : > { %v3370_v21 = vpop.permute.xlu1 %1690 }
 0x294   : > { %2273 = vperm.xlu0 %2849, %v3336_v40   ;;  %4336 = vst [vmem:[#allocation17_spill] sm:$0xff] %v3370_v21 }
 0x296   : > { %2840 = vset.pattern.permute.xlu1 %v4261_v6  ;;  %v2882_v52 = vpop.eup %2881 }
 0x297   : > { %2149 = vperm.xlu1 %2840, %v3278_v37   ;;  %v3378_v26 = vpop.permute.xlu1 %1720 }
 0x298   : > { %2415 = vperm.xlu0 %2849, %v3354_v48   ;;  %4337 = vst [vmem:[#allocation18_spill] sm:$0xff] %v3378_v26 }
 0x29b   : > { %2842 = vset.pattern.permute.xlu1 %v4253_v42  ;;  %v3387_v44 = vpop.permute.xlu1 %1736 }
 0x29c   : > { %2850 = vset.pattern.permute.xlu0 %v4253_v42  ;;  %2181 = vperm.xlu1 %2842, %v3278_v37   ;;  %4339 = vst [vmem:[#allocation20_spill] sm:$0xff] %v3387_v44 }
 0x29d   : > { %1899 = vperm.xlu0 %2850, %v3218_v38   ;;  %v791_v38 = vmul.f32 %v2882_v52, %v3309_v46 }
 0x29f   : > { %v811_v41 = vmul.f32 %v791_v38, %v791_v38  ;;  %v3394_v42 = vpop.permute.xlu1 %1768 }
 0x2a0   : > { %2843 = vset.pattern.permute.xlu1 %v4259_v45  ;;  %4341 = vst [vmem:[#allocation22_spill] sm:$0xff] %v3394_v42 }
 0x2a1   : > { %2197 = vperm.xlu1 %2843, %v3278_v37   ;;  %2321 = vperm.xlu0 %2850, %v3336_v40   ;;  %v3381_v37 = vpop.permute.xlu0 %1422  ;;  %v819_v29 = vsel %vm473_vm0, %v811_v41, 0.0  ;;  %v815_v41 = vrot.slane %v814_v56, 2 }
 0x2a2   : > { %4338 = vst [vmem:[#allocation19_spill] sm:$0xff] %v3381_v37  ;;  %v820_v52 = vrot.slane %v819_v29, 4 }
 0x2a3   : > { %v816_v6 = vadd.f32 %v815_v41, %v814_v56  ;;  %v4346_v56 = vmov 6  }
 0x2a4   : > { %v821_v27 = vadd.f32 %v820_v52, %v819_v29 }
 0x2a5   : > { %2845 = vset.pattern.permute.xlu1 %v4257_v2  ;;  %v3390_v46 = vpop.permute.xlu0 %1704  ;;  %v817_v51 = vrot.slane %v816_v6, 1 }
 0x2a6   : > { %2243 = vperm.xlu1 %2845, %v3336_v40   ;;  %4340 = vst [vmem:[#allocation21_spill] sm:$0xff] %v3390_v46  ;;  %v822_v33 = vrot.slane %v821_v27, 2 }
 0x2a7   : > { %v818_v42 = vadd.f32 %v817_v51, %v816_v6 }
 0x2a9   : > { %v3396_v5 = vpop.permute.xlu0 %1270 }
 0x2aa   : > { %2846 = vset.pattern.permute.xlu1 %v4263_v4 }
 0x2ab   : > { %2257 = vperm.xlu1 %2846, %v3336_v40  }
 0x2ad   : > { %v3402_v45 = vpop.permute.xlu0 %1550 }
 0x2ae   : > { %4343 = vst [vmem:[#allocation24_spill] sm:$0xff] %v3402_v45 }
 0x2af   : > { %2847 = vset.pattern.permute.xlu1 %v4257_v2  ;;  %v3400_v2 = vpop.permute.xlu1 %1784 }
 0x2b0   : > { %2385 = vperm.xlu1 %2847, %v3354_v48   ;;  %4342 = vst [vmem:[#allocation23_spill] sm:$0xff] %v3400_v2 }
 0x2b1   : > { %v3408_v10 = vpop.permute.xlu0 %1961 }
 0x2b2   : > { %4345 = vst [vmem:[#allocation25_spill] sm:$0xff] %v3408_v10 }
 0x2b3   : > { %v3406_v29 = vpop.permute.xlu1 %1821 }
 0x2b4   : > { %2848 = vset.pattern.permute.xlu1 %v4263_v4  ;;  %v823_v4 = vadd.f32 %v822_v33, %v821_v27  ;;  %v826_v27 = vmax.f32 %v818_v42, 1e-24 }
 0x2b5   : > { %2399 = vperm.xlu1 %2848, %v3354_v48   ;;  %v3415_v33 = vpop.permute.xlu0 %1364 }
 0x2b6   : > { %v824_v52 = vrot.slane %v823_v4, 1  ;;  %4347 = vst [vmem:[#allocation26_spill] sm:$0xff] %v3415_v33  ;;  %2883 = vrsqrt.f32 %v826_v27 }
 0x2b7   : > { %v3412_v44 = vpop.permute.xlu1 %1835 }
 0x2b8   : > { %v825_v2 = vadd.f32 %v824_v52, %v823_v4 }
 0x2b9   : > { %2851 = vset.pattern.permute.xlu1 %v4271_v32  ;;  %v3419_v46 = vpop.permute.xlu0 %1644 }
 0x2ba   : > { %2305 = vperm.xlu1 %2851, %v3336_v40   ;;  %v827_v41 = vmax.f32 %v825_v2, 1e-24  ;;  %4348 = vst [vmem:[#allocation27_spill] sm:$0xff] %v3419_v46 }
 0x2bb   : > { %v3417_v26 = vpop.permute.xlu1 %1867 }
 0x2bc   : > { %2885 = vrsqrt.f32 %v827_v41 }
 0x2be   : > { %2852 = vset.pattern.permute.xlu1 %v4344_v39 }
 0x2bf   : > { %2431 = vperm.xlu1 %2852, %v3354_v48   ;;  %v3421_v10 = vpop.permute.xlu1 %1883 }
 0x2c0   : > { %v2884_v6 = vpop.eup %2883 }
 0x2c1   : > { %v830_v21 = vmul.f32 %v2884_v6, %v790_v22 }
 0x2c3   : > { %2853 = vset.pattern.permute.xlu1 %v4271_v32  ;;  %v3423_v32 = vpop.permute.xlu0 %2055  ;;  %v904_v2 = vrot.slane %v830_v21, %v3077_v11  ;;  %v890_v36 = vrot.slane %v830_v21, %v3073_v7  ;;  %v920_v22 = vrot.slane %v830_v21, %v3081_v16  ;;  %v936_v6 = vrot.slane %v830_v21, %v3085_v18 }
 0x2c4   : > { %2447 = vperm.xlu1 %2853, %v3354_v48   ;;  %4349 = vst [vmem:[#allocation28_spill] sm:$0xff] %v3423_v32  ;;  %v1098_v21 = vrot.slane %v2887_v49, %v3075_v8 }
 0x2c6   : > { %v2886_v4 = vpop.eup %2885 }
 0x2c7   : > { %v831_v52 = vmul.f32 %v2886_v4, %v791_v38 }
 0x2c8   : > { %2854 = vset.pattern.permute.xlu1 %v4346_v56 }
 0x2c9   : > { %v908_v33 = vrot.slane %v831_v52, %v3077_v11  ;;  %v894_v41 = vrot.slane %v831_v52, %v3073_v7  ;;  %v924_v34 = vrot.slane %v831_v52, %v3081_v16  ;;  %v940_v38 = vrot.slane %v831_v52, %v3085_v18 }
 0x2ca   : > { %v1094_v52 = vrot.slane %v2887_v49, %v3073_v7 }
 0x2da   : > { %v885_v51 = vpop.permute.xlu1 %884  ;;  %v931_v35 = vpop.permute.xlu0 %930 }
 0x2db   : > { %v895_v32 = vmul.f32 %v890_v36, %v885_v51  ;;  %v896_v46 = vmul.f32 %v894_v41, %v885_v51 }
 0x2df   : > { %v899_v42 = vpop.permute.xlu1 %898  ;;  %v3427_v27 = vpop.permute.xlu0 %2117 }
 0x2e0   : > { %4350 = vst [vmem:[#allocation29_spill] sm:$0xff] %v3427_v27  ;;  %v909_v50 = vmul.f32 %v904_v2, %v899_v42  ;;  %v910_v23 = vmul.f32 %v908_v33, %v899_v42  ;;  %v941_v2 = vmul.f32 %v936_v6, %v931_v35  ;;  %v942_v33 = vmul.f32 %v940_v38, %v931_v35 }
 0x2e2   : > { %v911_v27 = vadd.f32 %v909_v50, %v895_v32  ;;  %v912_v30 = vadd.f32 %v910_v23, %v896_v46  ;;  %v1122_v32 = vrot.slane %v2887_v49, %v3079_v12  ;;  %v1128_v46 = vrot.slane %v1118_v58, %v3077_v11 }
 0x2e4   : > { %v915_v4 = vpop.permute.xlu1 %914  ;;  %v3435_v57 = vpop.permute.xlu0 %1470 }
 0x2e5   : > { %v925_v15 = vmul.f32 %v920_v22, %v915_v4  ;;  %v926_v20 = vmul.f32 %v924_v34, %v915_v4 }
 0x2e7   : > { %v927_v36 = vadd.f32 %v925_v15, %v911_v27  ;;  %v928_v51 = vadd.f32 %v926_v20, %v912_v30  ;;  %v1104_v20 = vrot.slane %v1094_v52, %v3073_v7  ;;  %v1108_v30 = vrot.slane %v1098_v21, %v3073_v7 }
 0x2e8   : > { %v3437_v42 = vpop.permute.xlu0 %1752  ;;  %v1132_v27 = vrot.slane %v1122_v32, %v3077_v11  ;;  %v1144_v52 = vrot.slane %v2887_v49, %v3081_v16  ;;  %v1148_v21 = vrot.slane %v2887_v49, %v3083_v17 }
 0x2e9   : > { %4351 = vst [vmem:[#allocation30_spill] sm:$0xff] %v3437_v42  ;;  %v943_v41 = vadd.f32 %v941_v2, %v927_v36  ;;  %v944_v45 = vadd.f32 %v942_v33, %v928_v51 }
 0x2eb   : > { %v945_v23 = vmul.f32 0.0625, %v943_v41  ;;  %v946_v50 = vmul.f32 0.0625, %v944_v45 }
 0x2ec   : > { %v3444_v34 = vpop.permute.xlu0 %2165 }
 0x2ed   : > { %4352 = vst [vmem:[#allocation31_spill] sm:$0xff] %v3444_v34  ;;  %v947_v15 = vadd.f32 %v945_v23, %v3232_v53  ;;  %v948_v35 = vadd.f32 %v946_v50, %v3118_v47 }
 0x2ef   : > { %v958_v22 = vrot.slane %v947_v15, %v3073_v7  ;;  %v962_v38 = vrot.slane %v948_v35, %v3073_v7  ;;  %v972_v45 = vrot.slane %v947_v15, %v3077_v11  ;;  %v976_v6 = vrot.slane %v948_v35, %v3077_v11 }
 0x2f0   : > { %v988_v53 = vrot.slane %v947_v15, %v3081_v16  ;;  %v992_v47 = vrot.slane %v948_v35, %v3081_v16  ;;  %v1004_v4 = vrot.slane %v947_v15, %v3085_v18  ;;  %v1008_v2 = vrot.slane %v948_v35, %v3085_v18 }
 0x2f1   : > { %v963_v58 = vmul.f32 %v958_v22, %v3237_v55  ;;  %v964_v33 = vmul.f32 %v962_v38, %v3237_v55  ;;  %v977_v36 = vmul.f32 %v972_v45, %v3239_v59  ;;  %v978_v51 = vmul.f32 %v976_v6, %v3239_v59  ;;  %v3464_v41 = vpop.permute.xlu0 %1518 }
 0x2f2   : > { %4353 = vst [vmem:[#allocation32_spill] sm:$0xff] %v3464_v41  ;;  %v993_v50 = vmul.f32 %v988_v53, %v3241_v60  ;;  %v994_v15 = vmul.f32 %v992_v47, %v3241_v60  ;;  %v1109_v35 = vmul.f32 %v1104_v20, %v3255_v1  ;;  %v1110_v55 = vmul.f32 %v1108_v30, %v3255_v1 }
 0x2f3   : > { %v979_v32 = vadd.f32 %v977_v36, %v963_v58  ;;  %v980_v23 = vadd.f32 %v978_v51, %v964_v33  ;;  %v1133_v22 = vmul.f32 %v1128_v46, %v3257_v3  ;;  %v1134_v59 = vmul.f32 %v1132_v27, %v3257_v3 }
 0x2f4   : > { %v1009_v6 = vmul.f32 %v1004_v4, %v3243_v61  ;;  %v1010_v34 = vmul.f32 %v1008_v2, %v3243_v61  ;;  %v1154_v53 = vrot.slane %v1144_v52, %v3081_v16  ;;  %v1158_v60 = vrot.slane %v1148_v21, %v3081_v16 }
 0x2f5   : > { %v995_v38 = vadd.f32 %v993_v50, %v979_v32  ;;  %v996_v45 = vadd.f32 %v994_v15, %v980_v23  ;;  %v3476_v58 = vpop.permute.xlu0 %1800  ;;  %v1170_v20 = vrot.slane %v2887_v49, %v3085_v18  ;;  %v1174_v1 = vrot.slane %v2887_v49, %v3087_v19 }
 0x2f6   : > { %4354 = vst [vmem:[#allocation33_spill] sm:$0xff] %v3476_v58  ;;  %v1135_v47 = vadd.f32 %v1133_v22, %v1109_v35  ;;  %v1136_v3 = vadd.f32 %v1134_v59, %v1110_v55  ;;  %v1159_v61 = vmul.f32 %v1154_v53, %v3375_v25  ;;  %v1160_v2 = vmul.f32 %v1158_v60, %v3375_v25 }
 0x2f7   : > { %v1011_v30 = vadd.f32 %v1009_v6, %v995_v38  ;;  %v1012_v46 = vadd.f32 %v1010_v34, %v996_v45  ;;  %v1180_v36 = vrot.slane %v1170_v20, %v3085_v18  ;;  %v1184_v51 = vrot.slane %v1174_v1, %v3085_v18 }
 0x2f8   : > { %v1161_v22 = vadd.f32 %v1159_v61, %v1135_v47  ;;  %v1162_v59 = vadd.f32 %v1160_v2, %v1136_v3 }
 0x2f9   : > { %v1019_v27 = vadd.f32 %v3245_v62, %v1011_v30  ;;  %v1020_v4 = vadd.f32 %v3245_v62, %v1012_v46  ;;  %v3484_v33 = vpop.permute.xlu0 %2213  ;;  %v1185_v38 = vmul.f32 %v1180_v36, %v3259_v9  ;;  %v1186_v45 = vmul.f32 %v1184_v51, %v3259_v9  ;;  %v1916_v36 = vpop.permute.xlu1 %1915 }
 0x2fa   : > { %4355 = vst [vmem:[#allocation34_spill] sm:$0xff] %v3484_v33 }
 0x2fb   : > { %v1030_v49 = vrot.slane %v1019_v27, %v3073_v7  ;;  %v1034_v34 = vrot.slane %v1020_v4, %v3073_v7  ;;  %v1044_v52 = vrot.slane %v1019_v27, %v3077_v11  ;;  %v1048_v21 = vrot.slane %v1020_v4, %v3077_v11 }
 0x2fc   : > { %v1060_v62 = vrot.slane %v1019_v27, %v3081_v16  ;;  %v1064_v32 = vrot.slane %v1020_v4, %v3081_v16  ;;  %v1076_v23 = vrot.slane %v1019_v27, %v3085_v18  ;;  %v1080_v25 = vrot.slane %v1020_v4, %v3085_v18 }
 0x2fd   : > { %v1035_v50 = vmul.f32 %v1030_v49, %v3247_v63  ;;  %v1036_v15 = vmul.f32 %v1034_v34, %v3247_v63  ;;  %v1049_v35 = vmul.f32 %v1044_v52, %v3249_v43  ;;  %v1050_v55 = vmul.f32 %v1048_v21, %v3249_v43 }
 0x2fe   : > { %v3504_v6 = vpop.permute.xlu0 %1316  ;;  %v1065_v20 = vmul.f32 %v1060_v62, %v3251_v31  ;;  %v1066_v1 = vmul.f32 %v1064_v32, %v3251_v31  ;;  %v1081_v46 = vmul.f32 %v1076_v23, %v3253_v0  ;;  %v1082_v43 = vmul.f32 %v1080_v25, %v3253_v0  ;;  %v1932_v32 = vpop.permute.xlu1 %1931 }
 0x2ff   : > { %v1051_v53 = vadd.f32 %v1049_v35, %v1035_v50  ;;  %v1052_v60 = vadd.f32 %v1050_v55, %v1036_v15  ;;  %v1187_v3 = vadd.f32 %v1185_v38, %v1161_v22  ;;  %v1188_v27 = vadd.f32 %v1186_v45, %v1162_v59 }
 0x301   : > { %v1067_v30 = vadd.f32 %v1065_v20, %v1051_v53  ;;  %v1068_v63 = vadd.f32 %v1066_v1, %v1052_v60 }
 0x302   : > { %v3510_v47 = vpop.permute.xlu0 %1596 }
 0x303   : > { %v1083_v4 = vadd.f32 %v1081_v46, %v1067_v30  ;;  %v1084_v9 = vadd.f32 %v1082_v43, %v1068_v63 }
 0x305   : > { %v1189_v61 = vadd.f32 %v1187_v3, %v1083_v4  ;;  %v1190_v2 = vadd.f32 %v1188_v27, %v1084_v9 }
 0x306   : > { %v3512_v51 = vpop.permute.xlu0 %2007 }
 0x307   : > { %4356 = vst [vmem:[#allocation35_spill] sm:$0xff] %v3512_v51  ;;  %v1197_v49 = vadd.f32 %v3261_v13, %v1189_v61  ;;  %v1198_v31 = vadd.f32 %v3261_v13, %v1190_v2 }
 0x309   : > { %vm1199_vm2 = vcmp.ge.f32.partialorder %v1197_v49, 0.0  ;;  %vm1200_vm3 = vcmp.ge.f32.partialorder %v1198_v31, 0.0  ;;  %v1201_v34 = vmul.f32 0.2, %v1197_v49  ;;  %v1202_v52 = vmul.f32 0.2, %v1198_v31 }
 0x30a   : > { %v3516_v0 = vpop.permute.xlu0 %2289 }
 0x30b   : > { %v3518_v21 = vsel %vm1199_vm2, %v1197_v49, %v1201_v34  ;;  %v3520_v62 = vsel %vm1200_vm3, %v1198_v31, %v1202_v52 }
 0x30c   : > { %v1921_v23 = vrot.slane %v3518_v21, %v3083_v17  ;;  %v1925_v25 = vrot.slane %v3520_v62, %v3083_v17  ;;  %1258 = vrot.lane.b32.xlu1 %v3520_v62, %s2906_s21  ;;  %1256 = vrot.lane.b32.xlu0 %v3518_v21, %s2906_s21  ;;  %v1937_v13 = vrot.slane %v3518_v21, %v3087_v19 }
 0x30d   : > { %v1941_v50 = vrot.slane %v3520_v62, %v3087_v19  ;;  %v1831_v15 = vrot.slane %v3520_v62, %v3073_v7  ;;  %v1845_v35 = vrot.slane %v3520_v62, %v3077_v11  ;;  %v1861_v55 = vrot.slane %v3520_v62, %v3081_v16 }
 0x30e   : > { %v1926_v22 = vmul.f32 %v1921_v23, %v1916_v36  ;;  %v1927_v59 = vmul.f32 %v1925_v25, %v1916_v36  ;;  %v1942_v38 = vmul.f32 %v1937_v13, %v1932_v32  ;;  %v1877_v45 = vrot.slane %v3520_v62, %v3085_v18 }
 0x30f   : > { %v1943_v53 = vmul.f32 %v1941_v50, %v1932_v32  ;;  %v1833_v60 = vmul.f32 %v1831_v15, %v3406_v29  ;;  %v1847_v20 = vmul.f32 %v1845_v35, %v3412_v44  ;;  %v1852_v1 = vpop.permute.xlu0 %1851  ;;  %v1827_v30 = vrot.slane %v3518_v21, %v3073_v7  ;;  %v3569_v35 = vpop.permute.xlu1 %1975 }
 0x310   : > { %v1841_v63 = vrot.slane %v3518_v21, %v3077_v11  ;;  %v1857_v46 = vrot.slane %v3518_v21, %v3081_v16  ;;  %v1863_v43 = vmul.f32 %v1861_v55, %v1852_v1  ;;  %1395 = vrot.lane.b32.xlu1 %v3518_v21, %s2907_s22  ;;  %1397 = vrot.lane.b32.xlu0 %v3520_v62, %s2907_s22 }
 0x311   : > { %v1849_v3 = vadd.f32 %v1847_v20, %v1833_v60  ;;  %v1832_v27 = vmul.f32 %v1827_v30, %v3406_v29  ;;  %v1893_v4 = vrot.slane %v3520_v62, %v3075_v8  ;;  %v1873_v2 = vrot.slane %v3518_v21, %v3085_v18  ;;  %4358 = vst [vmem:[#allocation37_spill] sm:$0xff] %v3569_v35 }
 0x312   : > { %v1846_v9 = vmul.f32 %v1841_v63, %v3412_v44  ;;  %v1862_v61 = vmul.f32 %v1857_v46, %v1852_v1  ;;  %v1889_v36 = vrot.slane %v3518_v21, %v3075_v8  ;;  %v1879_v49 = vmul.f32 %v1877_v45, %v3417_v26 }
 0x313   : > { %v1865_v31 = vadd.f32 %v1863_v43, %v1849_v3  ;;  %v3559_v34 = vpop.permute.xlu0 %2273  ;;  %v1895_v29 = vmul.f32 %v1893_v4, %v3421_v10  ;;  %v1878_v25 = vmul.f32 %v1873_v2, %v3417_v26  ;;  %v1905_v45 = vrot.slane %v3518_v21, %v3079_v12  ;;  %v3578_v1 = vpop.permute.xlu1 %1991 }
 0x314   : > { %v1848_v52 = vadd.f32 %v1846_v9, %v1832_v27  ;;  %1535 = vrot.lane.b32.xlu1 %v3518_v21, %s2908_s23  ;;  %v1894_v44 = vmul.f32 %v1889_v36, %v3421_v10  ;;  %1679 = vrot.lane.b32.xlu0 %v3520_v62, %s2909_s24  ;;  %v1909_v10 = vrot.slane %v3520_v62, %v3079_v12  ;;  %v4370_v2 = vmov 1  }
 0x315   : > { %v1881_v32 = vadd.f32 %v1879_v49, %v1865_v31  ;;  %4359 = vst [vmem:[#allocation38_spill] sm:$0xff] %v3578_v1  ;;  %v4374_v36 = vmov 4   ;;  %v4375_v31 = vmov 5  }
 0x316   : > { %v1864_v23 = vadd.f32 %v1862_v61, %v1848_v52  ;;  %v4367_v61 = vmov 7   ;;  %v2654_v52 = vld [vmem:[%s4250_s13] sm:$0xf] }
 0x317   : > { %v3566_v13 = vpop.permute.xlu0 %2415  ;;  %v1897_v50 = vadd.f32 %v1895_v29, %v1881_v32  ;;  %v3587_v4 = vpop.permute.xlu1 %2023 }
 0x318   : > { %4357 = vst [vmem:[#allocation36_spill] sm:$0xff] %v3566_v13  ;;  %v1880_v15 = vadd.f32 %v1878_v25, %v1864_v23  ;;  %1537 = vrot.lane.b32.xlu1 %v3520_v62, %s2908_s23  ;;  %1948 = vrot.lane.b32.xlu0 %v3518_v21, %s2910_s26  ;;  %4362 = vst [vmem:[#allocation41_spill] sm:$0xff] %v3587_v4  ;;  %v4378_v25 = vlaneseq }
 0x31a   : > { %v1896_v55 = vadd.f32 %v1894_v44, %v1880_v15 }
 0x31c   : > { %v1900_v60 = vpop.permute.xlu0 %1899  ;;  %1677 = vrot.lane.b32.xlu1 %v3518_v21, %s2909_s24  ;;  %2090 = vrot.lane.b32.xlu0 %v3520_v62, %s2911_s27 }
 0x31d   : > { %v1910_v26 = vmul.f32 %v1905_v45, %v1900_v60  ;;  %v1911_v20 = vmul.f32 %v1909_v10, %v1900_v60 }
 0x31f   : > { %v1912_v30 = vadd.f32 %v1910_v26, %v1896_v55  ;;  %v1913_v63 = vadd.f32 %v1911_v20, %v1897_v50  ;;  %v3644_v50 = vand.u32 127, %v4378_v25  ;;  %v2914_v20 = vmov 0.0  }
 0x320   : > { %1950 = vrot.lane.b32.xlu1 %v3520_v62, %s2910_s26  ;;  %2230 = vrot.lane.b32.xlu0 %v3518_v21, %s2912_s15  ;;  %v3652_v60 = vpop.permute.xlu0 %2321  ;;  %s467_s26 = scalar_lea.vmem %s4251_s14, %s2749_s25 }
 0x321   : > { %v1928_v46 = vadd.f32 %v1926_v22, %v1912_v30  ;;  %v1929_v43 = vadd.f32 %v1927_v59, %v1913_v63  ;;  %v3593_v22 = vpop.permute.xlu1 %2039  ;;  %v2526_v59 = vld [vmem:[%s4249_s12] sm:$0xf]  ;;  %v1207_v55 = vadd.s32 128, %v3644_v50  ;;  %v1212_v10 = vand.u32 15, %v3644_v50  ;;  %4381 = vst [vmem:[#allocation53_spill] sm:$0xff] %v3652_v60 }
 0x322   : > { %4363 = vst [vmem:[#allocation42_spill] sm:$0xff] %v3593_v22  ;;  %vm1244_vm5 = vcmp.ge.s32.totalorder %v3644_v50, 16  ;;  %vm1260_vm7 = vcmp.lt.s32.totalorder %v3644_v50, 17  ;;  %vm1399_vm8 = vcmp.lt.s32.totalorder %v3644_v50, 16  ;;  %vm1539_vm12 = vcmp.lt.s32.totalorder %v3644_v50, 15 }
 0x323   : > { %v3582_v3 = vadd.f32 %v1942_v38, %v1928_v46  ;;  %v3584_v27 = vadd.f32 %v1943_v53, %v1929_v43  ;;  %v4364_v38 = vmov 0   ;;  %v1219_v26 = vand.u32 15, %v1207_v55 }
 0x324   : > { %2088 = vrot.lane.b32.xlu1 %v3518_v21, %s2911_s27  ;;  %2463 = vperm.xlu0 %2850, %v3354_v48   ;;  %vm1232_vm4 = vcmp.ge.s32.totalorder %v1212_v10, 1  ;;  %v2737_v63 = vsel %vm1244_vm5, 1.0, %v2914_v20  ;;  %vm1238_vm9 = vcmp.le.s32.totalorder %v1212_v10, 14  ;;  %vm1251_vm10 = vcmp.lt.s32.totalorder %v1207_v55, 240 }
 0x325   : > { %4360 = vst [vmem:[#allocation39_spill] sm:$0xff] %v3582_v3  ;;  %4361 = vst [vmem:[#allocation40_spill] sm:$0xff] %v3584_v27  ;;  %v3601_v53 = vpop.permute.xlu1 %2071  ;;  %v3655_v30 = vsel %vm1232_vm4, 1.0, %v2914_v20  ;;  %vm1233_vm6 = vcmp.ge.s32.totalorder %v1219_v26, 1  ;;  %vm1239_vm11 = vcmp.le.s32.totalorder %v1219_v26, 14  ;;  %v3673_v10 = vsel %vm1251_vm10, 1.0, %v2914_v20 }
 0x326   : > { %4365 = vst [vmem:[#allocation43_spill] sm:$0xff] %v3601_v53  ;;  %vm1681_vm13 = vcmp.lt.s32.totalorder %v3644_v50, 1  ;;  %vm1952_vm14 = vcmp.lt.s32.totalorder %v3644_v50, 127  ;;  %vm2092_vm15 = vcmp.lt.s32.totalorder %v3644_v50, 113  ;;  %vm2234_vm0 = vcmp.lt.s32.totalorder %v3644_v50, 112 }
 0x327   : > { %vm2374_vm1 = vcmp.lt.s32.totalorder %v3644_v50, 111 }
 0x328   : > { %2232 = vrot.lane.b32.xlu1 %v3520_v62, %s2912_s15  ;;  %2856 = vset.pattern.permute.xlu0 %v4346_v56 }
 0x329   : > { %2479 = vperm.xlu0 %2856, %v3354_v48   ;;  %v3605_v9 = vpop.permute.xlu1 %2103 }
 0x32a   : > { %4366 = vst [vmem:[#allocation44_spill] sm:$0xff] %v3605_v9 }
 0x32c   : > { %2370 = vrot.lane.b32.xlu1 %v3518_v21, %s2913_s16 }
 0x32d   : > { %2858 = vset.pattern.permute.xlu0 %v4364_v38  ;;  %v3610_v21 = vpop.permute.xlu1 %2133 }
 0x32e   : > { %2529 = vperm.xlu0 %2858, %v2526_v59   ;;  %4368 = vst [vmem:[#allocation45_spill] sm:$0xff] %v3610_v21 }
 0x330   : > { %2372 = vrot.lane.b32.xlu1 %v3520_v62, %s2913_s16 }
 0x331   : > { %v3618_v62 = vpop.permute.xlu1 %2149 }
 0x332   : > { %2861 = vset.pattern.permute.xlu0 %v4344_v39  ;;  %v2512_v39 = vld [vmem:[%s4248_s11] sm:$0xff]  ;;  %4369 = vst [vmem:[#allocation46_spill] sm:$0xff] %v3618_v62 }
 0x333   : > { %2575 = vperm.xlu0 %2861, %v2526_v59  }
 0x334   : > { %2337 = vperm.xlu1 %2854, %v3336_v40  }
 0x337   : > { %2864 = vset.pattern.permute.xlu0 %v4346_v56  ;;  %v4372_v56 = vmov 2  }
 0x338   : > { %2855 = vset.pattern.permute.xlu1 %v4367_v61  ;;  %2623 = vperm.xlu0 %2864, %v2526_v59  }
 0x339   : > { %2353 = vperm.xlu1 %2855, %v3336_v40   ;;  %v3621_v40 = vpop.permute.xlu1 %2181 }
 0x33a   : > { %4371 = vst [vmem:[#allocation47_spill] sm:$0xff] %v3621_v40 }
 0x33c   : > { %2867 = vset.pattern.permute.xlu0 %v4364_v38 }
 0x33d   : > { %2495 = vperm.xlu1 %2855, %v3354_v48   ;;  %v3624_v48 = vpop.permute.xlu1 %2197 }
 0x33e   : > { %4373 = vst [vmem:[#allocation48_spill] sm:$0xff] %v3624_v48 }
 0x341   : > { %2857 = vset.pattern.permute.xlu1 %v4364_v38  ;;  %v3627_v49 = vpop.permute.xlu1 %2243 }
 0x342   : > { %2515 = vperm.xlu1 %2857, %v2512_v39  }
 0x345   : > { %v3631_v29 = vpop.permute.xlu1 %2257 }
 0x346   : > { %2859 = vset.pattern.permute.xlu1 %v4370_v2 }
 0x347   : > { %2543 = vperm.xlu1 %2859, %v2526_v59  }
 0x349   : > { %v3637_v44 = vpop.permute.xlu1 %2385 }
 0x34b   : > { %2860 = vset.pattern.permute.xlu1 %v4372_v56 }
 0x34c   : > { %2559 = vperm.xlu1 %2860, %v2526_v59  }
 0x34d   : > { %v3639_v32 = vpop.permute.xlu1 %2399 }
 0x34e   : > { %4376 = vst [vmem:[#allocation49_spill] sm:$0xff] %v3639_v32 }
 0x350   : > { %2862 = vset.pattern.permute.xlu1 %v4374_v36  ;;  %v3662_v36 = vsel %vm1238_vm9, 1.0, %v2914_v20 }
 0x351   : > { %2591 = vperm.xlu1 %2862, %v2526_v59   ;;  %v3641_v23 = vpop.permute.xlu1 %2305 }
 0x352   : > { %4377 = vst [vmem:[#allocation50_spill] sm:$0xff] %v3641_v23 }
 0x355   : > { %2863 = vset.pattern.permute.xlu1 %v4375_v31  ;;  %v3646_v15 = vpop.permute.xlu1 %2431 }
 0x356   : > { %2607 = vperm.xlu1 %2863, %v2526_v59   ;;  %4379 = vst [vmem:[#allocation51_spill] sm:$0xff] %v3646_v15  ;;  %v4382_v15 = vld [vmem:[#allocation10_spill] sm:$0xff] }
 0x359   : > { %v3650_v45 = vpop.permute.xlu1 %2447 }
 0x35a   : > { %2865 = vset.pattern.permute.xlu1 %v4367_v61  ;;  %4380 = vst [vmem:[#allocation52_spill] sm:$0xff] %v3650_v45 }
 0x35b   : > { %2639 = vperm.xlu1 %2865, %v2526_v59   ;;  %v1263_v59 = vmul.f32 %v2737_v63, %v3655_v30 }
 0x35f   : > { %2866 = vset.pattern.permute.xlu1 %v4364_v38  ;;  %v3660_v38 = vsel %vm1233_vm6, 1.0, %v2914_v20 }
 0x360   : > { %2657 = vperm.xlu1 %2866, %v2654_v52   ;;  %v3689_v48 = vmul.f32 %v3673_v10, %v3660_v38 }
 0x37e   : > { %v1259_v46 = vpop.permute.xlu1 %1258  ;;  %v1257_v43 = vpop.permute.xlu0 %1256 }
 0x37f   : > { %v1261_v61 = vsel %vm1260_vm7, %v1257_v43, %v1259_v46  ;;  %v1262_v39 = vsel %vm1260_vm7, %v1259_v46, %v1257_v43 }
 0x380   : > { %v3664_v31 = vmul.f32 %v1263_v59, %v1262_v39  ;;  %v3667_v52 = vmul.f32 %v3660_v38, %v1261_v61  ;;  %v3681_v59 = vsel %vm1239_vm11, 1.0, %v2914_v20  ;;  %v1542_v61 = vmul.f32 %v2737_v63, %v3662_v36 }
 0x381   : > { %v3693_v40 = vmul.f32 %v3673_v10, %v3681_v59 }
 0x382   : > { %v1396_v2 = vpop.permute.xlu1 %1395  ;;  %v1398_v56 = vpop.permute.xlu0 %1397  ;;  %v1276_v20 = vrot.slane %v3664_v31, %v3073_v7  ;;  %v1280_v62 = vrot.slane %v3667_v52, %v3073_v7  ;;  %v1290_v21 = vrot.slane %v3664_v31, %v3077_v11  ;;  %v1294_v53 = vrot.slane %v3667_v52, %v3077_v11 }
 0x383   : > { %v3671_v25 = vsel %vm1399_vm8, %v1396_v2, %v1398_v56  ;;  %v1306_v4 = vrot.slane %v3664_v31, %v3081_v16 }
 0x384   : > { %v1418_v46 = vrot.slane %v3671_v25, %v3073_v7  ;;  %v1432_v55 = vrot.slane %v3671_v25, %v3077_v11  ;;  %v1448_v26 = vrot.slane %v3671_v25, %v3081_v16  ;;  %v1464_v22 = vrot.slane %v3671_v25, %v3085_v18 }
 0x385   : > { %v1480_v51 = vrot.slane %v3671_v25, %v3075_v8  ;;  %v1496_v58 = vrot.slane %v3671_v25, %v3079_v12 }
 0x386   : > { %v1536_v43 = vpop.permute.xlu1 %1535  ;;  %v1420_v39 = vmul.f32 %v1418_v46, %v3288_v54  ;;  %v1434_v33 = vmul.f32 %v1432_v55, %v3381_v37  ;;  %v1401_v46 = vsel %vm1399_vm8, %v1398_v56, %v1396_v2  ;;  %v1680_v55 = vpop.permute.xlu0 %1679  ;;  %v1450_v27 = vmul.f32 %v1448_v26, %v3294_v24 }
 0x387   : > { %v1310_v2 = vrot.slane %v3667_v52, %v3081_v16  ;;  %v1322_v56 = vrot.slane %v3664_v31, %v3085_v18  ;;  %v1281_v37 = vmul.f32 %v1276_v20, %v3396_v5  ;;  %v1282_v54 = vmul.f32 %v1280_v62, %v3396_v5 }
 0x388   : > { %v1436_v9 = vadd.f32 %v1434_v33, %v1420_v39  ;;  %v1326_v33 = vrot.slane %v3667_v52, %v3085_v18  ;;  %v3718_v39 = vmul.f32 %v2737_v63, %v1401_v46  ;;  %v1466_v63 = vmul.f32 %v1464_v22, %v3303_v28 }
 0x389   : > { %v1512_v46 = vrot.slane %v3671_v25, %v3083_v17  ;;  %v1528_v5 = vrot.slane %v3671_v25, %v3087_v19  ;;  %v1295_v62 = vmul.f32 %v1290_v21, %v3263_v14  ;;  %v1482_v28 = vmul.f32 %v1480_v51, %v3435_v57  ;;  %v4384_v25 = vld [vmem:[#allocation24_spill] sm:$0xff] }
 0x38a   : > { %v1538_v3 = vpop.permute.xlu1 %1537  ;;  %v1452_v35 = vadd.f32 %v1450_v27, %v1436_v9  ;;  %v1949_v45 = vpop.permute.xlu0 %1948  ;;  %v1498_v13 = vmul.f32 %v1496_v58, %v4382_v15  ;;  %v4385_v21 = vld [vmem:[#allocation12_spill] sm:$0xff] }
 0x38b   : > { %v1540_v26 = vsel %vm1539_vm12, %v1536_v43, %v1538_v3  ;;  %v1541_v1 = vsel %vm1539_vm12, %v1538_v3, %v1536_v43  ;;  %v4383_v43 = vld [vmem:[#allocation11_spill] sm:$0xff] }
 0x38c   : > { %v3728_v42 = vmul.f32 %v1542_v61, %v1541_v1  ;;  %v3731_v24 = vmul.f32 %v3681_v59, %v1540_v26  ;;  %v1296_v61 = vmul.f32 %v1294_v53, %v3263_v14  ;;  %v1468_v26 = vadd.f32 %v1466_v63, %v1452_v35  ;;  %v4386_v14 = vld [vmem:[#allocation3_spill] sm:$0xff] }
 0x38d   : > { %v3759_v60 = vmul.f32 %v1512_v46, %v4383_v43  ;;  %v3764_v53 = vmul.f32 %v1306_v4, %v4386_v14  ;;  %v3769_v58 = vmul.f32 %v1310_v2, %v4386_v14  ;;  %v3772_v63 = vmul.f32 %v1322_v56, %v3504_v6 }
 0x38e   : > { %v1678_v3 = vpop.permute.xlu1 %1677  ;;  %v1556_v27 = vrot.slane %v3728_v42, %v3073_v7  ;;  %v1560_v1 = vrot.slane %v3731_v24, %v3073_v7  ;;  %v1570_v9 = vrot.slane %v3728_v42, %v3077_v11  ;;  %v1574_v22 = vrot.slane %v3731_v24, %v3077_v11 }
 0x38f   : > { %v3775_v46 = vmul.f32 %v1528_v5, %v3464_v41  ;;  %v3781_v4 = vadd.f32 %v1296_v61, %v1282_v54  ;;  %v1484_v43 = vadd.f32 %v1482_v28, %v1468_v26  ;;  %v1683_v2 = vsel %vm1681_vm13, %v1680_v55, %v1678_v3 }
 0x390   : > { %v1561_v23 = vmul.f32 %v1556_v27, %v4384_v25  ;;  %v1575_v32 = vmul.f32 %v1570_v9, %v4385_v21  ;;  %v1562_v35 = vmul.f32 %v1560_v1, %v4384_v25  ;;  %v1576_v51 = vmul.f32 %v1574_v22, %v4385_v21  ;;  %v2091_v22 = vpop.permute.xlu0 %2090 }
 0x391   : > { %4387 = vst [vmem:[#allocation10_spill] sm:$0xff] %v3775_v46  ;;  %v1586_v27 = vrot.slane %v3728_v42, %v3081_v16  ;;  %v3779_v9 = vadd.f32 %v1295_v62, %v1281_v37  ;;  %v1682_v1 = vsel %vm1681_vm13, %v1678_v3, %v1680_v55  ;;  %v1590_v56 = vrot.slane %v3731_v24, %v3081_v16 }
 0x392   : > { %v1951_v20 = vpop.permute.xlu1 %1950  ;;  %v1577_v25 = vadd.f32 %v1575_v32, %v1561_v23  ;;  %v1602_v37 = vrot.slane %v3728_v42, %v3085_v18  ;;  %v1606_v54 = vrot.slane %v3731_v24, %v3085_v18  ;;  %v1578_v61 = vadd.f32 %v1576_v51, %v1562_v35  ;;  %v4389_v32 = vld [vmem:[#allocation13_spill] sm:$0xff] }
 0x393   : > { %v1953_v5 = vsel %vm1952_vm14, %v1949_v45, %v1951_v20  ;;  %v1954_v28 = vsel %vm1952_vm14, %v1951_v20, %v1949_v45  ;;  %v1618_v55 = vrot.slane %v3728_v42, %v3075_v8  ;;  %v3800_v3 = vmul.f32 %v1326_v33, %v3504_v6 }
 0x394   : > { %v3803_v26 = vmul.f32 %v3655_v30, %v1683_v2  ;;  %v1591_v23 = vmul.f32 %v1586_v27, %v4389_v32  ;;  %v3810_v45 = vadd.f32 %v1498_v13, %v1484_v43  ;;  %v3813_v20 = vmul.f32 %v3660_v38, %v1682_v1  ;;  %v2231_v13 = vpop.permute.xlu0 %2230  ;;  %v4393_v1 = vld [vmem:[#allocation14_spill] sm:$0xff] }
 0x395   : > { %v3816_v35 = vmul.f32 %v3662_v36, %v1953_v5  ;;  %v1592_v6 = vmul.f32 %v1590_v56, %v4389_v32  ;;  %v3821_v33 = vmul.f32 %v3681_v59, %v1954_v28  ;;  %v1607_v27 = vmul.f32 %v1602_v37, %v3510_v47 }
 0x396   : > { %v2089_v62 = vpop.permute.xlu1 %2088  ;;  %4388 = vst [vmem:[#allocation24_spill] sm:$0xff] %v3803_v26  ;;  %4390 = vst [vmem:[#allocation12_spill] sm:$0xff] %v3813_v20  ;;  %v1593_v51 = vadd.f32 %v1591_v23, %v1577_v25  ;;  %v1608_v2 = vmul.f32 %v1606_v54, %v3510_v47  ;;  %v1622_v38 = vrot.slane %v3731_v24, %v3075_v8  ;;  %v4396_v26 = vld [vmem:[#allocation15_spill] sm:$0xff] }
 0x397   : > { %4391 = vst [vmem:[#allocation3_spill] sm:$0xff] %v3816_v35  ;;  %4392 = vst [vmem:[#allocation13_spill] sm:$0xff] %v3821_v33  ;;  %v1594_v14 = vadd.f32 %v1592_v6, %v1578_v61  ;;  %v1623_v5 = vmul.f32 %v1618_v55, %v4393_v1  ;;  %v1634_v21 = vrot.slane %v3728_v42, %v3079_v12 }
 0x398   : > { %v2093_v59 = vsel %vm2092_vm15, %v2089_v62, %v2091_v22  ;;  %v2094_v56 = vsel %vm2092_vm15, %v2091_v22, %v2089_v62  ;;  %v1609_v62 = vadd.f32 %v1607_v27, %v1593_v51  ;;  %v1638_v55 = vrot.slane %v3731_v24, %v3079_v12 }
 0x399   : > { %v3865_v51 = vmul.f32 %v3689_v48, %v2094_v56  ;;  %v1624_v33 = vmul.f32 %v1622_v38, %v4393_v1  ;;  %v1610_v20 = vadd.f32 %v1608_v2, %v1594_v14  ;;  %v1654_v14 = vrot.slane %v3731_v24, %v3083_v17  ;;  %v4397_v2 = vld [vmem:[#allocation27_spill] sm:$0xff] }
 0x39a   : > { %v2233_v43 = vpop.permute.xlu1 %2232 }
 0x39b   : > { %v3836_v47 = vsel %vm2234_vm0, %v2231_v13, %v2233_v43  ;;  %v2236_v25 = vsel %vm2234_vm0, %v2233_v43, %v2231_v13  ;;  %4395 = vst [vmem:[#allocation54_spill] sm:$0xff] %v3865_v51 }
 0x39c   : > { %v3841_v37 = vmul.f32 %v3673_v10, %v2236_v25  ;;  %v2249_v54 = vrot.slane %v3836_v47, %v3073_v7  ;;  %v2263_v28 = vrot.slane %v3836_v47, %v3077_v11  ;;  %v2279_v61 = vrot.slane %v3836_v47, %v3081_v16 }
 0x39d   : > { %v2295_v22 = vrot.slane %v3836_v47, %v3085_v18  ;;  %v1650_v10 = vrot.slane %v3728_v42, %v3083_v17  ;;  %v3862_v25 = vmul.f32 %v3655_v30, %v2093_v59  ;;  %v1639_v30 = vmul.f32 %v1634_v21, %v4396_v26 }
 0x39e   : > { %v2371_v32 = vpop.permute.xlu1 %2370  ;;  %v2253_v23 = vrot.slane %v3841_v37, %v3073_v7  ;;  %v2254_v6 = vmul.f32 %v2249_v54, %v3627_v49  ;;  %v2267_v13 = vrot.slane %v3841_v37, %v3077_v11  ;;  %v2268_v43 = vmul.f32 %v2263_v28, %v3631_v29 }
 0x39f   : > { %4394 = vst [vmem:[#allocation14_spill] sm:$0xff] %v3862_v25  ;;  %v2283_v27 = vrot.slane %v3841_v37, %v3081_v16  ;;  %v2284_v41 = vmul.f32 %v2279_v61, %v3559_v34  ;;  %v1625_v28 = vadd.f32 %v1623_v5, %v1609_v62  ;;  %v1640_v59 = vmul.f32 %v1638_v55, %v4396_v26 }
 0x3a0   : > { %v2255_v35 = vmul.f32 %v2253_v23, %v3627_v49  ;;  %v2269_v54 = vmul.f32 %v2267_v13, %v3631_v29  ;;  %v2270_v46 = vadd.f32 %v2268_v43, %v2254_v6  ;;  %v2300_v38 = vmul.f32 %v2295_v22, %v3516_v0  ;;  %v4398_v43 = vld [vmem:[#allocation49_spill] sm:$0xff] }
 0x3a1   : > { %v2285_v51 = vmul.f32 %v2283_v27, %v3559_v34  ;;  %v1655_v21 = vmul.f32 %v1650_v10, %v4397_v2  ;;  %v2311_v50 = vrot.slane %v3836_v47, %v3075_v8  ;;  %v2315_v1 = vrot.slane %v3841_v37, %v3075_v8  ;;  %v4399_v27 = vld [vmem:[#allocation50_spill] sm:$0xff] }
 0x3a2   : > { %v2373_v48 = vpop.permute.xlu1 %2372  ;;  %v2271_v56 = vadd.f32 %v2269_v54, %v2255_v35  ;;  %v2286_v25 = vadd.f32 %v2284_v41, %v2270_v46  ;;  %v2299_v46 = vrot.slane %v3841_v37, %v3085_v18  ;;  %v1626_v5 = vadd.f32 %v1624_v33, %v1610_v20 }
 0x3a3   : > { %v2375_v49 = vsel %vm2374_vm1, %v2371_v32, %v2373_v48  ;;  %v2376_v29 = vsel %vm2374_vm1, %v2373_v48, %v2371_v32  ;;  %v2327_v62 = vrot.slane %v3836_v47, %v3079_v12  ;;  %v1666_v55 = vrot.slane %v3728_v42, %v3087_v19 }
 0x3a4   : > { %v3885_v26 = vmul.f32 %v3662_v36, %v2375_v49  ;;  %v3888_v35 = vmul.f32 %v3693_v40, %v2376_v29  ;;  %v2287_v41 = vadd.f32 %v2285_v51, %v2271_v56  ;;  %v2302_v34 = vadd.f32 %v2300_v38, %v2286_v25  ;;  %v4400_v38 = vld [vmem:[#allocation53_spill] sm:$0xff] }
 0x3a5   : > { %v1670_v20 = vrot.slane %v3731_v24, %v3087_v19  ;;  %v1313_v33 = vadd.f32 %v3764_v53, %v3779_v9  ;;  %v2331_v10 = vrot.slane %v3841_v37, %v3079_v12  ;;  %v2343_v32 = vrot.slane %v3836_v47, %v3083_v17 }
 0x3a6   : > { %v2391_v61 = vrot.slane %v3885_v26, %v3073_v7  ;;  %v2395_v36 = vrot.slane %v3888_v35, %v3073_v7  ;;  %v2405_v40 = vrot.slane %v3885_v26, %v3077_v11  ;;  %v2409_v22 = vrot.slane %v3888_v35, %v3077_v11 }
 0x3a7   : > { %v1641_v23 = vadd.f32 %v1639_v30, %v1625_v28  ;;  %v1656_v6 = vmul.f32 %v1654_v14, %v4397_v2  ;;  %v2421_v42 = vrot.slane %v3885_v26, %v3081_v16  ;;  %v2301_v51 = vmul.f32 %v2299_v46, %v3516_v0  ;;  %v4401_v46 = vld [vmem:[#allocation36_spill] sm:$0xff] }
 0x3a8   : > { %v2396_v13 = vmul.f32 %v2391_v61, %v3637_v44  ;;  %v2410_v25 = vmul.f32 %v2405_v40, %v4398_v43  ;;  %v2397_v53 = vmul.f32 %v2395_v36, %v3637_v44  ;;  %v2411_v9 = vmul.f32 %v2409_v22, %v4398_v43  ;;  %v4402_v43 = vld [vmem:[#allocation51_spill] sm:$0xff] }
 0x3a9   : > { %v2316_v54 = vmul.f32 %v2311_v50, %v4399_v27  ;;  %v2317_v48 = vmul.f32 %v2315_v1, %v4399_v27  ;;  %v2425_v28 = vrot.slane %v3888_v35, %v3081_v16  ;;  %v2437_v30 = vrot.slane %v3885_v26, %v3085_v18 }
 0x3aa   : > { %v2441_v56 = vrot.slane %v3888_v35, %v3085_v18  ;;  %v2332_v49 = vmul.f32 %v2327_v62, %v4400_v38  ;;  %v2333_v0 = vmul.f32 %v2331_v10, %v4400_v38  ;;  %v2347_v44 = vrot.slane %v3841_v37, %v3083_v17 }
 0x3ab   : > { %v2359_v29 = vrot.slane %v3836_v47, %v3087_v19  ;;  %v2363_v14 = vrot.slane %v3841_v37, %v3087_v19  ;;  %v2412_v2 = vadd.f32 %v2410_v25, %v2396_v13  ;;  %v2426_v50 = vmul.f32 %v2421_v42, %v4401_v46 }
 0x3ac   : > { %v1642_v1 = vadd.f32 %v1640_v59, %v1626_v5  ;;  %v3941_v61 = vadd.f32 %v1655_v21, %v1641_v23  ;;  %v2413_v36 = vadd.f32 %v2411_v9, %v2397_v53  ;;  %v2453_v40 = vrot.slane %v3885_v26, %v3075_v8  ;;  %v4403_v53 = vld [vmem:[#allocation52_spill] sm:$0xff] }
 0x3ad   : > { %v2303_v22 = vadd.f32 %v2301_v51, %v2287_v41  ;;  %v2318_v62 = vadd.f32 %v2316_v54, %v2302_v34  ;;  %v2427_v10 = vmul.f32 %v2425_v28, %v4401_v46  ;;  %v3947_v27 = vmul.f32 %v2437_v30, %v4402_v43  ;;  %v4404_v30 = vld [vmem:[#allocation4_spill] sm:$0xff] }
 0x3ae   : > { %v3950_v47 = vmul.f32 %v2441_v56, %v4402_v43  ;;  %v2457_v37 = vrot.slane %v3888_v35, %v3075_v8  ;;  %v2469_v59 = vrot.slane %v3885_v26, %v3079_v12  ;;  %v2473_v21 = vrot.slane %v3888_v35, %v3079_v12 }
 0x3af   : > { %v2319_v5 = vadd.f32 %v2317_v48, %v2303_v22  ;;  %v2334_v41 = vadd.f32 %v2332_v49, %v2318_v62  ;;  %v2485_v34 = vrot.slane %v3885_v26, %v3083_v17  ;;  %v2489_v23 = vrot.slane %v3888_v35, %v3083_v17 }
 0x3b0   : > { %v1314_v13 = vadd.f32 %v3769_v58, %v3781_v4  ;;  %v1329_v25 = vadd.f32 %v3772_v63, %v1313_v33  ;;  %v3965_v42 = vadd.f32 %v2426_v50, %v2412_v2  ;;  %v3967_v51 = vadd.f32 %v2427_v10, %v2413_v36 }
 0x3b1   : > { %v3970_v9 = vmul.f32 %v2453_v40, %v4403_v53  ;;  %v2335_v54 = vadd.f32 %v2333_v0, %v2319_v5  ;;  %v4405_v56 = vrot.slane %v3664_v31, %v3075_v8  ;;  %v4406_v58 = vrot.slane %v3667_v52, %v3075_v8  ;;  %v4407_v0 = vld [vmem:[#allocation16_spill] sm:$0xff]  ;;  %v4408_v40 = vld [vmem:[#allocation5_spill] sm:$0xff] }
 0x3b2   : > { %v1330_v28 = vadd.f32 %v3800_v3, %v1314_v13  ;;  %v1354_v4 = vrot.slane %v3664_v31, %v3079_v12  ;;  %v1658_v2 = vadd.f32 %v1656_v6, %v1642_v1  ;;  %v1671_v46 = vmul.f32 %v1666_v55, %v4407_v0 }
 0x3b3   : > { %v2338_v48 = vpop.permute.xlu1 %2337  ;;  %v1343_v38 = vmul.f32 %v4405_v56, %v4404_v30  ;;  %v1344_v63 = vmul.f32 %v4406_v58, %v4404_v30  ;;  %v1358_v36 = vrot.slane %v3667_v52, %v3079_v12  ;;  %v1370_v43 = vrot.slane %v3664_v31, %v3083_v17  ;;  %v4412_v30 = vld [vmem:[#allocation19_spill] sm:$0xff] }
 0x3b4   : > { %v2348_v33 = vmul.f32 %v2343_v32, %v2338_v48  ;;  %v2349_v49 = vmul.f32 %v2347_v44, %v2338_v48  ;;  %v1359_v22 = vmul.f32 %v1354_v4, %v4408_v40  ;;  %v1374_v5 = vrot.slane %v3667_v52, %v3083_v17  ;;  %v4414_v4 = vld [vmem:[#allocation6_spill] sm:$0xff] }
 0x3b5   : > { %v1345_v50 = vadd.f32 %v1343_v38, %v1329_v25  ;;  %v1346_v3 = vadd.f32 %v1344_v63, %v1330_v28  ;;  %v1672_v55 = vmul.f32 %v1670_v20, %v4407_v0  ;;  %v1360_v32 = vmul.f32 %v1358_v36, %v4408_v40 }
 0x3b6   : > { %v2350_v62 = vadd.f32 %v2348_v33, %v2334_v41  ;;  %v2351_v10 = vadd.f32 %v2349_v49, %v2335_v54  ;;  %v1386_v44 = vrot.slane %v3664_v31, %v3087_v19  ;;  %v4409_v41 = vld [vmem:[#allocation26_spill] sm:$0xff]  ;;  %v1390_v25 = vrot.slane %v3667_v52, %v3087_v19  ;;  %v4410_v54 = vld [vmem:[#allocation7_spill] sm:$0xff] }
 0x3b7   : > { %v1361_v6 = vadd.f32 %v1359_v22, %v1345_v50  ;;  %v1375_v13 = vmul.f32 %v1370_v43, %v4409_v41  ;;  %v4411_v48 = vrot.slane %v3718_v39, %v3073_v7  ;;  %v4413_v24 = vrot.slane %v3718_v39, %v3077_v11 }
 0x3b8   : > { %v2354_v1 = vpop.permute.xlu1 %2353  ;;  %v1362_v58 = vadd.f32 %v1360_v32, %v1346_v3  ;;  %v1376_v31 = vmul.f32 %v1374_v5, %v4409_v41  ;;  %v1391_v33 = vmul.f32 %v1386_v44, %v4414_v4  ;;  %v1444_v52 = vrot.slane %v3718_v39, %v3081_v16 }
 0x3b9   : > { %v1419_v28 = vmul.f32 %v4411_v48, %v4410_v54  ;;  %v1433_v20 = vmul.f32 %v4413_v24, %v4412_v30  ;;  %v2364_v56 = vmul.f32 %v2359_v29, %v2354_v1  ;;  %v2365_v38 = vmul.f32 %v2363_v14, %v2354_v1  ;;  %v4415_v14 = vld [vmem:[#allocation8_spill] sm:$0xff]  ;;  %v4416_v1 = vld [vmem:[#allocation9_spill] sm:$0xff] }
 0x3ba   : > { %v1377_v63 = vadd.f32 %v1375_v13, %v1361_v6  ;;  %v1378_v36 = vadd.f32 %v1376_v31, %v1362_v58  ;;  %v1460_v40 = vrot.slane %v3718_v39, %v3085_v18  ;;  %v1392_v29 = vmul.f32 %v1390_v25, %v4414_v4  ;;  %v4420_v24 = vld [vmem:[#allocation32_spill] sm:$0xff]  ;;  %v4423_v4 = vld [vmem:[#allocation21_spill] sm:$0xff] }
 0x3bb   : > { %v1435_v49 = vadd.f32 %v1433_v20, %v1419_v28  ;;  %v4013_v0 = vadd.f32 %v2364_v56, %v2350_v62  ;;  %v4015_v50 = vadd.f32 %v2365_v38, %v2351_v10  ;;  %v1449_v3 = vmul.f32 %v1444_v52, %v4415_v14  ;;  %v4419_v28 = vld [vmem:[#allocation12_spill] sm:$0xff] }
 0x3bc   : > { %v1476_v22 = vrot.slane %v3718_v39, %v3075_v8  ;;  %v1492_v43 = vrot.slane %v3718_v39, %v3079_v12  ;;  %v4026_v5 = vmul.f32 %v2457_v37, %v4403_v53  ;;  %v1673_v62 = vadd.f32 %v1671_v46, %v3941_v61  ;;  %v4417_v53 = vld [vmem:[#allocation11_spill] sm:$0xff]  ;;  %v4418_v46 = vld [vmem:[#allocation24_spill] sm:$0xff] }
 0x3bd   : > { %v1674_v10 = vadd.f32 %v1672_v55, %v1658_v2  ;;  %v1393_v32 = vadd.f32 %v1391_v33, %v1377_v63  ;;  %v1394_v6 = vadd.f32 %v1392_v29, %v1378_v36  ;;  %v1451_v44 = vadd.f32 %v1449_v3, %v1435_v49 }
 0x3be   : > { %v1465_v41 = vmul.f32 %v1460_v40, %v4416_v1  ;;  %v1508_v13 = vrot.slane %v3718_v39, %v3083_v17  ;;  %v1481_v25 = vmul.f32 %v1476_v22, %v3435_v57  ;;  %v1497_v54 = vmul.f32 %v1492_v43, %v4382_v15  ;;  %v4421_v57 = vld [vmem:[#allocation10_spill] sm:$0xff] }
 0x3bf   : > { %v1516_v48 = vadd.f32 %v3759_v60, %v3810_v45  ;;  %v1524_v37 = vrot.slane %v3718_v39, %v3087_v19  ;;  %v1696_v55 = vrot.slane %v4418_v46, %v3073_v7  ;;  %v1700_v30 = vrot.slane %v4419_v28, %v3073_v7  ;;  %v4422_v45 = vld [vmem:[#allocation17_spill] sm:$0xff]  ;;  %v4424_v40 = vld [vmem:[#allocation18_spill] sm:$0xff] }
 0x3c0   : > { %v1467_v61 = vadd.f32 %v1465_v41, %v1451_v44  ;;  %v1513_v2 = vmul.f32 %v1508_v13, %v4417_v53  ;;  %v1710_v15 = vrot.slane %v4418_v46, %v3077_v11  ;;  %v1714_v60 = vrot.slane %v4419_v28, %v3077_v11  ;;  %v4425_v41 = vld [vmem:[#allocation20_spill] sm:$0xff] }
 0x3c1   : > { %v1529_v20 = vmul.f32 %v1524_v37, %v4420_v24  ;;  %v1532_v56 = vadd.f32 %v4421_v57, %v1516_v48  ;;  %v1701_v38 = vmul.f32 %v1696_v55, %v4422_v45  ;;  %v1702_v58 = vmul.f32 %v1700_v30, %v4422_v45  ;;  %v4426_v55 = vld [vmem:[#allocation30_spill] sm:$0xff] }
 0x3c2   : > { %v1483_v39 = vadd.f32 %v1481_v25, %v1467_v61  ;;  %v1726_v31 = vrot.slane %v4418_v46, %v3081_v16  ;;  %v1715_v33 = vmul.f32 %v1710_v15, %v4423_v4  ;;  %v1716_v49 = vmul.f32 %v1714_v60, %v4423_v4  ;;  %v4427_v60 = vld [vmem:[#allocation22_spill] sm:$0xff] }
 0x3c3   : > { %v1534_v63 = vadd.f32 %v1532_v56, %v1394_v6  ;;  %v1730_v52 = vrot.slane %v4419_v28, %v3081_v16  ;;  %v1742_v14 = vrot.slane %v4418_v46, %v3085_v18  ;;  %v1746_v3 = vrot.slane %v4419_v28, %v3085_v18 }
 0x3c4   : > { %v1499_v36 = vadd.f32 %v1497_v54, %v1483_v39  ;;  %v1731_v29 = vmul.f32 %v1726_v31, %v4424_v40  ;;  %v1717_v43 = vadd.f32 %v1715_v33, %v1701_v38  ;;  %v1718_v44 = vadd.f32 %v1716_v49, %v1702_v58  ;;  %v4428_v58 = vld [vmem:[#allocation23_spill] sm:$0xff] }
 0x3c5   : > { %v1676_v22 = vadd.f32 %v1674_v10, %v1534_v63  ;;  %v1732_v6 = vmul.f32 %v1730_v52, %v4424_v40  ;;  %v1747_v13 = vmul.f32 %v1742_v14, %v4425_v41  ;;  %v1748_v25 = vmul.f32 %v1746_v3, %v4425_v41  ;;  %v4432_v41 = vld [vmem:[#allocation25_spill] sm:$0xff] }
 0x3c6   : > { %v1515_v1 = vadd.f32 %v1513_v2, %v1499_v36  ;;  %v1758_v54 = vrot.slane %v4418_v46, %v3075_v8  ;;  %v1733_v48 = vadd.f32 %v1731_v29, %v1717_v43  ;;  %v1762_v61 = vrot.slane %v4419_v28, %v3075_v8  ;;  %v4430_v29 = vld [vmem:[#allocation13_spill] sm:$0xff] }
 0x3c7   : > { %v1734_v37 = vadd.f32 %v1732_v6, %v1718_v44  ;;  %v1774_v10 = vrot.slane %v4418_v46, %v3079_v12  ;;  %v1778_v2 = vrot.slane %v4419_v28, %v3079_v12  ;;  %v1790_v24 = vrot.slane %v4418_v46, %v3083_v17  ;;  %v4431_v44 = vld [vmem:[#allocation33_spill] sm:$0xff] }
 0x3c8   : > { %v1531_v53 = vadd.f32 %v1529_v20, %v1515_v1  ;;  %v1763_v30 = vmul.f32 %v1758_v54, %v4426_v55  ;;  %v1749_v57 = vadd.f32 %v1747_v13, %v1733_v48  ;;  %v1764_v15 = vmul.f32 %v1762_v61, %v4426_v55  ;;  %v4433_v61 = vld [vmem:[#allocation37_spill] sm:$0xff] }
 0x3c9   : > { %v1750_v56 = vadd.f32 %v1748_v25, %v1734_v37  ;;  %v1779_v39 = vmul.f32 %v1774_v10, %v4427_v60  ;;  %v1780_v38 = vmul.f32 %v1778_v2, %v4427_v60  ;;  %v1794_v20 = vrot.slane %v4419_v28, %v3083_v17 }
 0x3ca   : > { %v1533_v45 = vadd.f32 %v1531_v53, %v1393_v32  ;;  %v1795_v31 = vmul.f32 %v1790_v24, %v4428_v58  ;;  %v1765_v63 = vadd.f32 %v1763_v30, %v1749_v57  ;;  %v1806_v33 = vrot.slane %v4418_v46, %v3087_v19  ;;  %v4429_v32 = vld [vmem:[#allocation3_spill] sm:$0xff]  ;;  %v4434_v57 = vld [vmem:[#allocation38_spill] sm:$0xff] }
 0x3cb   : > { %v1766_v4 = vadd.f32 %v1764_v15, %v1750_v56  ;;  %v1810_v49 = vrot.slane %v4419_v28, %v3087_v19  ;;  %v1796_v36 = vmul.f32 %v1794_v20, %v4428_v58  ;;  %v1967_v40 = vrot.slane %v4429_v32, %v3073_v7 }
 0x3cc   : > { %v1675_v52 = vadd.f32 %v1673_v62, %v1533_v45  ;;  %v1971_v14 = vrot.slane %v4430_v29, %v3073_v7  ;;  %v1781_v3 = vadd.f32 %v1779_v39, %v1765_v63  ;;  %v1811_v6 = vmul.f32 %v1806_v33, %v4431_v44  ;;  %v4435_v45 = vld [vmem:[#allocation35_spill] sm:$0xff] }
 0x3cd   : > { %v1782_v43 = vadd.f32 %v1780_v38, %v1766_v4  ;;  %v1812_v1 = vmul.f32 %v1810_v49, %v4431_v44  ;;  %v1972_v46 = vmul.f32 %v1967_v40, %v4432_v41  ;;  %v1981_v62 = vrot.slane %v4429_v32, %v3077_v11 }
 0x3ce   : > { %v1973_v13 = vmul.f32 %v1971_v14, %v4432_v41  ;;  %v1985_v28 = vrot.slane %v4430_v29, %v3077_v11  ;;  %v1797_v25 = vadd.f32 %v1795_v31, %v1781_v3  ;;  %v1997_v48 = vrot.slane %v4429_v32, %v3081_v16  ;;  %v4436_v14 = vld [vmem:[#allocation39_spill] sm:$0xff] }
 0x3cf   : > { %v1798_v54 = vadd.f32 %v1796_v36, %v1782_v43  ;;  %v2001_v37 = vrot.slane %v4430_v29, %v3081_v16  ;;  %v1986_v10 = vmul.f32 %v1981_v62, %v4433_v61  ;;  %v2013_v55 = vrot.slane %v4429_v32, %v3085_v18  ;;  %v4437_v43 = vld [vmem:[#allocation40_spill] sm:$0xff] }
 0x3d0   : > { %v1987_v53 = vmul.f32 %v1985_v28, %v4433_v61  ;;  %v2017_v30 = vrot.slane %v4430_v29, %v3085_v18  ;;  %v1813_v2 = vadd.f32 %v1811_v6, %v1797_v25  ;;  %v2002_v56 = vmul.f32 %v1997_v48, %v4434_v57 }
 0x3d1   : > { %v1814_v24 = vadd.f32 %v1812_v1, %v1798_v54  ;;  %v2003_v15 = vmul.f32 %v2001_v37, %v4434_v57  ;;  %v1988_v60 = vadd.f32 %v1986_v10, %v1972_v46  ;;  %v2018_v38 = vmul.f32 %v2013_v55, %v4435_v45  ;;  %v4439_v46 = vld [vmem:[#allocation42_spill] sm:$0xff]  ;;  %v4442_v57 = vld [vmem:[#allocation28_spill] sm:$0xff] }
 0x3d2   : > { %v1989_v39 = vadd.f32 %v1987_v53, %v1973_v13  ;;  %v2019_v20 = vmul.f32 %v2017_v30, %v4435_v45  ;;  %v1815_v58 = vadd.f32 %v1813_v2, %v1675_v52  ;;  %v2029_v63 = vrot.slane %v4429_v32, %v3075_v8  ;;  %v4438_v52 = vld [vmem:[#allocation41_spill] sm:$0xff]  ;;  %v4440_v10 = vld [vmem:[#allocation14_spill] sm:$0xff] }
 0x3d3   : > { %v1816_v31 = vadd.f32 %v1814_v24, %v1676_v22  ;;  %v2033_v4 = vrot.slane %v4430_v29, %v3075_v8  ;;  %v2004_v33 = vadd.f32 %v2002_v56, %v1988_v60  ;;  %v2045_v36 = vrot.slane %v4429_v32, %v3079_v12  ;;  %v4441_v55 = vld [vmem:[#allocation54_spill] sm:$0xff]  ;;  %v4443_v60 = vld [vmem:[#allocation44_spill] sm:$0xff] }
 0x3d4   : > { %v2005_v49 = vadd.f32 %v2003_v15, %v1989_v39  ;;  %v2049_v40 = vrot.slane %v4430_v29, %v3079_v12  ;;  %v1946_v3 = vadd.f32 %v4436_v14, %v1815_v58  ;;  %v2034_v22 = vmul.f32 %v2029_v63, %v4438_v52  ;;  %v4444_v58 = vld [vmem:[#allocation43_spill] sm:$0xff] }
 0x3d5   : > { %v1947_v44 = vadd.f32 %v4437_v43, %v1816_v31  ;;  %v2035_v6 = vmul.f32 %v2033_v4, %v4438_v52  ;;  %v2020_v1 = vadd.f32 %v2018_v38, %v2004_v33  ;;  %v2050_v13 = vmul.f32 %v2045_v36, %v4439_v46  ;;  %v4445_v4 = vld [vmem:[#allocation29_spill] sm:$0xff] }
 0x3d6   : > { %v2021_v41 = vadd.f32 %v2019_v20, %v2005_v49  ;;  %v2051_v62 = vmul.f32 %v2049_v40, %v4439_v46  ;;  %v2061_v28 = vrot.slane %v4429_v32, %v3083_v17  ;;  %v2065_v25 = vrot.slane %v4430_v29, %v3083_v17  ;;  %v4446_v52 = vld [vmem:[#allocation45_spill] sm:$0xff] }
 0x3d7   : > { %v2077_v54 = vrot.slane %v4429_v32, %v3087_v19  ;;  %v2081_v48 = vrot.slane %v4430_v29, %v3087_v19  ;;  %v2036_v37 = vadd.f32 %v2034_v22, %v2020_v1  ;;  %v2109_v53 = vrot.slane %v4440_v10, %v3073_v7  ;;  %v2464_v1 = vpop.permute.xlu0 %2463 }
 0x3d8   : > { %v2037_v61 = vadd.f32 %v2035_v6, %v2021_v41  ;;  %v2113_v30 = vrot.slane %v4441_v55, %v3073_v7  ;;  %v2444_v2 = vadd.f32 %v3947_v27, %v3965_v42  ;;  %v2445_v24 = vadd.f32 %v3950_v47, %v3967_v51  ;;  %v2496_v41 = vpop.permute.xlu1 %2495 }
 0x3d9   : > { %v2066_v56 = vmul.f32 %v2061_v28, %v4442_v57  ;;  %v2067_v32 = vmul.f32 %v2065_v25, %v4442_v57  ;;  %v2052_v15 = vadd.f32 %v2050_v13, %v2036_v37  ;;  %v2114_v39 = vmul.f32 %v2109_v53, %v4443_v60 }
 0x3da   : > { %v2053_v29 = vadd.f32 %v2051_v62, %v2037_v61  ;;  %v2115_v45 = vmul.f32 %v2113_v30, %v4443_v60  ;;  %v2123_v38 = vrot.slane %v4440_v10, %v3077_v11  ;;  %v2127_v20 = vrot.slane %v4441_v55, %v3077_v11  ;;  %v4447_v30 = vld [vmem:[#allocation46_spill] sm:$0xff] }
 0x3db   : > { %v2139_v27 = vrot.slane %v4440_v10, %v3081_v16  ;;  %v2143_v47 = vrot.slane %v4441_v55, %v3081_v16  ;;  %v2068_v42 = vadd.f32 %v2066_v56, %v2052_v15  ;;  %v2082_v31 = vmul.f32 %v2077_v54, %v4444_v58 }
 0x3dc   : > { %v2069_v51 = vadd.f32 %v2067_v32, %v2053_v29  ;;  %v2083_v63 = vmul.f32 %v2081_v48, %v4444_v58  ;;  %v2128_v33 = vmul.f32 %v2123_v38, %v4445_v4  ;;  %v2129_v49 = vmul.f32 %v2127_v20, %v4445_v4  ;;  %v4448_v29 = vld [vmem:[#allocation31_spill] sm:$0xff] }
 0x3dd   : > { %v2155_v36 = vrot.slane %v4440_v10, %v3085_v18  ;;  %v2159_v40 = vrot.slane %v4441_v55, %v3085_v18  ;;  %v2084_v14 = vadd.f32 %v2082_v31, %v2068_v42  ;;  %v2144_v22 = vmul.f32 %v2139_v27, %v4446_v52  ;;  %v2480_v27 = vpop.permute.xlu0 %2479 }
 0x3de   : > { %v2085_v43 = vadd.f32 %v2083_v63, %v2069_v51  ;;  %v2145_v6 = vmul.f32 %v2143_v47, %v4446_v52  ;;  %v2130_v46 = vadd.f32 %v2128_v33, %v2114_v39  ;;  %v2131_v13 = vadd.f32 %v2129_v49, %v2115_v45  ;;  %v2516_v47 = vpop.permute.xlu1 %2515 }
 0x3df   : > { %v2171_v62 = vrot.slane %v4440_v10, %v3075_v8  ;;  %v2175_v28 = vrot.slane %v4441_v55, %v3075_v8  ;;  %v2086_v25 = vadd.f32 %v2084_v14, %v1946_v3  ;;  %v2187_v48 = vrot.slane %v4440_v10, %v3079_v12 }
 0x3e0   : > { %v2087_v54 = vadd.f32 %v2085_v43, %v1947_v44  ;;  %v2191_v37 = vrot.slane %v4441_v55, %v3079_v12  ;;  %v2146_v61 = vadd.f32 %v2144_v22, %v2130_v46  ;;  %v2147_v53 = vadd.f32 %v2145_v6, %v2131_v13 }
 0x3e1   : > { %v2160_v57 = vmul.f32 %v2155_v36, %v4447_v30  ;;  %v2161_v56 = vmul.f32 %v2159_v40, %v4447_v30  ;;  %v2460_v32 = vadd.f32 %v3970_v9, %v2444_v2  ;;  %v2461_v15 = vadd.f32 %v4026_v5, %v2445_v24  ;;  %v4449_v5 = vld [vmem:[#allocation47_spill] sm:$0xff]  ;;  %v4450_v36 = vld [vmem:[#allocation48_spill] sm:$0xff] }
 0x3e2   : > { %v2176_v60 = vmul.f32 %v2171_v62, %v4448_v29  ;;  %v2177_v3 = vmul.f32 %v2175_v28, %v4448_v29  ;;  %v2203_v45 = vrot.slane %v4440_v10, %v3083_v17  ;;  %v2207_v38 = vrot.slane %v4441_v55, %v3083_v17 }
 0x3e3   : > { %v2162_v44 = vadd.f32 %v2160_v57, %v2146_v61  ;;  %v2163_v39 = vadd.f32 %v2161_v56, %v2147_v53  ;;  %v2474_v20 = vmul.f32 %v2469_v59, %v2464_v1  ;;  %v2475_v9 = vmul.f32 %v2473_v21, %v2464_v1  ;;  %v4451_v1 = vld [vmem:[#allocation34_spill] sm:$0xff]  ;;  %v2544_v61 = vpop.permute.xlu1 %2543 }
 0x3e4   : > { %v2192_v2 = vmul.f32 %v2187_v48, %v4449_v5  ;;  %v2193_v24 = vmul.f32 %v2191_v37, %v4449_v5  ;;  %v2219_v58 = vrot.slane %v4440_v10, %v3087_v19  ;;  %v2223_v31 = vrot.slane %v4441_v55, %v3087_v19 }
 0x3e5   : > { %v2178_v42 = vadd.f32 %v2176_v60, %v2162_v44  ;;  %v2179_v51 = vadd.f32 %v2177_v3, %v2163_v39  ;;  %v2476_v63 = vadd.f32 %v2474_v20, %v2460_v32  ;;  %v2477_v59 = vadd.f32 %v2475_v9, %v2461_v15  ;;  %v2530_v3 = vpop.permute.xlu0 %2529 }
 0x3e6   : > { %v2501_v4 = vrot.slane %v3885_v26, %v3087_v19  ;;  %v2505_v21 = vrot.slane %v3888_v35, %v3087_v19  ;;  %v2208_v40 = vmul.f32 %v2203_v45, %v4450_v36  ;;  %v2209_v14 = vmul.f32 %v2207_v38, %v4450_v36 }
 0x3e7   : > { %v2194_v33 = vadd.f32 %v2192_v2, %v2178_v42  ;;  %v2195_v49 = vadd.f32 %v2193_v24, %v2179_v51  ;;  %v2490_v10 = vmul.f32 %v2485_v34, %v2480_v27  ;;  %v2491_v55 = vmul.f32 %v2489_v23, %v2480_v27  ;;  %v2560_v56 = vpop.permute.xlu1 %2559 }
 0x3e8   : > { %v2506_v43 = vmul.f32 %v2501_v4, %v2496_v41  ;;  %v2507_v52 = vmul.f32 %v2505_v21, %v2496_v41  ;;  %v2224_v46 = vmul.f32 %v2219_v58, %v4451_v1  ;;  %v2225_v13 = vmul.f32 %v2223_v31, %v4451_v1 }
 0x3e9   : > { %v2210_v22 = vadd.f32 %v2208_v40, %v2194_v33  ;;  %v2211_v6 = vadd.f32 %v2209_v14, %v2195_v49  ;;  %v2492_v62 = vadd.f32 %v2490_v10, %v2476_v63  ;;  %v2493_v28 = vadd.f32 %v2491_v55, %v2477_v59  ;;  %v2576_v27 = vpop.permute.xlu0 %2575 }
 0x3eb   : > { %v2226_v48 = vadd.f32 %v2224_v46, %v2210_v22  ;;  %v2227_v37 = vadd.f32 %v2225_v13, %v2211_v6  ;;  %v2508_v53 = vadd.f32 %v2506_v43, %v2492_v62  ;;  %v2509_v26 = vadd.f32 %v2507_v52, %v2493_v28  ;;  %v2592_v45 = vpop.permute.xlu1 %2591 }
 0x3ed   : > { %v2228_v34 = vadd.f32 %v2226_v48, %v2086_v25  ;;  %v2229_v30 = vadd.f32 %v2227_v37, %v2087_v54  ;;  %v2624_v55 = vpop.permute.xlu0 %2623 }
 0x3ef   : > { %v2368_v35 = vadd.f32 %v4013_v0, %v2228_v34  ;;  %v2369_v23 = vadd.f32 %v4015_v50, %v2229_v30 }
 0x3f1   : > { %v2510_v41 = vadd.f32 %v2508_v53, %v2368_v35  ;;  %v2511_v57 = vadd.f32 %v2509_v26, %v2369_v23 }
 0x3f3   : > { %v2518_v32 = vadd.f32 %v2516_v47, %v2510_v41  ;;  %v2519_v15 = vadd.f32 %v2516_v47, %v2511_v57  ;;  %v2888_v57 = vld [vmem:[%s3027_s28] sm:$0xff] }
 0x3f5   : > { %vm2520_vm2 = vcmp.ge.f32.partialorder %v2518_v32, 0.0  ;;  %vm2521_vm3 = vcmp.ge.f32.partialorder %v2519_v15, 0.0  ;;  %v2522_v29 = vmul.f32 0.2, %v2518_v32  ;;  %v2523_v60 = vmul.f32 0.2, %v2519_v15 }
 0x3f7   : > { %v2524_v44 = vsel %vm2520_vm2, %v2518_v32, %v2522_v29  ;;  %v2525_v39 = vsel %vm2521_vm3, %v2519_v15, %v2523_v60  ;;  %v4452_v32 = vld [vmem:[#allocation2_spill] sm:$0xff] }
 0x3f8   : > { %v2539_v25 = vrot.slane %v2525_v39, %v3073_v7  ;;  %v2535_v54 = vrot.slane %v2524_v44, %v3073_v7  ;;  %v2549_v0 = vrot.slane %v2524_v44, %v3077_v11  ;;  %v2553_v50 = vrot.slane %v2525_v39, %v3077_v11  ;;  %v2608_v7 = vpop.permute.xlu1 %2607 }
 0x3f9   : > { %v2585_v9 = vrot.slane %v2525_v39, %v3085_v18  ;;  %v2581_v5 = vrot.slane %v2524_v44, %v3085_v18  ;;  %v2565_v47 = vrot.slane %v2524_v44, %v3081_v16  ;;  %v2569_v42 = vrot.slane %v2525_v39, %v3081_v16 }
 0x3fa   : > { %v2540_v38 = vmul.f32 %v2535_v54, %v2530_v3  ;;  %v2541_v20 = vmul.f32 %v2539_v25, %v2530_v3  ;;  %v2554_v2 = vmul.f32 %v2549_v0, %v2544_v61  ;;  %v2555_v24 = vmul.f32 %v2553_v50, %v2544_v61 }
 0x3fb   : > { %v2570_v31 = vmul.f32 %v2565_v47, %v2560_v56  ;;  %v2571_v63 = vmul.f32 %v2569_v42, %v2560_v56  ;;  %v2597_v11 = vrot.slane %v2524_v44, %v3075_v8  ;;  %v2601_v59 = vrot.slane %v2525_v39, %v3075_v8 }
 0x3fc   : > { %v2556_v51 = vadd.f32 %v2554_v2, %v2540_v38  ;;  %v2557_v58 = vadd.f32 %v2555_v24, %v2541_v20  ;;  %v2586_v4 = vmul.f32 %v2581_v5, %v2576_v27  ;;  %v2587_v21 = vmul.f32 %v2585_v9, %v2576_v27  ;;  %v2640_v8 = vpop.permute.xlu1 %2639 }
 0x3fd   : > { %v2613_v18 = vrot.slane %v2524_v44, %v3079_v12  ;;  %v2617_v33 = vrot.slane %v2525_v39, %v3079_v12  ;;  %v2602_v40 = vmul.f32 %v2597_v11, %v2592_v45  ;;  %v2603_v14 = vmul.f32 %v2601_v59, %v2592_v45 }
 0x3fe   : > { %v2572_v49 = vadd.f32 %v2570_v31, %v2556_v51  ;;  %v2573_v36 = vadd.f32 %v2571_v63, %v2557_v58  ;;  %v2633_v16 = vrot.slane %v2525_v39, %v3083_v17  ;;  %v2629_v10 = vrot.slane %v2524_v44, %v3083_v17 }
 0x3ff   : > { %v2618_v22 = vmul.f32 %v2613_v18, %v2608_v7  ;;  %v2619_v6 = vmul.f32 %v2617_v33, %v2608_v7  ;;  %v2645_v13 = vrot.slane %v2524_v44, %v3087_v19  ;;  %v2649_v12 = vrot.slane %v2525_v39, %v3087_v19 }
 0x400   : > { %v2588_v43 = vadd.f32 %v2586_v4, %v2572_v49  ;;  %v2589_v52 = vadd.f32 %v2587_v21, %v2573_v36  ;;  %v2634_v62 = vmul.f32 %v2629_v10, %v2624_v55  ;;  %v2635_v28 = vmul.f32 %v2633_v16, %v2624_v55  ;;  %v2658_v34 = vpop.permute.xlu1 %2657 }
 0x401   : > { %v2650_v61 = vmul.f32 %v2645_v13, %v2640_v8  ;;  %v2651_v17 = vmul.f32 %v2649_v12, %v2640_v8 }
 0x402   : > { %v2604_v1 = vadd.f32 %v2602_v40, %v2588_v43  ;;  %v2605_v46 = vadd.f32 %v2603_v14, %v2589_v52 }
 0x404   : > { %v2620_v48 = vadd.f32 %v2618_v22, %v2604_v1  ;;  %v2621_v37 = vadd.f32 %v2619_v6, %v2605_v46 }
 0x406   : > { %v2636_v53 = vadd.f32 %v2634_v62, %v2620_v48  ;;  %v2637_v26 = vadd.f32 %v2635_v28, %v2621_v37 }
 0x408   : > { %v2652_v30 = vadd.f32 %v2650_v61, %v2636_v53  ;;  %v2653_v35 = vadd.f32 %v2651_v17, %v2637_v26 }
 0x40a   : > { %v2660_v23 = vadd.f32 %v2658_v34, %v2652_v30  ;;  %v2661_v41 = vadd.f32 %v2658_v34, %v2653_v35 }
 0x40c   : > { %v2662_v56 = vadd.f32 %v2888_v57, %v2660_v23  ;;  %v2663_v15 = vadd.f32 %v2661_v41, %v4452_v32 }
 0x40e   : > { %v2666_v19 = vcombine.low %v2662_v56, %v2663_v15 }
 0x410   : > { %2668 = vst [vmem:[%s467_s26] sm:$0xff] %v2666_v19 }
 0x411 PF: > { %s24_s29 = sadd.s32 1, %s2895_s29  }
 0x412   : > { %p21_p4 = scmp.ge.s32.totalorder %s24_s29, 4  }
 0x414   :  { %23 = sbr.rel (!%p21_p4) target bundleno = 1 (0x1), region = 114 }

</bundles_post_ra>
